<compile_context>
chip_gen: v7x
topology: tpu7x:2x2x1
jax: 0.10.0
libtpu: 0.0.40
codegen_flags: <defaults>
</compile_context>

<pallas_src>
import functools

import jax
import jax.numpy as jnp
import numpy as np
from jax.experimental import pallas as pl
from jax.experimental.pallas import tpu as pltpu

KH = KW = 3  # kernel_size = 3, padding = 1, stride = 1


# --------------------------------------------------------------------------- #
# Kernel helpers.  Only Mosaic-safe ops: static slices, concats along any axis,
# and reshapes that never change the minor (lane) dimension.
# --------------------------------------------------------------------------- #
def _pad_spatial(x):
    """(B, H, W, C) -> (B, H+2, W+2, C) with a zero border (padding=1)."""
    b, h, w, c = x.shape
    zrow = jnp.zeros((b, 1, w, c), x.dtype)
    x = jnp.concatenate([zrow, x, zrow], axis=1)          # pad H (untiled dim)
    zcol = jnp.zeros((b, h + 2, 1, c), x.dtype)
    return jnp.concatenate([zcol, x, zcol], axis=2)       # pad W (sublane dim)


def _im2col(xp, h, w):
    """Padded (B, Hp, Wp, C) -> (B*h*w, KH*KW*C); columns ordered (dy, dx, c)."""
    b, _, _, c = xp.shape
    taps = [xp[:, dy:dy + h, dx:dx + w, :].reshape(b * h * w, c)
            for dy in range(KH) for dx in range(KW)]
    return jnp.concatenate(taps, axis=-1)


def _resid_block_kernel(x_ref, wxr_ref, bxr_ref, w2_ref, b2_ref, out_ref):
    """Fused ResidBlock forward for one batch block.

    x_ref   : (B, H, W, Cin)    bf16  unpadded NHWC input block
    wxr_ref : (9*Cin, C0 + C1)  bf16  [conv1 | resid_conv] taps, rows (dy, dx, ci)
    bxr_ref : (1, C0 + C1)      f32   [b1 | br]
    w2_ref  : (9*C0, C1)        bf16  conv2 taps, rows (dy, dx, c0)
    b2_ref  : (1, C1)           f32
    out_ref : (B, H, W*C1)      f32   lane-dense output slab
    """
    B, H, W, _ = x_ref.shape
    C1 = w2_ref.shape[1]
    C0 = w2_ref.shape[0] // (KH * KW)

    # ---- fused x sweep: conv1 and resid_conv share one im2col LHS and run as a
    #      single MXU contraction (K = 9*Cin, Nout = C0 + C1) ----
    xp = _pad_spatial(x_ref[...])                          # (B, H+2, W+2, Cin) bf16
    lhs_x = _im2col(xp, H, W)                              # (M, 9*Cin) bf16
    acc_x = jnp.dot(lhs_x, wxr_ref[...],
                    preferred_element_type=jnp.float32) + bxr_ref[...]
    h1 = jnp.maximum(acc_x[:, :C0], 0.0)                   # ConvLayer 1: +b1, ReLU
    resid = acc_x[:, C0:]                                  # resid_conv: +br, no act

    # ---- ConvLayer 2 over h1; LHS built directly from the fp32 h1 value
    #      (no padded VMEM scratch round trip) ----
    h1p = _pad_spatial(h1.reshape(B, H, W, C0))            # f32, minor dim kept
    lhs_h = _im2col(h1p, H, W).astype(w2_ref.dtype)        # (M, 9*C0) bf16
    out = jnp.dot(lhs_h, w2_ref[...],
                  preferred_element_type=jnp.float32) + b2_ref[...] + resid
    out = jnp.maximum(out, 0.0)                            # block ReLU (f32 epilogue)

    # ---- lane-dense store: (M, C1) -> (B, H, W*C1) via per-column lane concat
    #      (avoids a minor-dim-changing reshape; slab is a full 128-lane store) ----
    out4 = out.reshape(B, H, W, C1)
    out_ref[...] = jnp.concatenate([out4[:, :, i, :] for i in range(W)],
                                   axis=-1).astype(out_ref.dtype)


# --------------------------------------------------------------------------- #
# One-time weight packing (pure jnp, hoisted out of the forward).
# --------------------------------------------------------------------------- #
def pack_resid_block_params(params, mxu_dtype=jnp.bfloat16):
    """w1/w2/wr: (3, 3, Cin, Cout); b1/b2/br: (Cout,).

    conv1 and resid_conv read the same input, so their taps are packed side by
    side into one (9*Cin, C0+C1) matrix -> a single MXU contraction per step.
    """
    w1 = jnp.asarray(params["w1"], jnp.float32)
    w2 = jnp.asarray(params["w2"], jnp.float32)
    wr = jnp.asarray(params["wr"], jnp.float32)
    kh, kw, cin, c0 = w1.shape
    c1 = wr.shape[-1]
    wxr = (jnp.concatenate([w1, wr], axis=-1)
           .reshape(kh * kw * cin, c0 + c1).astype(mxu_dtype))
    w2p = w2.reshape(kh * kw * c0, c1).astype(mxu_dtype)
    bxr = jnp.concatenate([jnp.asarray(params["b1"], jnp.float32),
                           jnp.asarray(params["br"], jnp.float32)])[None, :]
    b2 = jnp.asarray(params["b2"], jnp.float32)[None, :]
    return {"wxr": wxr, "bxr": bxr, "w2": w2p, "b2": b2}


# --------------------------------------------------------------------------- #
# Generation-aware tiling / VMEM budgeting.
# --------------------------------------------------------------------------- #
@functools.lru_cache(maxsize=None)
def _tpu_cores_and_vmem():
    """(TensorCores to split the grid over, per-core VMEM capacity in bytes)."""
    try:
        kind = jax.devices()[0].device_kind.lower()
    except Exception:  # pragma: no cover
        kind = ""
    if ("v5 lite" in kind or "v5e" in kind or "v6 lite" in kind or "v6e" in kind):
        return 1, 128 * 1024 * 1024      # single TensorCore, 128 MiB VMEM
    if "v7" in kind or "7x" in kind:
        return 2, 64 * 1024 * 1024       # 2 TensorCores per chip, 64 MiB VMEM
    return 2, 64 * 1024 * 1024           # unknown: conservative default


def _padded_bytes(shape, itemsize):
    """VMEM footprint of an array after native (sublane, lane) tile padding."""
    shape = tuple(int(s) for s in shape)
    if len(shape) < 2:
        shape = (1,) * (2 - len(shape)) + shape
    lead = int(np.prod(shape[:-2], dtype=np.int64)) if len(shape) > 2 else 1
    sublane = 32 // itemsize                        # 8 rows f32, 16 rows bf16
    rows = -(-shape[-2] // sublane) * sublane
    cols = -(-shape[-1] // 128) * 128
    return int(lead * rows * cols * itemsize)


def _per_batch_vmem_bytes(h, w, cin, c0, c1):
    """Rough per-batch-element VMEM need of one grid step (blocks + live values)."""
    hp, wp, m, kk = h + 2, w + 2, h * w, KH * KW
    b = 2 * _padded_bytes((h, w, cin), 2)           # double-buffered input block
    b += 2 * _padded_bytes((h, w * c1), 4)          # double-buffered output block
    b += _padded_bytes((hp, wp, cin), 2)            # padded x value
    b += _padded_bytes((hp, wp, c0), 4)             # padded h1 value
    b += _padded_bytes((m, kk * cin), 2)            # im2col LHS (x sweep)
    b += _padded_bytes((m, kk * c0), 4)             # im2col LHS (h1 sweep, f32)
    b += _padded_bytes((m, kk * c0), 2)             # ... and its bf16 cast
    b += 4 * _padded_bytes((m, c0 + c1), 4)         # acc / h1 / resid / out
    return b


def pick_batch_block(n, h, w, cin, c0, c1):
    """Largest divisor of n that fits the VMEM budget; on 1-TC chips prefer one
    big grid step, on 2-TC chips keep the step count divisible by 2."""
    cores, vmem_cap = _tpu_cores_and_vmem()
    budget = vmem_cap // 2
    per_batch = _per_batch_vmem_bytes(h, w, cin, c0, c1)
    fits = [d for d in range(1, n + 1) if n % d == 0 and 2 * d * per_batch <= budget]
    if not fits:
        return 1
    if cores <= 1:
        return max(fits)
    even = [d for d in fits if (n // d) % cores == 0]
    return max(even) if even else max(fits)


# --------------------------------------------------------------------------- #
# Forward.
# --------------------------------------------------------------------------- #
@functools.partial(jax.jit, static_argnames=("batch_block", "out_format"))
def resid_block_forward(x_nchw, packed, batch_block=1, out_format="NCHW"):
    """Pallas ResidBlock forward.  x_nchw: (N, Cin, H, W) f32 -> (N, C1, H, W)."""
    N, Cin, H, W = x_nchw.shape
    C1 = packed["w2"].shape[1]
    C0 = packed["w2"].shape[0] // (KH * KW)
    if packed["wxr"].shape != (KH * KW * Cin, C0 + C1):
        raise ValueError("packed params do not match the input channel count")
    B = batch_block
    if N % B:
        raise ValueError(f"batch_block={B} must divide N={N}")

    # NCHW -> NHWC, bf16 MXU operands.  Spatial zero-padding happens inside the
    # kernel, so no padded copy of the input is materialized in HBM.
    x_nhwc = jnp.transpose(x_nchw, (0, 2, 3, 1)).astype(jnp.bfloat16)

    _, vmem_cap = _tpu_cores_and_vmem()
    per_batch = _per_batch_vmem_bytes(H, W, Cin, C0, C1)
    w_bytes = sum(_padded_bytes(v.shape, v.dtype.itemsize) for v in packed.values())
    need = w_bytes + 2 * per_batch * B + (8 << 20)
    vmem_limit = int(max(32 << 20, min(need, int(0.7 * vmem_cap))))

    flops = 2 * N * H * W * KH * KW * (Cin * (C0 + C1) + C0 * C1)
    bytes_accessed = (N * H * W * Cin * 2 + N * H * W * C1 * 4
                      + sum(int(np.prod(v.shape)) * v.dtype.itemsize
                            for v in packed.values()))

    out_rows = pl.pallas_call(
        _resid_block_kernel,
        out_shape=jax.ShapeDtypeStruct((N, H, W * C1), jnp.float32),
        grid=(N // B,),
        in_specs=[
            pl.BlockSpec((B, H, W, Cin), lambda n: (n, 0, 0, 0)),
            pl.BlockSpec(packed["wxr"].shape, lambda n: (0, 0)),
            pl.BlockSpec(packed["bxr"].shape, lambda n: (0, 0)),
            pl.BlockSpec(packed["w2"].shape, lambda n: (0, 0)),
            pl.BlockSpec(packed["b2"].shape, lambda n: (0, 0)),
        ],
        out_specs=pl.BlockSpec((B, H, W * C1), lambda n: (n, 0, 0)),
        compiler_params=pltpu.CompilerParams(
            dimension_semantics=("parallel",),
            vmem_limit_bytes=vmem_limit),
        cost_estimate=pl.CostEstimate(
            flops=flops, transcendentals=0, bytes_accessed=bytes_accessed),
    )(x_nhwc, packed["wxr"], packed["bxr"], packed["w2"], packed["b2"])

    out_nhwc = out_rows.reshape(N, H, W, C1)
    if out_format == "NHWC":
        return out_nhwc.astype(x_nchw.dtype)        # skip the NCHW HBM round trip
    return jnp.transpose(out_nhwc, (0, 3, 1, 2)).astype(x_nchw.dtype)


# --------------------------------------------------------------------------- #
# Pure-JAX (XLA) fp32 reference matching the PyTorch ResidBlock forward.
# --------------------------------------------------------------------------- #
def resid_block_reference(x_nchw, params):
    def conv(x, w, b):  # w: (3, 3, Cin, Cout)
        w_oihw = jnp.transpose(w, (3, 2, 0, 1))
        y = jax.lax.conv_general_dilated(
            x, w_oihw, window_strides=(1, 1), padding=((1, 1), (1, 1)),
            dimension_numbers=("NCHW", "OIHW", "NCHW"),
            precision=jax.lax.Precision.HIGHEST)
        return y + b[None, :, None, None]

    h1 = jax.nn.relu(conv(x_nchw, params["w1"], params["b1"]))
    h2 = conv(h1, params["w2"], params["b2"])
    r = conv(x_nchw, params["wr"], params["br"])
    return jax.nn.relu(h2 + r)


if __name__ == "__main__":
    # ResidBlock(num_conv=2, in_channels=4, out_channels=8, kernel_size=3,
    # stride=1, dim=2, conv_bias=True, norm_layer=None, activation='relu').
    N, Cin, H, W = 2, 4, 16, 16
    C0 = C1 = 8

    key = jax.random.PRNGKey(0)
    kx, k1, k2, k3, k4, k5, k6 = jax.random.split(key, 7)
    x = jax.random.normal(kx, (N, Cin, H, W), jnp.float32)

    params = {
        "w1": 0.1 * jax.random.normal(k1, (KH, KW, Cin, C0), jnp.float32),
        "b1": 0.1 * jax.random.normal(k2, (C0,), jnp.float32),
        "w2": 0.1 * jax.random.normal(k3, (KH, KW, C0, C1), jnp.float32),
        "b2": 0.1 * jax.random.normal(k4, (C1,), jnp.float32),
        "wr": 0.1 * jax.random.normal(k5, (KH, KW, Cin, C1), jnp.float32),
        "br": 0.1 * jax.random.normal(k6, (C1,), jnp.float32),
    }
    # TODO(synk): norm_layer / drop_block variants of ConvLayer are not
    # instantiated here (config uses norm_layer=None, drop_block=False).

    packed = pack_resid_block_params(params)       # one-time packing (pure jnp)
    bb = pick_batch_block(N, H, W, Cin, C0, C1)    # generation-aware batch block

    out = jax.block_until_ready(resid_block_forward(x, packed, batch_block=bb))
    ref = jax.block_until_ready(resid_block_reference(x, params))

    # Kernel feeds bf16 operands to the MXU (fp32 accumulation); the reference is
    # pure fp32, so compare at a bf16-appropriate tolerance.
    np.testing.assert_allclose(np.asarray(out), np.asarray(ref),
                               rtol=2e-2, atol=2e-2)
    print("KERNEL_OK")
</pallas_src>

<mosaic_0001>
module attributes {stable_mosaic.version = 11 : i64} {
  func.func @_resid_block_kernel(%arg0: i32, %arg1: memref<1x16x16x4xbf16, #tpu.memory_space<vmem>>, %arg2: memref<36x16xbf16, #tpu.memory_space<vmem>>, %arg3: memref<1x16xf32, #tpu.memory_space<vmem>>, %arg4: memref<72x8xbf16, #tpu.memory_space<vmem>>, %arg5: memref<1x8xf32, #tpu.memory_space<vmem>>, %arg6: memref<1x16x128xf32, #tpu.memory_space<vmem>>) attributes {dimension_semantics = [#tpu.dimension_semantics<parallel>], iteration_bounds = array<i64: 2>, scalar_prefetch = 0 : i64, scratch_operands = 0 : i64, tpu.core_type = #tpu.core_type<tc>, window_params = [{transform_indices = @transform_0, window_bounds = array<i64: 1, 16, 16, 4>}, {pipeline_mode = #tpu.pipeline_mode<synchronous>, transform_indices = @transform_1, window_bounds = array<i64: 36, 16>}, {pipeline_mode = #tpu.pipeline_mode<synchronous>, transform_indices = @transform_2, window_bounds = array<i64: 1, 16>}, {pipeline_mode = #tpu.pipeline_mode<synchronous>, transform_indices = @transform_3, window_bounds = array<i64: 72, 8>}, {pipeline_mode = #tpu.pipeline_mode<synchronous>, transform_indices = @transform_4, window_bounds = array<i64: 1, 8>}, {transform_indices = @transform_5, window_bounds = array<i64: 1, 16, 128>}]} {
    %c0 = arith.constant 0 : index
    %c0_0 = arith.constant 0 : index
    %c0_1 = arith.constant 0 : index
    %c0_2 = arith.constant 0 : index
    %0 = vector.load %arg1[%c0, %c0_0, %c0_1, %c0_2] : memref<1x16x16x4xbf16, #tpu.memory_space<vmem>>, vector<1x16x16x4xbf16>
    %cst = arith.constant 0.000000e+00 : bf16
    %1 = vector.broadcast %cst : bf16 to vector<1x1x16x4xbf16>
    %2 = tpu.concatenate %1, %0, %1 in 1 : vector<1x1x16x4xbf16>, vector<1x16x16x4xbf16>, vector<1x1x16x4xbf16> -> vector<1x18x16x4xbf16>
    %cst_3 = arith.constant 0.000000e+00 : bf16
    %3 = vector.broadcast %cst_3 : bf16 to vector<1x18x1x4xbf16>
    %4 = tpu.concatenate %3, %2, %3 in 2 : vector<1x18x1x4xbf16>, vector<1x18x16x4xbf16>, vector<1x18x1x4xbf16> -> vector<1x18x18x4xbf16>
    %5 = vector.extract_strided_slice %4 {offsets = [0, 0, 0, 0], sizes = [1, 16, 16, 4], strides = [1, 1, 1, 1]} : vector<1x18x18x4xbf16> to vector<1x16x16x4xbf16>
    %6 = vector.shape_cast %5 : vector<1x16x16x4xbf16> to vector<256x4xbf16>
    %7 = vector.extract_strided_slice %4 {offsets = [0, 0, 1, 0], sizes = [1, 16, 16, 4], strides = [1, 1, 1, 1]} : vector<1x18x18x4xbf16> to vector<1x16x16x4xbf16>
    %8 = vector.shape_cast %7 : vector<1x16x16x4xbf16> to vector<256x4xbf16>
    %9 = vector.extract_strided_slice %4 {offsets = [0, 0, 2, 0], sizes = [1, 16, 16, 4], strides = [1, 1, 1, 1]} : vector<1x18x18x4xbf16> to vector<1x16x16x4xbf16>
    %10 = vector.shape_cast %9 : vector<1x16x16x4xbf16> to vector<256x4xbf16>
    %11 = vector.extract_strided_slice %4 {offsets = [0, 1, 0, 0], sizes = [1, 16, 16, 4], strides = [1, 1, 1, 1]} : vector<1x18x18x4xbf16> to vector<1x16x16x4xbf16>
    %12 = vector.shape_cast %11 : vector<1x16x16x4xbf16> to vector<256x4xbf16>
    %13 = vector.extract_strided_slice %4 {offsets = [0, 1, 1, 0], sizes = [1, 16, 16, 4], strides = [1, 1, 1, 1]} : vector<1x18x18x4xbf16> to vector<1x16x16x4xbf16>
    %14 = vector.shape_cast %13 : vector<1x16x16x4xbf16> to vector<256x4xbf16>
    %15 = vector.extract_strided_slice %4 {offsets = [0, 1, 2, 0], sizes = [1, 16, 16, 4], strides = [1, 1, 1, 1]} : vector<1x18x18x4xbf16> to vector<1x16x16x4xbf16>
    %16 = vector.shape_cast %15 : vector<1x16x16x4xbf16> to vector<256x4xbf16>
    %17 = vector.extract_strided_slice %4 {offsets = [0, 2, 0, 0], sizes = [1, 16, 16, 4], strides = [1, 1, 1, 1]} : vector<1x18x18x4xbf16> to vector<1x16x16x4xbf16>
    %18 = vector.shape_cast %17 : vector<1x16x16x4xbf16> to vector<256x4xbf16>
    %19 = vector.extract_strided_slice %4 {offsets = [0, 2, 1, 0], sizes = [1, 16, 16, 4], strides = [1, 1, 1, 1]} : vector<1x18x18x4xbf16> to vector<1x16x16x4xbf16>
    %20 = vector.shape_cast %19 : vector<1x16x16x4xbf16> to vector<256x4xbf16>
    %21 = vector.extract_strided_slice %4 {offsets = [0, 2, 2, 0], sizes = [1, 16, 16, 4], strides = [1, 1, 1, 1]} : vector<1x18x18x4xbf16> to vector<1x16x16x4xbf16>
    %22 = vector.shape_cast %21 : vector<1x16x16x4xbf16> to vector<256x4xbf16>
    %23 = tpu.concatenate %6, %8, %10, %12, %14, %16, %18, %20, %22 in 1 : vector<256x4xbf16>, vector<256x4xbf16>, vector<256x4xbf16>, vector<256x4xbf16>, vector<256x4xbf16>, vector<256x4xbf16>, vector<256x4xbf16>, vector<256x4xbf16>, vector<256x4xbf16> -> vector<256x36xbf16>
    %c0_4 = arith.constant 0 : index
    %c0_5 = arith.constant 0 : index
    %24 = vector.load %arg2[%c0_4, %c0_5] : memref<36x16xbf16, #tpu.memory_space<vmem>>, vector<36x16xbf16>
    %cst_6 = arith.constant dense<0.000000e+00> : vector<256x16xf32>
    %25 = tpu.matmul %23, %24, %cst_6 {dimension_numbers = #tpu.dot_dimension_numbers<[1], [0], [0], [1], [0, 0, 1, 1], [], []>} : vector<256x36xbf16>, vector<36x16xbf16>, vector<256x16xf32> -> vector<256x16xf32>
    %c0_7 = arith.constant 0 : index
    %c0_8 = arith.constant 0 : index
    %26 = vector.load %arg3[%c0_7, %c0_8] : memref<1x16xf32, #tpu.memory_space<vmem>>, vector<1x16xf32>
    %27 = vector.broadcast %26 : vector<1x16xf32> to vector<256x16xf32>
    %28 = arith.addf %25, %27 : vector<256x16xf32>
    %29 = vector.extract_strided_slice %28 {offsets = [0, 0], sizes = [256, 8], strides = [1, 1]} : vector<256x16xf32> to vector<256x8xf32>
    %cst_9 = arith.constant 0.000000e+00 : f32
    %30 = vector.broadcast %cst_9 : f32 to vector<256x8xf32>
    %31 = arith.maximumf %29, %30 : vector<256x8xf32>
    %32 = vector.extract_strided_slice %28 {offsets = [0, 8], sizes = [256, 8], strides = [1, 1]} : vector<256x16xf32> to vector<256x8xf32>
    %33 = vector.shape_cast %31 : vector<256x8xf32> to vector<1x16x16x8xf32>
    %cst_10 = arith.constant 0.000000e+00 : f32
    %34 = vector.broadcast %cst_10 : f32 to vector<1x1x16x8xf32>
    %35 = tpu.concatenate %34, %33, %34 in 1 : vector<1x1x16x8xf32>, vector<1x16x16x8xf32>, vector<1x1x16x8xf32> -> vector<1x18x16x8xf32>
    %cst_11 = arith.constant 0.000000e+00 : f32
    %36 = vector.broadcast %cst_11 : f32 to vector<1x18x1x8xf32>
    %37 = tpu.concatenate %36, %35, %36 in 2 : vector<1x18x1x8xf32>, vector<1x18x16x8xf32>, vector<1x18x1x8xf32> -> vector<1x18x18x8xf32>
    %38 = vector.extract_strided_slice %37 {offsets = [0, 0, 0, 0], sizes = [1, 16, 16, 8], strides = [1, 1, 1, 1]} : vector<1x18x18x8xf32> to vector<1x16x16x8xf32>
    %39 = vector.shape_cast %38 : vector<1x16x16x8xf32> to vector<256x8xf32>
    %40 = vector.extract_strided_slice %37 {offsets = [0, 0, 1, 0], sizes = [1, 16, 16, 8], strides = [1, 1, 1, 1]} : vector<1x18x18x8xf32> to vector<1x16x16x8xf32>
    %41 = vector.shape_cast %40 : vector<1x16x16x8xf32> to vector<256x8xf32>
    %42 = vector.extract_strided_slice %37 {offsets = [0, 0, 2, 0], sizes = [1, 16, 16, 8], strides = [1, 1, 1, 1]} : vector<1x18x18x8xf32> to vector<1x16x16x8xf32>
    %43 = vector.shape_cast %42 : vector<1x16x16x8xf32> to vector<256x8xf32>
    %44 = vector.extract_strided_slice %37 {offsets = [0, 1, 0, 0], sizes = [1, 16, 16, 8], strides = [1, 1, 1, 1]} : vector<1x18x18x8xf32> to vector<1x16x16x8xf32>
    %45 = vector.shape_cast %44 : vector<1x16x16x8xf32> to vector<256x8xf32>
    %46 = vector.extract_strided_slice %37 {offsets = [0, 1, 1, 0], sizes = [1, 16, 16, 8], strides = [1, 1, 1, 1]} : vector<1x18x18x8xf32> to vector<1x16x16x8xf32>
    %47 = vector.shape_cast %46 : vector<1x16x16x8xf32> to vector<256x8xf32>
    %48 = vector.extract_strided_slice %37 {offsets = [0, 1, 2, 0], sizes = [1, 16, 16, 8], strides = [1, 1, 1, 1]} : vector<1x18x18x8xf32> to vector<1x16x16x8xf32>
    %49 = vector.shape_cast %48 : vector<1x16x16x8xf32> to vector<256x8xf32>
    %50 = vector.extract_strided_slice %37 {offsets = [0, 2, 0, 0], sizes = [1, 16, 16, 8], strides = [1, 1, 1, 1]} : vector<1x18x18x8xf32> to vector<1x16x16x8xf32>
    %51 = vector.shape_cast %50 : vector<1x16x16x8xf32> to vector<256x8xf32>
    %52 = vector.extract_strided_slice %37 {offsets = [0, 2, 1, 0], sizes = [1, 16, 16, 8], strides = [1, 1, 1, 1]} : vector<1x18x18x8xf32> to vector<1x16x16x8xf32>
    %53 = vector.shape_cast %52 : vector<1x16x16x8xf32> to vector<256x8xf32>
    %54 = vector.extract_strided_slice %37 {offsets = [0, 2, 2, 0], sizes = [1, 16, 16, 8], strides = [1, 1, 1, 1]} : vector<1x18x18x8xf32> to vector<1x16x16x8xf32>
    %55 = vector.shape_cast %54 : vector<1x16x16x8xf32> to vector<256x8xf32>
    %56 = tpu.concatenate %39, %41, %43, %45, %47, %49, %51, %53, %55 in 1 : vector<256x8xf32>, vector<256x8xf32>, vector<256x8xf32>, vector<256x8xf32>, vector<256x8xf32>, vector<256x8xf32>, vector<256x8xf32>, vector<256x8xf32>, vector<256x8xf32> -> vector<256x72xf32>
    %57 = arith.truncf %56 : vector<256x72xf32> to vector<256x72xbf16>
    %c0_12 = arith.constant 0 : index
    %c0_13 = arith.constant 0 : index
    %58 = vector.load %arg4[%c0_12, %c0_13] : memref<72x8xbf16, #tpu.memory_space<vmem>>, vector<72x8xbf16>
    %cst_14 = arith.constant dense<0.000000e+00> : vector<256x8xf32>
    %59 = tpu.matmul %57, %58, %cst_14 {dimension_numbers = #tpu.dot_dimension_numbers<[1], [0], [0], [1], [0, 0, 1, 1], [], []>} : vector<256x72xbf16>, vector<72x8xbf16>, vector<256x8xf32> -> vector<256x8xf32>
    %c0_15 = arith.constant 0 : index
    %c0_16 = arith.constant 0 : index
    %60 = vector.load %arg5[%c0_15, %c0_16] : memref<1x8xf32, #tpu.memory_space<vmem>>, vector<1x8xf32>
    %61 = vector.broadcast %60 : vector<1x8xf32> to vector<256x8xf32>
    %62 = arith.addf %59, %61 : vector<256x8xf32>
    %63 = arith.addf %62, %32 : vector<256x8xf32>
    %cst_17 = arith.constant 0.000000e+00 : f32
    %64 = vector.broadcast %cst_17 : f32 to vector<256x8xf32>
    %65 = arith.maximumf %63, %64 : vector<256x8xf32>
    %66 = vector.shape_cast %65 : vector<256x8xf32> to vector<1x16x16x8xf32>
    %67 = vector.extract_strided_slice %66 {offsets = [0, 0, 0, 0], sizes = [1, 16, 1, 8], strides = [1, 1, 1, 1]} : vector<1x16x16x8xf32> to vector<1x16x1x8xf32>
    %68 = vector.shape_cast %67 : vector<1x16x1x8xf32> to vector<1x16x8xf32>
    %69 = vector.extract_strided_slice %66 {offsets = [0, 0, 1, 0], sizes = [1, 16, 1, 8], strides = [1, 1, 1, 1]} : vector<1x16x16x8xf32> to vector<1x16x1x8xf32>
    %70 = vector.shape_cast %69 : vector<1x16x1x8xf32> to vector<1x16x8xf32>
    %71 = vector.extract_strided_slice %66 {offsets = [0, 0, 2, 0], sizes = [1, 16, 1, 8], strides = [1, 1, 1, 1]} : vector<1x16x16x8xf32> to vector<1x16x1x8xf32>
    %72 = vector.shape_cast %71 : vector<1x16x1x8xf32> to vector<1x16x8xf32>
    %73 = vector.extract_strided_slice %66 {offsets = [0, 0, 3, 0], sizes = [1, 16, 1, 8], strides = [1, 1, 1, 1]} : vector<1x16x16x8xf32> to vector<1x16x1x8xf32>
    %74 = vector.shape_cast %73 : vector<1x16x1x8xf32> to vector<1x16x8xf32>
    %75 = vector.extract_strided_slice %66 {offsets = [0, 0, 4, 0], sizes = [1, 16, 1, 8], strides = [1, 1, 1, 1]} : vector<1x16x16x8xf32> to vector<1x16x1x8xf32>
    %76 = vector.shape_cast %75 : vector<1x16x1x8xf32> to vector<1x16x8xf32>
    %77 = vector.extract_strided_slice %66 {offsets = [0, 0, 5, 0], sizes = [1, 16, 1, 8], strides = [1, 1, 1, 1]} : vector<1x16x16x8xf32> to vector<1x16x1x8xf32>
    %78 = vector.shape_cast %77 : vector<1x16x1x8xf32> to vector<1x16x8xf32>
    %79 = vector.extract_strided_slice %66 {offsets = [0, 0, 6, 0], sizes = [1, 16, 1, 8], strides = [1, 1, 1, 1]} : vector<1x16x16x8xf32> to vector<1x16x1x8xf32>
    %80 = vector.shape_cast %79 : vector<1x16x1x8xf32> to vector<1x16x8xf32>
    %81 = vector.extract_strided_slice %66 {offsets = [0, 0, 7, 0], sizes = [1, 16, 1, 8], strides = [1, 1, 1, 1]} : vector<1x16x16x8xf32> to vector<1x16x1x8xf32>
    %82 = vector.shape_cast %81 : vector<1x16x1x8xf32> to vector<1x16x8xf32>
    %83 = vector.extract_strided_slice %66 {offsets = [0, 0, 8, 0], sizes = [1, 16, 1, 8], strides = [1, 1, 1, 1]} : vector<1x16x16x8xf32> to vector<1x16x1x8xf32>
    %84 = vector.shape_cast %83 : vector<1x16x1x8xf32> to vector<1x16x8xf32>
    %85 = vector.extract_strided_slice %66 {offsets = [0, 0, 9, 0], sizes = [1, 16, 1, 8], strides = [1, 1, 1, 1]} : vector<1x16x16x8xf32> to vector<1x16x1x8xf32>
    %86 = vector.shape_cast %85 : vector<1x16x1x8xf32> to vector<1x16x8xf32>
    %87 = vector.extract_strided_slice %66 {offsets = [0, 0, 10, 0], sizes = [1, 16, 1, 8], strides = [1, 1, 1, 1]} : vector<1x16x16x8xf32> to vector<1x16x1x8xf32>
    %88 = vector.shape_cast %87 : vector<1x16x1x8xf32> to vector<1x16x8xf32>
    %89 = vector.extract_strided_slice %66 {offsets = [0, 0, 11, 0], sizes = [1, 16, 1, 8], strides = [1, 1, 1, 1]} : vector<1x16x16x8xf32> to vector<1x16x1x8xf32>
    %90 = vector.shape_cast %89 : vector<1x16x1x8xf32> to vector<1x16x8xf32>
    %91 = vector.extract_strided_slice %66 {offsets = [0, 0, 12, 0], sizes = [1, 16, 1, 8], strides = [1, 1, 1, 1]} : vector<1x16x16x8xf32> to vector<1x16x1x8xf32>
    %92 = vector.shape_cast %91 : vector<1x16x1x8xf32> to vector<1x16x8xf32>
    %93 = vector.extract_strided_slice %66 {offsets = [0, 0, 13, 0], sizes = [1, 16, 1, 8], strides = [1, 1, 1, 1]} : vector<1x16x16x8xf32> to vector<1x16x1x8xf32>
    %94 = vector.shape_cast %93 : vector<1x16x1x8xf32> to vector<1x16x8xf32>
    %95 = vector.extract_strided_slice %66 {offsets = [0, 0, 14, 0], sizes = [1, 16, 1, 8], strides = [1, 1, 1, 1]} : vector<1x16x16x8xf32> to vector<1x16x1x8xf32>
    %96 = vector.shape_cast %95 : vector<1x16x1x8xf32> to vector<1x16x8xf32>
    %97 = vector.extract_strided_slice %66 {offsets = [0, 0, 15, 0], sizes = [1, 16, 1, 8], strides = [1, 1, 1, 1]} : vector<1x16x16x8xf32> to vector<1x16x1x8xf32>
    %98 = vector.shape_cast %97 : vector<1x16x1x8xf32> to vector<1x16x8xf32>
    %99 = tpu.concatenate %68, %70, %72, %74, %76, %78, %80, %82, %84, %86, %88, %90, %92, %94, %96, %98 in 2 : vector<1x16x8xf32>, vector<1x16x8xf32>, vector<1x16x8xf32>, vector<1x16x8xf32>, vector<1x16x8xf32>, vector<1x16x8xf32>, vector<1x16x8xf32>, vector<1x16x8xf32>, vector<1x16x8xf32>, vector<1x16x8xf32>, vector<1x16x8xf32>, vector<1x16x8xf32>, vector<1x16x8xf32>, vector<1x16x8xf32>, vector<1x16x8xf32>, vector<1x16x8xf32> -> vector<1x16x128xf32>
    %c0_18 = arith.constant 0 : index
    %c0_19 = arith.constant 0 : index
    %c0_20 = arith.constant 0 : index
    %100 = vector.load %arg6[%c0_18, %c0_19, %c0_20] : memref<1x16x128xf32, #tpu.memory_space<vmem>>, vector<1x16x128xf32>
    tpu.vector_store %arg6[%c0_18, %c0_19, %c0_20], %99 {strides = array<i32>} : memref<1x16x128xf32, #tpu.memory_space<vmem>>, vector<1x16x128xf32>,
    return
  }
  func.func @transform_0(%arg0: i32) -> (i32, i32, i32, i32) {
    %c0_i32 = arith.constant 0 : i32
    %c0_i32_0 = arith.constant 0 : i32
    %c0_i32_1 = arith.constant 0 : i32
    %c0_i32_2 = arith.constant 0 : i32
    return %arg0, %c0_i32, %c0_i32_0, %c0_i32_1 : i32, i32, i32, i32
  }
  func.func @transform_1(%arg0: i32) -> (i32, i32) {
    %c0_i32 = arith.constant 0 : i32
    %c0_i32_0 = arith.constant 0 : i32
    %c0_i32_1 = arith.constant 0 : i32
    return %c0_i32, %c0_i32_0 : i32, i32
  }
  func.func @transform_2(%arg0: i32) -> (i32, i32) {
    %c0_i32 = arith.constant 0 : i32
    %c0_i32_0 = arith.constant 0 : i32
    %c0_i32_1 = arith.constant 0 : i32
    return %c0_i32, %c0_i32_0 : i32, i32
  }
  func.func @transform_3(%arg0: i32) -> (i32, i32) {
    %c0_i32 = arith.constant 0 : i32
    %c0_i32_0 = arith.constant 0 : i32
    %c0_i32_1 = arith.constant 0 : i32
    return %c0_i32, %c0_i32_0 : i32, i32
  }
  func.func @transform_4(%arg0: i32) -> (i32, i32) {
    %c0_i32 = arith.constant 0 : i32
    %c0_i32_0 = arith.constant 0 : i32
    %c0_i32_1 = arith.constant 0 : i32
    return %c0_i32, %c0_i32_0 : i32, i32
  }
  func.func @transform_5(%arg0: i32) -> (i32, i32, i32) {
    %c0_i32 = arith.constant 0 : i32
    %c0_i32_0 = arith.constant 0 : i32
    %c0_i32_1 = arith.constant 0 : i32
    return %arg0, %c0_i32, %c0_i32_0 : i32, i32, i32
  }
}

</mosaic_0001>

<bundles_post_ra>
// kernel: resid_block_forward.1
= control target key start
LH: loop header
LB: loop body
LE: loop exit
PB: predicated region body
PF: predicated region fallthrough
CT: control target
= control target key end

     0   :  { %s5081_s18 = smov 0   ;;  %s8556_s0 = inlined_call_operand.vmem [shape: bf16[2,16,16,4], index: 0, kind: input, shape index: {}]   ;;  %s8557_s1 = inlined_call_operand.vmem [shape: bf16[36,16], index: 1, kind: input, shape index: {}]   ;;  %s8558_s2 = inlined_call_operand.vmem [shape: f32[1,16], index: 2, kind: input, shape index: {}]   ;;  %s8559_s3 = inlined_call_operand.vmem [shape: bf16[72,8], index: 3, kind: input, shape index: {}]   ;;  %s8560_s4 = inlined_call_operand.vmem [shape: f32[1,8], index: 4, kind: input, shape index: {}]   ;;  %s8561_s5 = inlined_call_operand.vmem [shape: f32[2,16,128], index: 5, kind: output, shape index: {}]  }
   0x1 LB: > { %s4134_s19 = sadd.s32 4294967295, %s5028_s18   ;;  %p4138_p0 = scmp.ge.s32.totalorder %s5028_s18, 1  ;;  %s5028_s18 = sphi %s5081_s18, %s15_s18  }
   0x2   : > { %p187_p1 = scmp.lt.s32.totalorder %s5028_s18, 3 }
   0x4   : > { %p188_p2 = pnand %p4138_p0, %p187_p1 }
   0x6   : > { %191 = sbr.rel (%p188_p2) target bundleno = 1529 (0x5f9), region = 40 }
   0xd   : > { %vm491_vm0 = vcmask 1040384   ;;  %vm492_vm1 = vsmask.f32 256  ;;  %v5030_v0 = vmov 0   ;;  %p215_p3 = scmp.lt.s32.totalorder %s4134_s19, 1  ;;  %v5031_v13 = vmov 0.0  }
   0xe   : > { %v341_v1 = vrot.slane %v5030_v0, 7  ;;  %vm5090_vm2 = vmand %vm491_vm0, %vm492_vm1  ;;  %vm528_vm3 = vsmask.f32 7424  ;;  %v5115_v14 = vrot.slane %v5031_v13, 7  ;;  %s5032_s24 = smov 4   ;;  %vm753_vm4 = vcmask 1046528  }
   0xf   : > { %s8966_s19 = smov (!%p215_p3, %s4134_s19), 1  ;;  %s5033_s25 = smov 8   ;;  %vm1399_vm5 = vcmask 1041408   ;;  %vm1075_vm6 = vcmask 31744   ;;  %vm1108_vm7 = vcmask 64512   ;;  %vm1141_vm8 = vcmask 97280  }
  0x10   : > { %v5096_v3 = vsel %vm5090_vm2, 0, %v341_v1  ;;  %v5100_v4 = vsel %vm5090_vm2, %v341_v1, 0  ;;  %s4203_s20 = sshll.u32 %s8966_s19, 7  ;;  %8654 = vst [vmem:[#allocation3_spill] sm:$0xff] %v5115_v14  ;;  %s5034_s26 = smov 12   ;;  %vm1876_vm9 = vcmask 1045504  }
  0x11   : > { %8653 = vst [vmem:[#allocation2_spill] sm:$0xff] %v5096_v3  ;;  %v530_v5 = vshrl.u32 %v5096_v3, 16  ;;  %v532_v6 = vshll.u32 %v5096_v3, 16  ;;  %v537_v7 = vshll.u32 %v5100_v4, 16  ;;  %s5111_s23 = scalar_lea.vmem %s8556_s0, %s4203_s20  ;;  %s5035_s27 = smov 16   ;;  %vm1174_vm10 = vcmask 130048  }
  0x12   : > { %v4996_v10 = vld [vmem:[%s5111_s23 + $0x8] sm:$0xff]   ;;  %v4997_v12 = vld [vmem:[%s5111_s23] sm:$0xff]   ;;  %v4998_v20 = vld [vmem:[%s5111_s23 + $0x10] sm:$0xff]   ;;  %s5036_s28 = smov 20   ;;  %s5037_s29 = smov 24   ;;  %vm1207_vm11 = vcmask 162816  }
  0x13   : > { %v534_v8 = vrot.slane %v532_v6, 1  ;;  %v539_v9 = vrot.slane %v537_v7, 1  ;;  %v353_v15 = vshrl.u32 %v4996_v10, 16  ;;  %v356_v16 = vshll.u32 %v4996_v10, 16  ;;  %v4999_v21 = vld [vmem:[%s5111_s23 + $0x18] sm:$0xff]   ;;  %v5000_v23 = vld [vmem:[%s5111_s23 + $0x20] sm:$0xff]  }
  0x14   : > { %v346_v18 = vshrl.u32 %v4997_v12, 16  ;;  %v349_v19 = vshll.u32 %v4997_v12, 16  ;;  %v360_v25 = vshrl.u32 %v4998_v20, 16  ;;  %v363_v26 = vshll.u32 %v4998_v20, 16  ;;  %v5001_v52 = vld [vmem:[%s5111_s23 + $0x28] sm:$0xff]   ;;  %v5002_v1 = vld [vmem:[%s5111_s23 + $0x30] sm:$0xff]  }
  0x15   : > { %v535_v11 = vor.u32 %v534_v8, %v530_v5  ;;  %v355_v22 = vrot.slane %v353_v15, 7  ;;  %v367_v27 = vshrl.u32 %v4999_v21, 16  ;;  %v370_v30 = vshll.u32 %v4999_v21, 16  ;;  %s5038_s11 = smov 28   ;;  %s5039_s12 = smov 32  }
  0x16   : > { %v348_v24 = vrot.slane %v346_v18, 7  ;;  %v374_v31 = vshrl.u32 %v5000_v23, 16  ;;  %v362_v35 = vrot.slane %v360_v25, 7  ;;  %v377_v8 = vshll.u32 %v5000_v23, 16  ;;  %s5040_s15 = smov 48   ;;  %s5041_s16 = smov 40  }
  0x17   : > { %v5118_v17 = vsel %vm528_vm3, %v535_v11, %v539_v9  ;;  %v358_v28 = vor.u32 %v356_v16, %v355_v22  ;;  %v5127_v29 = vsel %vm5090_vm2, %v355_v22, 0  ;;  %v369_v38 = vrot.slane %v367_v27, 7  ;;  %v5003_v9 = vld [vmem:[%s5111_s23 + $0x38] sm:$0xff]   ;;  %s5042_s17 = smov 56   ;;  %s5043_s20 = smov 64  }
  0x18   : > { %8655 = vst [vmem:[#allocation4_spill] sm:$0xff] %v5118_v17  ;;  %819 = vrot.lane.b32.xlu0 %v5118_v17, %s5032_s24  ;;  %v561_v32 = vshll.u32 %v5127_v29, 16  ;;  %v351_v33 = vor.u32 %v349_v19, %v348_v24  ;;  %v5132_v34 = vsel %vm5090_vm2, %v348_v24, 0  ;;  %v376_v39 = vrot.slane %v374_v31, 7  ;;  %v5004_v24 = vld [vmem:[%s5111_s23 + $0x40] sm:$0xff]   ;;  %s5045_s21 = smov 112  }
  0x19   : > { %v5136_v36 = vsel %vm5090_vm2, 0, %v358_v28  ;;  %v549_v37 = vshll.u32 %v5132_v34, 16  ;;  %v365_v47 = vor.u32 %v363_v26, %v362_v35  ;;  %v5149_v49 = vsel %vm5090_vm2, %v362_v35, 0  ;;  %s5046_s22 = smov 72   ;;  %s5050_s6 = smov 104  }
  0x1a   : > { %v554_v40 = vshrl.u32 %v5136_v36, 16  ;;  %v556_v41 = vshll.u32 %v5136_v36, 16  ;;  %v563_v42 = vrot.slane %v561_v32, 1  ;;  %v5143_v43 = vsel %vm5090_vm2, 0, %v351_v33 }
  0x1b   : > { %v542_v44 = vshrl.u32 %v5143_v43, 16  ;;  %v544_v45 = vshll.u32 %v5143_v43, 16  ;;  %v551_v46 = vrot.slane %v549_v37, 1  ;;  %v372_v50 = vor.u32 %v370_v30, %v369_v38 }
  0x1c   : > { %v558_v48 = vrot.slane %v556_v41, 1  ;;  %v5153_v51 = vsel %vm5090_vm2, %v369_v38, 0  ;;  %v5158_v54 = vsel %vm5090_vm2, 0, %v365_v47  ;;  %v573_v55 = vshll.u32 %v5149_v49, 16 }
  0x1d   : > { %v546_v53 = vrot.slane %v544_v45, 1  ;;  %v585_v56 = vshll.u32 %v5153_v51, 16  ;;  %v566_v58 = vshrl.u32 %v5158_v54, 16  ;;  %v568_v59 = vshll.u32 %v5158_v54, 16 }
  0x1e   : > { %v559_v57 = vor.u32 %v558_v48, %v554_v40  ;;  %v5166_v60 = vsel %vm5090_vm2, 0, %v372_v50  ;;  %v575_v62 = vrot.slane %v573_v55, 1  ;;  %v5182_v12 = vsel %vm5090_vm2, %v376_v39, 0 }
  0x1f   : > { %v547_v61 = vor.u32 %v546_v53, %v542_v44  ;;  %v578_v63 = vshrl.u32 %v5166_v60, 16  ;;  %v580_v0 = vshll.u32 %v5166_v60, 16  ;;  %v570_v6 = vrot.slane %v568_v59, 1 }
  0x20   : > { %v5172_v5 = vsel %vm528_vm3, %v559_v57, %v563_v42  ;;  %v587_v7 = vrot.slane %v585_v56, 1  ;;  %v381_v13 = vshrl.u32 %v5001_v52, 16  ;;  %v379_v16 = vor.u32 %v377_v8, %v376_v39  ;;  %v5005_v56 = vld [vmem:[%s5111_s23 + $0x48] sm:$0xff]  }
  0x21   : > { %823 = vrot.lane.b32.xlu1 %v5172_v5, %s5032_s24  ;;  %v5178_v10 = vsel %vm528_vm3, %v547_v61, %v551_v46  ;;  %v582_v11 = vrot.slane %v580_v0, 1  ;;  %v571_v15 = vor.u32 %v570_v6, %v566_v58  ;;  %v597_v18 = vshll.u32 %v5182_v12, 16  ;;  %v5006_v6 = vld [vmem:[%s5111_s23 + $0x50] sm:$0xff]  }
  0x22   : > { %821 = vrot.lane.b32.xlu0 %v5178_v10, %s5032_s24  ;;  %v384_v19 = vshll.u32 %v5001_v52, 16  ;;  %v383_v21 = vrot.slane %v381_v13, 7  ;;  %v388_v22 = vshrl.u32 %v5002_v1, 16  ;;  %v391_v23 = vshll.u32 %v5002_v1, 16  ;;  %v5007_v13 = vld [vmem:[%s5111_s23 + $0x58] sm:$0xff]  }
  0x23   : > { %v583_v20 = vor.u32 %v582_v11, %v578_v63  ;;  %v5189_v25 = vsel %vm528_vm3, %v571_v15, %v575_v62  ;;  %v5193_v26 = vsel %vm5090_vm2, 0, %v379_v16  ;;  %v599_v27 = vrot.slane %v597_v18, 1 }
  0x24   : > { %v395_v28 = vshrl.u32 %v5003_v9, 16  ;;  %v590_v31 = vshrl.u32 %v5193_v26, 16  ;;  %v592_v32 = vshll.u32 %v5193_v26, 16  ;;  %v386_v33 = vor.u32 %v384_v19, %v383_v21 }
  0x25   : > { %825 = vrot.lane.b32.xlu1 %v5189_v25, %s5032_s24  ;;  %v5198_v30 = vsel %vm528_vm3, %v583_v20, %v587_v7  ;;  %v5206_v35 = vsel %vm5090_vm2, %v383_v21, 0  ;;  %v390_v37 = vrot.slane %v388_v22, 7  ;;  %v398_v39 = vshll.u32 %v5003_v9, 16 }
  0x26   : > { %827 = vrot.lane.b32.xlu0 %v5198_v30, %s5032_s24  ;;  %v397_v38 = vrot.slane %v395_v28, 7  ;;  %v594_v40 = vrot.slane %v592_v32, 1  ;;  %v5210_v41 = vsel %vm5090_vm2, 0, %v386_v33  ;;  %v609_v42 = vshll.u32 %v5206_v35, 16  ;;  %v5008_v32 = vld [vmem:[%s5111_s23 + $0x60] sm:$0xff]  }
  0x27   : > { %8656 = vst [vmem:[#allocation5_spill] sm:$0xff] %v5210_v41  ;;  %v402_v44 = vshrl.u32 %v5004_v24, 16  ;;  %v602_v45 = vshrl.u32 %v5210_v41, 16  ;;  %v604_v46 = vshll.u32 %v5210_v41, 16  ;;  %v393_v47 = vor.u32 %v391_v23, %v390_v37 }
  0x28   : > { %v5217_v48 = vsel %vm5090_vm2, %v390_v37, 0  ;;  %v595_v50 = vor.u32 %v594_v40, %v590_v31  ;;  %v611_v52 = vrot.slane %v609_v42, 1  ;;  %v400_v55 = vor.u32 %v398_v39, %v397_v38  ;;  %v5261_v40 = vld [vmem:[%s5111_s23 + $0x68] sm:$0xff]  }
  0x29   : > { %v621_v53 = vshll.u32 %v5217_v48, 16  ;;  %v606_v57 = vrot.slane %v604_v46, 1  ;;  %v5223_v58 = vsel %vm5090_vm2, 0, %v393_v47  ;;  %v5227_v59 = vsel %vm5090_vm2, %v397_v38, 0 }
  0x2a   : > { %v404_v61 = vrot.slane %v402_v44, 7  ;;  %v5230_v62 = vsel %vm528_vm3, %v595_v50, %v599_v27  ;;  %v614_v63 = vshrl.u32 %v5223_v58, 16  ;;  %v616_v0 = vshll.u32 %v5223_v58, 16 }
  0x2b   : > { %v623_v1 = vrot.slane %v621_v53, 1  ;;  %829 = vrot.lane.b32.xlu1 %v5230_v62, %s5032_s24  ;;  %v607_v7 = vor.u32 %v606_v57, %v602_v45  ;;  %v5239_v8 = vsel %vm5090_vm2, 0, %v400_v55  ;;  %v633_v9 = vshll.u32 %v5227_v59, 16 }
  0x2c   : > { %8657 = vst [vmem:[#allocation6_spill] sm:$0xff] %v5239_v8  ;;  %v405_v11 = vshll.u32 %v5004_v24, 16  ;;  %v618_v15 = vrot.slane %v616_v0, 1  ;;  %v626_v16 = vshrl.u32 %v5239_v8, 16  ;;  %v628_v18 = vshll.u32 %v5239_v8, 16 }
  0x2d   : > { %v5247_v19 = vsel %vm5090_vm2, %v404_v61, 0  ;;  %v5250_v20 = vsel %vm528_vm3, %v607_v7, %v611_v52  ;;  %v635_v21 = vrot.slane %v633_v9, 1  ;;  %v409_v28 = vshrl.u32 %v5005_v56, 16 }
  0x2e   : > { %v407_v22 = vor.u32 %v405_v11, %v404_v61  ;;  %v645_v23 = vshll.u32 %v5247_v19, 16  ;;  %831 = vrot.lane.b32.xlu0 %v5250_v20, %s5032_s24  ;;  %v619_v24 = vor.u32 %v618_v15, %v614_v63  ;;  %v630_v27 = vrot.slane %v628_v18, 1 }
  0x2f   : > { %v412_v31 = vshll.u32 %v5005_v56, 16  ;;  %v416_v38 = vshrl.u32 %v5006_v6, 16  ;;  %v419_v39 = vshll.u32 %v5006_v6, 16  ;;  %v411_v47 = vrot.slane %v409_v28, 7 }
  0x30   : > { %v5258_v33 = vsel %vm5090_vm2, 0, %v407_v22  ;;  %v647_v37 = vrot.slane %v645_v23, 1  ;;  %v5264_v42 = vsel %vm528_vm3, %v619_v24, %v623_v1  ;;  %v631_v44 = vor.u32 %v630_v27, %v626_v16 }
  0x31   : > { %v638_v45 = vshrl.u32 %v5258_v33, 16  ;;  %v640_v46 = vshll.u32 %v5258_v33, 16  ;;  %833 = vrot.lane.b32.xlu1 %v5264_v42, %s5032_s24  ;;  %v418_v50 = vrot.slane %v416_v38, 7  ;;  %v423_v52 = vshrl.u32 %v5007_v13, 16 }
  0x32   : > { %v426_v53 = vshll.u32 %v5007_v13, 16  ;;  %v5271_v55 = vsel %vm528_vm3, %v631_v44, %v635_v21  ;;  %v430_v57 = vshrl.u32 %v5008_v32, 16  ;;  %v433_v61 = vshll.u32 %v5008_v32, 16 }
  0x33   : > { %v642_v56 = vrot.slane %v640_v46, 1  ;;  %835 = vrot.lane.b32.xlu0 %v5271_v55, %s5032_s24  ;;  %v414_v63 = vor.u32 %v412_v31, %v411_v47  ;;  %v5277_v0 = vsel %vm5090_vm2, %v411_v47, 0  ;;  %v421_v1 = vor.u32 %v419_v39, %v418_v50 }
  0x34   : > { %v5281_v6 = vsel %vm5090_vm2, %v418_v50, 0  ;;  %v657_v9 = vshll.u32 %v5277_v0, 16  ;;  %v425_v13 = vrot.slane %v423_v52, 7  ;;  %v432_v18 = vrot.slane %v430_v57, 7 }
  0x35   : > { %v643_v7 = vor.u32 %v642_v56, %v638_v45  ;;  %v669_v11 = vshll.u32 %v5281_v6, 16  ;;  %v5287_v15 = vsel %vm5090_vm2, 0, %v414_v63  ;;  %v5291_v16 = vsel %vm5090_vm2, 0, %v421_v1 }
  0x36   : > { %8658 = vst [vmem:[#allocation7_spill] sm:$0xff] %v5287_v15  ;;  %8659 = vst [vmem:[#allocation8_spill] sm:$0xff] %v5291_v16  ;;  %v437_v21 = vshrl.u32 %v5261_v40, 16  ;;  %v650_v23 = vshrl.u32 %v5287_v15, 16  ;;  %v652_v24 = vshll.u32 %v5287_v15, 16  ;;  %v659_v27 = vrot.slane %v657_v9, 1 }
  0x37   : > { %v5295_v22 = vsel %vm528_vm3, %v643_v7, %v647_v37  ;;  %v662_v28 = vshrl.u32 %v5291_v16, 16  ;;  %v664_v31 = vshll.u32 %v5291_v16, 16  ;;  %v671_v32 = vrot.slane %v669_v11, 1 }
  0x38   : > { %837 = vrot.lane.b32.xlu1 %v5295_v22, %s5032_s24  ;;  %v428_v38 = vor.u32 %v426_v53, %v425_v13  ;;  %v654_v39 = vrot.slane %v652_v24, 1  ;;  %v5305_v37 = vsel %vm5090_vm2, %v425_v13, 0  ;;  %v435_v44 = vor.u32 %v433_v61, %v432_v18  ;;  %v5010_v53 = vld [vmem:[%s5111_s23 + $0x70] sm:$0xff]  }
  0x39   : > { %v5309_v45 = vsel %vm5090_vm2, %v432_v18, 0  ;;  %v666_v46 = vrot.slane %v664_v31, 1  ;;  %v681_v50 = vshll.u32 %v5305_v37, 16  ;;  %vm1240_vm12 = vcmask 195584  }
  0x3a   : > { %v5313_v47 = vsel %vm5090_vm2, 0, %v428_v38  ;;  %v693_v52 = vshll.u32 %v5309_v45, 16  ;;  %v655_v56 = vor.u32 %v654_v39, %v650_v23  ;;  %v5322_v61 = vsel %vm5090_vm2, 0, %v435_v44 }
  0x3b   : > { %8660 = vst [vmem:[#allocation9_spill] sm:$0xff] %v5313_v47  ;;  %v674_v57 = vshrl.u32 %v5313_v47, 16  ;;  %v676_v63 = vshll.u32 %v5313_v47, 16  ;;  %8661 = vst [vmem:[#allocation10_spill] sm:$0xff] %v5322_v61  ;;  %v667_v1 = vor.u32 %v666_v46, %v662_v28  ;;  %v683_v7 = vrot.slane %v681_v50, 1 }
  0x3c   : > { %v686_v9 = vshrl.u32 %v5322_v61, 16  ;;  %v688_v11 = vshll.u32 %v5322_v61, 16  ;;  %v5327_v13 = vsel %vm528_vm3, %v655_v56, %v659_v27  ;;  %v695_v24 = vrot.slane %v693_v52, 1 }
  0x3d   : > { %v678_v18 = vrot.slane %v676_v63, 1  ;;  %v439_v23 = vrot.slane %v437_v21, 7  ;;  %839 = vrot.lane.b32.xlu0 %v5327_v13, %s5032_s24  ;;  %v5332_v31 = vsel %vm528_vm3, %v667_v1, %v671_v32  ;;  %v440_v28 = vshll.u32 %v5261_v40, 16 }
  0x3e   : > { %v690_v38 = vrot.slane %v688_v11, 1  ;;  %v444_v39 = vshrl.u32 %v5010_v53, 16  ;;  %841 = vrot.lane.b32.xlu1 %v5332_v31, %s5032_s24  ;;  %v447_v46 = vshll.u32 %v5010_v53, 16  ;;  %v5343_v32 = vsel %vm491_vm0, 0.0, %v5115_v14 }
  0x3f   : > { %v679_v44 = vor.u32 %v678_v18, %v674_v57  ;;  %v5339_v27 = vsel %vm5090_vm2, %v439_v23, 0  ;;  %v442_v50 = vor.u32 %v440_v28, %v439_v23  ;;  %8662 = vst [vmem:[#allocation11_spill] sm:$0xff] %v5343_v32  ;;  %v755_v40 = vrot.slane %v5100_v4, 1 }
  0x40   : > { %v691_v21 = vor.u32 %v690_v38, %v686_v9  ;;  %v446_v52 = vrot.slane %v444_v39, 7  ;;  %v705_v57 = vshll.u32 %v5339_v27, 16  ;;  %v754_v4 = vrot.slane %v5096_v3, 1 }
  0x41   : > { %v5347_v56 = vsel %vm528_vm3, %v679_v44, %v683_v7  ;;  %v5358_v1 = vsel %vm5090_vm2, 0, %v442_v50  ;;  %v8664_v3 = vrot.slane %v5115_v14, 1  ;;  %vm1273_vm13 = vcmask 228352  }
  0x42   : > { %843 = vrot.lane.b32.xlu0 %v5347_v56, %s5032_s24  ;;  %v5354_v53 = vsel %vm528_vm3, %v691_v21, %v695_v24  ;;  %v449_v9 = vor.u32 %v447_v46, %v446_v52  ;;  %v698_v7 = vshrl.u32 %v5358_v1, 16  ;;  %v700_v11 = vshll.u32 %v5358_v1, 16 }
  0x43   : > { %845 = vrot.lane.b32.xlu1 %v5354_v53, %s5032_s24  ;;  %v5367_v18 = vsel %vm5090_vm2, %v446_v52, 0  ;;  %v1796_v24 = vrot.slane %v5343_v32, 1  ;;  %v707_v39 = vrot.slane %v705_v57, 1  ;;  %v5378_v21 = vsel %vm753_vm4, %v754_v4, %v755_v40 }
  0x44   : > { %v5372_v23 = vsel %vm5090_vm2, 0, %v449_v9  ;;  %v717_v38 = vshll.u32 %v5367_v18, 16  ;;  %v702_v28 = vrot.slane %v700_v11, 1  ;;  %8663 = vst [vmem:[#allocation12_spill] sm:$0xff] %v5378_v21  ;;  %v757_v57 = vrot.slane %v5143_v43, 1 }
  0x45   : > { %v710_v44 = vshrl.u32 %v5372_v23, 16  ;;  %v712_v46 = vshll.u32 %v5372_v23, 16  ;;  %v5383_v17 = vsel %vm753_vm4, %v1796_v24, %v8664_v3  ;;  %v758_v32 = vrot.slane %v5132_v34, 1 }
  0x46   : > { %v703_v50 = vor.u32 %v702_v28, %v698_v7  ;;  %v719_v63 = vrot.slane %v717_v38, 1  ;;  %8665 = vst [vmem:[#allocation13_spill] sm:$0xff] %v5383_v17  ;;  %v4356_v40 = vpack.i.bf16 %v5383_v17, %v5378_v21  ;;  %v760_v3 = vrot.slane %v5136_v36, 1 }
  0x47   : > { %v714_v52 = vrot.slane %v712_v46, 1  ;;  %v761_v7 = vrot.slane %v5127_v29, 1  ;;  %v5402_v24 = vsel %vm753_vm4, %v757_v57, %v758_v32  ;;  %v763_v34 = vrot.slane %v5158_v54, 1 }
  0x48   : > { %v5386_v9 = vsel %vm528_vm3, %v703_v50, %v707_v39  ;;  %v764_v38 = vrot.slane %v5149_v49, 1  ;;  %v766_v28 = vrot.slane %v5166_v60, 1  ;;  %v767_v29 = vrot.slane %v5153_v51, 1 }
  0x49   : > { %v715_v11 = vor.u32 %v714_v52, %v710_v44  ;;  %847 = vrot.lane.b32.xlu0 %v5386_v9, %s5032_s24  ;;  %v769_v39 = vrot.slane %v5193_v26, 1  ;;  %v770_v49 = vrot.slane %v5182_v12, 1  ;;  %v772_v46 = vrot.slane %v5210_v41, 1 }
  0x4a   : > { %v5415_v32 = vsel %vm753_vm4, %v763_v34, %v764_v38  ;;  %v5422_v44 = vsel %vm753_vm4, %v766_v28, %v767_v29  ;;  %v773_v51 = vrot.slane %v5206_v35, 1  ;;  %v775_v52 = vrot.slane %v5223_v58, 1 }
  0x4b   : > { %v5395_v4 = vsel %vm528_vm3, %v715_v11, %v719_v63  ;;  %v5408_v63 = vsel %vm753_vm4, %v760_v3, %v761_v7  ;;  %v5429_v50 = vsel %vm753_vm4, %v769_v39, %v770_v49  ;;  %v776_v12 = vrot.slane %v5217_v48, 1 }
  0x4c   : > { %849 = vrot.lane.b32.xlu1 %v5395_v4, %s5032_s24  ;;  %v5436_v11 = vsel %vm753_vm4, %v772_v46, %v773_v51  ;;  %v778_v57 = vrot.slane %v5239_v8, 1  ;;  %v779_v35 = vrot.slane %v5227_v59, 1  ;;  %v781_v3 = vrot.slane %v5258_v33, 1  ;;  %s5048_s24 = smov 88  }
  0x4d   : > { %4357 = vrot.lane.b32.xlu0 %v4356_v40, %s5033_s25  ;;  %v5443_v40 = vsel %vm753_vm4, %v775_v52, %v776_v12  ;;  %v782_v48 = vrot.slane %v5247_v19, 1  ;;  %v784_v34 = vrot.slane %v5287_v15, 1  ;;  %v785_v59 = vrot.slane %v5277_v0, 1 }
  0x4e   : > { %v5450_v7 = vsel %vm753_vm4, %v778_v57, %v779_v35  ;;  %v787_v28 = vrot.slane %v5291_v16, 1  ;;  %v788_v19 = vrot.slane %v5281_v6, 1  ;;  %v790_v39 = vrot.slane %v5313_v47, 1 }
  0x4f   : > { %v5457_v38 = vsel %vm753_vm4, %v781_v3, %v782_v48  ;;  %v5464_v29 = vsel %vm753_vm4, %v784_v34, %v785_v59  ;;  %v791_v0 = vrot.slane %v5305_v37, 1  ;;  %v793_v46 = vrot.slane %v5322_v61, 1 }
  0x50   : > { %853 = vrot.lane.b32.xlu1 %v5402_v24, %s5033_s25  ;;  %v5471_v49 = vsel %vm753_vm4, %v787_v28, %v788_v19  ;;  %v794_v6 = vrot.slane %v5309_v45, 1  ;;  %v796_v52 = vrot.slane %v5358_v1, 1  ;;  %v797_v37 = vrot.slane %v5339_v27, 1 }
  0x51   : > { %855 = vrot.lane.b32.xlu0 %v5408_v63, %s5033_s25  ;;  %v5478_v51 = vsel %vm753_vm4, %v790_v39, %v791_v0  ;;  %v799_v57 = vrot.slane %v5372_v23, 1  ;;  %v800_v45 = vrot.slane %v5367_v18, 1  ;;  %v5011_v18 = vld [vmem:[%s5111_s23 + $0x78] sm:$0xff]   ;;  %vm1306_vm14 = vcmask 261120   ;;  %s5047_s23 = smov 80  }
  0x52   : > { %v5485_v12 = vsel %vm753_vm4, %v793_v46, %v794_v6  ;;  %v5492_v35 = vsel %vm753_vm4, %v796_v52, %v797_v37  ;;  %v451_v3 = vshrl.u32 %v5011_v18, 16  ;;  %v454_v34 = vshll.u32 %v5011_v18, 16 }
  0x53   : > { %v5497_v27 = vsel %vm753_vm4, %v799_v57, %v800_v45  ;;  %vm1366_vm15 = vcmask 293888   ;;  %vm3105_vm1 = vcmask 1043456  }
  0x54   : > { %857 = vrot.lane.b32.xlu1 %v5415_v32, %s5033_s25  ;;  %v453_v48 = vrot.slane %v451_v3, 7 }
  0x55   : > { %859 = vrot.lane.b32.xlu0 %v5422_v44, %s5033_s25 }
  0x56   : > { %v456_v59 = vor.u32 %v454_v34, %v453_v48  ;;  %v527_v52 = vsel %vm5090_vm2, %v453_v48, 0 }
  0x57   : > { %v810_v18 = vshll.u32 %v527_v52, 16 }
  0x58   : > { %861 = vrot.lane.b32.xlu1 %v5429_v50, %s5033_s25  ;;  %v5520_v28 = vsel %vm5090_vm2, 0, %v456_v59  ;;  %vm2865_vm2 = vcmask 326656  }
  0x59   : > { %863 = vrot.lane.b32.xlu0 %v5436_v11, %s5033_s25  ;;  %v805_v46 = vshll.u32 %v5520_v28, 16  ;;  %v803_v57 = vshrl.u32 %v5520_v28, 16  ;;  %v812_v2 = vrot.slane %v810_v18, 1 }
  0x5b   : > { %v807_v45 = vrot.slane %v805_v46, 1 }
  0x5c   : > { %865 = vrot.lane.b32.xlu1 %v5443_v40, %s5033_s25 }
  0x5d   : > { %867 = vrot.lane.b32.xlu0 %v5450_v7, %s5033_s25  ;;  %v808_v34 = vor.u32 %v807_v45, %v803_v57 }
  0x5f   : > { %v5573_v59 = vsel %vm528_vm3, %v808_v34, %v812_v2  ;;  %vm2898_vm3 = vcmask 392192  }
  0x60   : > { %869 = vrot.lane.b32.xlu1 %v5457_v38, %s5033_s25 }
  0x61   : > { %871 = vrot.lane.b32.xlu0 %v5464_v29, %s5033_s25 }
  0x64   : > { %873 = vrot.lane.b32.xlu1 %v5471_v49, %s5033_s25 }
  0x65   : > { %875 = vrot.lane.b32.xlu0 %v5478_v51, %s5033_s25 }
  0x68   : > { %877 = vrot.lane.b32.xlu1 %v5485_v12, %s5033_s25 }
  0x69   : > { %879 = vrot.lane.b32.xlu0 %v5492_v35, %s5033_s25 }
  0x6c   : > { %881 = vrot.lane.b32.xlu1 %v5497_v27, %s5033_s25 }
  0x6d   : > { %883 = vrot.lane.b32.xlu0 %v5143_v43, %s5034_s26 }
  0x70   : > { %885 = vrot.lane.b32.xlu1 %v5136_v36, %s5034_s26 }
  0x71   : > { %887 = vrot.lane.b32.xlu0 %v5158_v54, %s5034_s26 }
  0x74   : > { %889 = vrot.lane.b32.xlu1 %v5166_v60, %s5034_s26 }
  0x75   : > { %891 = vrot.lane.b32.xlu0 %v5193_v26, %s5034_s26 }
  0x78   : > { %893 = vrot.lane.b32.xlu1 %v5210_v41, %s5034_s26 }
  0x79   : > { %895 = vrot.lane.b32.xlu0 %v5223_v58, %s5034_s26 }
  0x7c   : > { %897 = vrot.lane.b32.xlu1 %v5239_v8, %s5034_s26 }
  0x7d   : > { %899 = vrot.lane.b32.xlu0 %v5258_v33, %s5034_s26 }
  0x80   : > { %901 = vrot.lane.b32.xlu1 %v5287_v15, %s5034_s26 }
  0x81   : > { %903 = vrot.lane.b32.xlu0 %v5291_v16, %s5034_s26 }
  0x84   : > { %905 = vrot.lane.b32.xlu1 %v5313_v47, %s5034_s26 }
  0x85   : > { %907 = vrot.lane.b32.xlu0 %v5322_v61, %s5034_s26 }
  0x88   : > { %909 = vrot.lane.b32.xlu1 %v5358_v1, %s5034_s26 }
  0x89   : > { %911 = vrot.lane.b32.xlu0 %v5372_v23, %s5034_s26 }
  0x8a   : > { %v5530_v19 = vpop.permute.xlu0 %819 }
  0x8c   : > { %913 = vrot.lane.b32.xlu1 %v5520_v28, %s5034_s26  ;;  %s5049_s26 = smov 96  }
  0x8d   : > { %915 = vrot.lane.b32.xlu0 %v5178_v10, %s5035_s27 }
  0x90   : > { %917 = vrot.lane.b32.xlu1 %v5172_v5, %s5035_s27 }
  0x91   : > { %919 = vrot.lane.b32.xlu0 %v5189_v25, %s5035_s27 }
  0x93   : > { %v5534_v39 = vpop.permute.xlu1 %823 }
  0x94   : > { %921 = vrot.lane.b32.xlu1 %v5198_v30, %s5035_s27  ;;  %v5540_v10 = vpop.permute.xlu0 %821 }
  0x95   : > { %923 = vrot.lane.b32.xlu0 %v5230_v62, %s5035_s27 }
  0x97   : > { %v5544_v0 = vpop.permute.xlu1 %825 }
  0x98   : > { %925 = vrot.lane.b32.xlu1 %v5250_v20, %s5035_s27  ;;  %v5551_v6 = vpop.permute.xlu0 %827 }
  0x99   : > { %927 = vrot.lane.b32.xlu0 %v5264_v42, %s5035_s27 }
  0x9c   : > { %929 = vrot.lane.b32.xlu1 %v5271_v55, %s5035_s27 }
  0x9d   : > { %931 = vrot.lane.b32.xlu0 %v5295_v22, %s5035_s27  ;;  %v5557_v37 = vpop.permute.xlu1 %829 }
  0x9e   : > { %8666 = vst [vmem:[#allocation14_spill] sm:$0xff] %v5557_v37 }
  0xa0   : > { %933 = vrot.lane.b32.xlu1 %v5327_v13, %s5035_s27  ;;  %v5564_v3 = vpop.permute.xlu0 %831 }
  0xa1   : > { %935 = vrot.lane.b32.xlu0 %v5332_v31, %s5035_s27  ;;  %8667 = vst [vmem:[#allocation15_spill] sm:$0xff] %v5564_v3 }
  0xa3   : > { %v5568_v48 = vpop.permute.xlu1 %833 }
  0xa4   : > { %937 = vrot.lane.b32.xlu1 %v5347_v56, %s5035_s27  ;;  %8668 = vst [vmem:[#allocation16_spill] sm:$0xff] %v5568_v48 }
  0xa5   : > { %939 = vrot.lane.b32.xlu0 %v5354_v53, %s5035_s27  ;;  %v5577_v46 = vpop.permute.xlu0 %835 }
  0xa6   : > { %8669 = vst [vmem:[#allocation17_spill] sm:$0xff] %v5577_v46 }
  0xa8   : > { %941 = vrot.lane.b32.xlu1 %v5386_v9, %s5035_s27 }
  0xa9   : > { %943 = vrot.lane.b32.xlu0 %v5395_v4, %s5035_s27 }
  0xaa   : > { %v5581_v57 = vpop.permute.xlu1 %837 }
  0xab   : > { %8670 = vst [vmem:[#allocation18_spill] sm:$0xff] %v5581_v57 }
  0xac   : > { %945 = vrot.lane.b32.xlu1 %v5573_v59, %s5035_s27 }
  0xad   : > { %947 = vrot.lane.b32.xlu0 %v5402_v24, %s5036_s28 }
  0xaf   : > { %v5587_v45 = vpop.permute.xlu0 %839 }
  0xb0   : > { %949 = vrot.lane.b32.xlu1 %v5408_v63, %s5036_s28  ;;  %8671 = vst [vmem:[#allocation19_spill] sm:$0xff] %v5587_v45  ;;  %v5591_v18 = vpop.permute.xlu1 %841  ;;  %v817_v45 = vrot.slane %v527_v52, 1 }
  0xb1   : > { %951 = vrot.lane.b32.xlu0 %v5415_v32, %s5036_s28  ;;  %8672 = vst [vmem:[#allocation20_spill] sm:$0xff] %v5591_v18  ;;  %v816_v18 = vrot.slane %v5520_v28, 1 }
  0xb3   : > { %v5635_v48 = vsel %vm753_vm4, %v816_v18, %v817_v45 }
  0xb4   : > { %953 = vrot.lane.b32.xlu1 %v5422_v44, %s5036_s28  ;;  %v5597_v34 = vpop.permute.xlu0 %843 }
  0xb5   : > { %955 = vrot.lane.b32.xlu0 %v5429_v50, %s5036_s28  ;;  %8673 = vst [vmem:[#allocation21_spill] sm:$0xff] %v5597_v34  ;;  %v5601_v24 = vpop.permute.xlu1 %845 }
  0xb6   : > { %8674 = vst [vmem:[#allocation22_spill] sm:$0xff] %v5601_v24 }
  0xb8   : > { %957 = vrot.lane.b32.xlu1 %v5436_v11, %s5036_s28 }
  0xb9   : > { %959 = vrot.lane.b32.xlu0 %v5443_v40, %s5036_s28 }
  0xbb   : > { %v5605_v2 = vpop.permute.xlu0 %847 }
  0xbc   : > { %961 = vrot.lane.b32.xlu1 %v5450_v7, %s5036_s28 }
  0xbd   : > { %963 = vrot.lane.b32.xlu0 %v5457_v38, %s5036_s28 }
  0xbe   : > { %v5611_v17 = vpop.permute.xlu1 %849 }
  0xbf   : > { %v5613_v21 = vpop.permute.xlu0 %4357 }
  0xc0   : > { %8675 = vst [vmem:[#allocation23_spill] sm:$0xff] %v5613_v21  ;;  %965 = vrot.lane.b32.xlu1 %v5464_v29, %s5036_s28 }
  0xc1   : > { %967 = vrot.lane.b32.xlu0 %v5471_v49, %s5036_s28 }
  0xc2   : > { %v5619_v24 = vpop.permute.xlu1 %853 }
  0xc3   : > { %v5621_v34 = vpop.permute.xlu0 %855 }
  0xc4   : > { %969 = vrot.lane.b32.xlu1 %v5478_v51, %s5036_s28 }
  0xc5   : > { %971 = vrot.lane.b32.xlu0 %v5485_v12, %s5036_s28 }
  0xc6   : > { %v5628_v57 = vpop.permute.xlu1 %857 }
  0xc7   : > { %v5630_v46 = vpop.permute.xlu0 %859 }
  0xc8   : > { %8676 = vst [vmem:[#allocation24_spill] sm:$0xff] %v5630_v46  ;;  %973 = vrot.lane.b32.xlu1 %v5492_v35, %s5036_s28 }
  0xc9   : > { %975 = vrot.lane.b32.xlu0 %v5497_v27, %s5036_s28 }
  0xca   : > { %v5639_v3 = vpop.permute.xlu1 %861 }
  0xcb   : > { %v5641_v37 = vpop.permute.xlu0 %863 }
  0xcc   : > { %8677 = vst [vmem:[#allocation25_spill] sm:$0xff] %v5641_v37  ;;  %977 = vrot.lane.b32.xlu1 %v5635_v48, %s5036_s28  ;;  %v5012_v37 = vld [vmem:[%s8557_s1] sm:$0xff]  }
  0xcd   : > { %979 = vrot.lane.b32.xlu0 %v5136_v36, %s5037_s29  ;;  %4245 = vmatprep.subr.bf16.mxu0 %v5012_v37 }
  0xce   : > { %v5647_v52 = vpop.permute.xlu1 %865  ;;  %4246 = vmatpush3.bf16.msra.mxu0 %v5012_v37  ;;  %v5014_v37 = vld [vmem:[%s8557_s1 + $0x10] ss:$0 sps:$4 sm:$0x33]  }
  0xcf   : > { %8678 = vst [vmem:[#allocation26_spill] sm:$0xff] %v5647_v52  ;;  %v5649_v46 = vpop.permute.xlu0 %867 }
  0xd0   : > { %8679 = vst [vmem:[#allocation27_spill] sm:$0xff] %v5649_v46  ;;  %981 = vrot.lane.b32.xlu1 %v5158_v54, %s5037_s29 }
  0xd1   : > { %983 = vrot.lane.b32.xlu0 %v5166_v60, %s5037_s29 }
  0xd2   : > { %v5655_v45 = vpop.permute.xlu1 %869 }
  0xd3   : > { %8680 = vst [vmem:[#allocation28_spill] sm:$0xff] %v5655_v45  ;;  %v5657_v18 = vpop.permute.xlu0 %871 }
  0xd4   : > { %8681 = vst [vmem:[#allocation29_spill] sm:$0xff] %v5657_v18  ;;  %985 = vrot.lane.b32.xlu1 %v5193_v26, %s5037_s29  ;;  %v5013_v18 = vld [vmem:[%s8557_s1 + $0x8] sm:$0xff]  }
  0xd5   : > { %987 = vrot.lane.b32.xlu0 %v5210_v41, %s5037_s29  ;;  %4247 = vmatprep.subr.bf16.mxu0 %v5013_v18 }
  0xd6   : > { %v5666_v46 = vpop.permute.xlu1 %873  ;;  %4248 = vmatpush3.bf16.msra.mxu0 %v5013_v18 }
  0xd7   : > { %8682 = vst [vmem:[#allocation30_spill] sm:$0xff] %v5666_v46  ;;  %v5668_v52 = vpop.permute.xlu0 %875  ;;  %4325 = vmatprep.subr.msk.bf16.mxu0 %vm1399_vm5, %v5014_v37  ;;  %v1401_v46 = vsel %vm1399_vm5, %v5014_v37, 0  ;;  %vm2931_vm5 = vcmask 457728  }
  0xd8   : > { %8683 = vst [vmem:[#allocation31_spill] sm:$0xff] %v5668_v52  ;;  %989 = vrot.lane.b32.xlu1 %v5223_v58, %s5037_s29 }
  0xd9   : > { %991 = vrot.lane.b32.xlu0 %v5239_v8, %s5037_s29 }
  0xda   : > { %v5677_v45 = vpop.permute.xlu1 %877  ;;  %4250 = vmatpush3.bf16.msra.mxu0 %v1401_v46 }
  0xdb   : > { %8684 = vst [vmem:[#allocation32_spill] sm:$0xff] %v5677_v45  ;;  %v880_v41 = vpop.permute.xlu0 %879 }
  0xdc   : > { %993 = vrot.lane.b32.xlu1 %v5258_v33, %s5037_s29 }
  0xdd   : > { %995 = vrot.lane.b32.xlu0 %v5287_v15, %s5037_s29  ;;  %v1079_v15 = vsel %vm1075_vm6, %v5143_v43, %v5540_v10 }
  0xde   : > { %v882_v52 = vpop.permute.xlu1 %881 }
  0xdf   : > { %v5686_v8 = vpop.permute.xlu0 %883 }
  0xe0   : > { %997 = vrot.lane.b32.xlu1 %v5291_v16, %s5037_s29 }
  0xe1   : > { %999 = vrot.lane.b32.xlu0 %v5313_v47, %s5037_s29 }
  0xe2   : > { %v5692_v18 = vpop.permute.xlu1 %885 }
  0xe3   : > { %v5694_v45 = vpop.permute.xlu0 %887 }
  0xe4   : > { %1001 = vrot.lane.b32.xlu1 %v5322_v61, %s5037_s29 }
  0xe5   : > { %1011 = vrot.lane.b32.xlu0 %v5172_v5, %s5038_s11 }
  0xe6   : > { %v5700_v46 = vpop.permute.xlu1 %889 }
  0xe7   : > { %v5702_v37 = vpop.permute.xlu0 %891 }
  0xe8   : > { %1013 = vrot.lane.b32.xlu1 %v5189_v25, %s5038_s11 }
  0xe9   : > { %1043 = vrot.lane.b32.xlu0 %v5408_v63, %s5039_s12 }
  0xea   : > { %v5708_v47 = vpop.permute.xlu1 %893 }
  0xeb   : > { %v5710_v16 = vpop.permute.xlu0 %895 }
  0xec   : > { %1045 = vrot.lane.b32.xlu1 %v5415_v32, %s5039_s12 }
  0xed   : > { %1015 = vrot.lane.b32.xlu0 %v5198_v30, %s5038_s11 }
  0xee   : > { %v5716_v5 = vpop.permute.xlu1 %897 }
  0xef   : > { %v5718_v61 = vpop.permute.xlu0 %899 }
  0xf0   : > { %1017 = vrot.lane.b32.xlu1 %v5230_v62, %s5038_s11 }
  0xf1   : > { %1047 = vrot.lane.b32.xlu0 %v5422_v44, %s5039_s12  ;;  %v1105_v44 = vsel %vm1075_vm6, %v5358_v1, %v5605_v2 }
  0xf2   : > { %v5724_v25 = vpop.permute.xlu1 %901 }
  0xf3   : > { %v5726_v63 = vpop.permute.xlu0 %903 }
  0xf4   : > { %8685 = vst [vmem:[#allocation33_spill] sm:$0xff] %v5726_v63  ;;  %1049 = vrot.lane.b32.xlu1 %v5429_v50, %s5039_s12 }
  0xf5   : > { %1019 = vrot.lane.b32.xlu0 %v5250_v20, %s5038_s11  ;;  %v1138_v20 = vsel %vm1108_vm7, %v1105_v44, %v880_v41 }
  0xf6   : > { %v5732_v30 = vpop.permute.xlu1 %905 }
  0xf7   : > { %8686 = vst [vmem:[#allocation34_spill] sm:$0xff] %v5732_v30  ;;  %v5734_v32 = vpop.permute.xlu0 %907 }
  0xf8   : > { %8687 = vst [vmem:[#allocation35_spill] sm:$0xff] %v5734_v32  ;;  %1021 = vrot.lane.b32.xlu1 %v5264_v42, %s5038_s11  ;;  %v1107_v42 = vsel %vm1075_vm6, %v5372_v23, %v5611_v17 }
  0xf9   : > { %1051 = vrot.lane.b32.xlu0 %v5436_v11, %s5039_s12 }
  0xfa   : > { %v5740_v62 = vpop.permute.xlu1 %909 }
  0xfb   : > { %8688 = vst [vmem:[#allocation36_spill] sm:$0xff] %v5740_v62  ;;  %v912_v50 = vpop.permute.xlu0 %911  ;;  %v1140_v62 = vsel %vm1108_vm7, %v1107_v42, %v882_v52  ;;  %v8695_v42 = vld [vmem:[#allocation4_spill] sm:$0xff] }
  0xfc   : > { %1053 = vrot.lane.b32.xlu1 %v5443_v40, %s5039_s12  ;;  %v5752_v11 = vsel %vm1141_vm8, %v1138_v20, %v912_v50 }
  0xfd   : > { %1023 = vrot.lane.b32.xlu0 %v5271_v55, %s5038_s11 }
  0xfe   : > { %v914_v2 = vpop.permute.xlu1 %913 }
  0xff   : > { %v5758_v41 = vsel %vm1141_vm8, %v1140_v62, %v914_v2  ;;  %v5760_v44 = vpop.permute.xlu0 %915 }
 0x100   : > { %1025 = vrot.lane.b32.xlu1 %v5295_v22, %s5038_s11 }
 0x101   : > { %1055 = vrot.lane.b32.xlu0 %v5450_v7, %s5039_s12 }
 0x102   : > { %v5766_v17 = vpop.permute.xlu1 %917 }
 0x103   : > { %v5768_v40 = vpop.permute.xlu0 %919 }
 0x104   : > { %1057 = vrot.lane.b32.xlu1 %v5457_v38, %s5039_s12 }
 0x105   : > { %1027 = vrot.lane.b32.xlu0 %v5327_v13, %s5038_s11 }
 0x106   : > { %v5774_v55 = vpop.permute.xlu1 %921 }
 0x107   : > { %v5776_v52 = vpop.permute.xlu0 %923 }
 0x108   : > { %1029 = vrot.lane.b32.xlu1 %v5332_v31, %s5038_s11 }
 0x109   : > { %1059 = vrot.lane.b32.xlu0 %v5464_v29, %s5039_s12 }
 0x10a   : > { %v5782_v22 = vpop.permute.xlu1 %925 }
 0x10b   : > { %v5784_v7 = vpop.permute.xlu0 %927 }
 0x10c   : > { %1061 = vrot.lane.b32.xlu1 %v5471_v49, %s5039_s12 }
 0x10d   : > { %1031 = vrot.lane.b32.xlu0 %v5347_v56, %s5038_s11 }
 0x10e   : > { %v5790_v13 = vpop.permute.xlu1 %929 }
 0x10f   : > { %v5792_v38 = vpop.permute.xlu0 %931 }
 0x110   : > { %1033 = vrot.lane.b32.xlu1 %v5354_v53, %s5038_s11 }
 0x111   : > { %1063 = vrot.lane.b32.xlu0 %v5478_v51, %s5039_s12 }
 0x112   : > { %v5798_v31 = vpop.permute.xlu1 %933 }
 0x113   : > { %v5800_v29 = vpop.permute.xlu0 %935 }
 0x114   : > { %8689 = vst [vmem:[#allocation37_spill] sm:$0xff] %v5800_v29  ;;  %1065 = vrot.lane.b32.xlu1 %v5485_v12, %s5039_s12  ;;  %v5822_v12 = vsel %vm491_vm0, %v5115_v14, 0.0 }
 0x115   : > { %1003 = vrot.lane.b32.xlu0 %v5358_v1, %s5037_s29  ;;  %8693 = vst [vmem:[#allocation41_spill] sm:$0xff] %v5822_v12  ;;  %v1880_v50 = vrot.slane %v5822_v12, 2 }
 0x116   : > { %v5806_v56 = vpop.permute.xlu1 %937 }
 0x117   : > { %8690 = vst [vmem:[#allocation38_spill] sm:$0xff] %v5806_v56  ;;  %v5808_v49 = vpop.permute.xlu0 %939 }
 0x118   : > { %8691 = vst [vmem:[#allocation39_spill] sm:$0xff] %v5808_v49  ;;  %1005 = vrot.lane.b32.xlu1 %v5372_v23, %s5037_s29 }
 0x119   : > { %1035 = vrot.lane.b32.xlu0 %v5386_v9, %s5038_s11  ;;  %v8694_v9 = vld [vmem:[#allocation11_spill] sm:$0xff] }
 0x11a   : > { %v5814_v53 = vpop.permute.xlu1 %941  ;;  %v1877_v20 = vrot.slane %v8694_v9, 2 }
 0x11b   : > { %8692 = vst [vmem:[#allocation40_spill] sm:$0xff] %v5814_v53  ;;  %v944_v51 = vpop.permute.xlu0 %943 }
 0x11c   : > { %1037 = vrot.lane.b32.xlu1 %v5395_v4, %s5038_s11  ;;  %v1878_v4 = vrot.slane %v5115_v14, 2 }
 0x11d   : > { %1067 = vrot.lane.b32.xlu0 %v5492_v35, %s5039_s12 }
 0x11e   : > { %v946_v1 = vpop.permute.xlu1 %945  ;;  %v1881_v2 = vsel %vm1876_vm9, %v1878_v4, %v1880_v50 }
 0x11f   : > { %v948_v62 = vpop.permute.xlu0 %947  ;;  %v1206_v32 = vsel %vm1174_vm10, %v5758_v41, %v946_v1  ;;  %v4359_v41 = vunpack.i.l.bf16 %v5613_v21  ;;  %v1112_v21 = vsel %vm1108_vm7, %v1079_v15, %v5619_v24 }
 0x120   : > { %1069 = vrot.lane.b32.xlu1 %v5497_v27, %s5039_s12 }
 0x121   : > { %1007 = vrot.lane.b32.xlu0 %v5520_v28, %s5037_s29  ;;  %v1879_v28 = vsel %vm1876_vm9, %v1877_v20, %v1878_v4 }
 0x122   : > { %v950_v23 = vpop.permute.xlu1 %949  ;;  %v5847_v12 = vpack.i.bf16 %v1881_v2, %v1879_v28  ;;  %v1204_v28 = vsel %vm1174_vm10, %v5752_v11, %v944_v51 }
 0x123   : > { %v5831_v35 = vpop.permute.xlu0 %951 }
 0x124   : > { %1041 = vrot.lane.b32.xlu1 %v8695_v42, %s5038_s11  ;;  %8696 = vst [vmem:[#allocation4_spill] sm:$0xff] %v5847_v12 }
 0x125   : > { %1039 = vrot.lane.b32.xlu0 %v5573_v59, %s5038_s11  ;;  %s5044_s11 = smov 120  }
 0x126   : > { %v5837_v27 = vpop.permute.xlu1 %953 }
 0x127   : > { %v5841_v9 = vpop.permute.xlu0 %955 }
 0x129   : > { %1071 = vrot.lane.b32.xlu0 %v5635_v48, %s5039_s12 }
 0x12a   : > { %v5845_v14 = vpop.permute.xlu1 %957 }
 0x12b   : > { %v5849_v53 = vpop.permute.xlu0 %959 }
 0x12d   : > { %4372 = vrot.lane.b32.xlu0 %v5847_v12, %s5035_s27 }
 0x12e   : > { %v5853_v59 = vpop.permute.xlu1 %961 }
 0x12f   : > { %v5855_v42 = vpop.permute.xlu0 %963 }
 0x132   : > { %v5857_v20 = vpop.permute.xlu1 %965 }
 0x133   : > { %8697 = vst [vmem:[#allocation42_spill] sm:$0xff] %v5857_v20  ;;  %v5859_v4 = vpop.permute.xlu0 %967 }
 0x134   : > { %8698 = vst [vmem:[#allocation43_spill] sm:$0xff] %v5859_v4 }
 0x136   : > { %v5861_v50 = vpop.permute.xlu1 %969 }
 0x137   : > { %8699 = vst [vmem:[#allocation44_spill] sm:$0xff] %v5861_v50  ;;  %v5863_v48 = vpop.permute.xlu0 %971 }
 0x138   : > { %8700 = vst [vmem:[#allocation45_spill] sm:$0xff] %v5863_v48 }
 0x13a   : > { %v5865_v49 = vpop.permute.xlu1 %973 }
 0x13b   : > { %8701 = vst [vmem:[#allocation46_spill] sm:$0xff] %v5865_v49  ;;  %v976_v2 = vpop.permute.xlu0 %975 }
 0x13c   : > { %v5870_v12 = vsel %vm1207_vm11, %v1204_v28, %v976_v2 }
 0x13d   : > { %8702 = vst [vmem:[#allocation47_spill] sm:$0xff] %v5870_v12 }
 0x13e   : > { %v978_v56 = vpop.permute.xlu1 %977 }
 0x13f   : > { %v5875_v4 = vsel %vm1207_vm11, %v1206_v32, %v978_v56  ;;  %v980_v50 = vpop.permute.xlu0 %979  ;;  %v8706_v56 = vld [vmem:[#allocation2_spill] sm:$0xff] }
 0x140   : > { %8703 = vst [vmem:[#allocation48_spill] sm:$0xff] %v5875_v4  ;;  %v1077_v1 = vsel %vm1075_vm6, %v8706_v56, %v5530_v19  ;;  %v1145_v19 = vsel %vm1141_vm8, %v1112_v21, %v5692_v18  ;;  %v1081_v21 = vsel %vm1075_vm6, %v5136_v36, %v5534_v39 }
 0x141   : > { %v1110_v12 = vsel %vm1108_vm7, %v1077_v1, %v4359_v41  ;;  %v1178_v43 = vsel %vm1174_vm10, %v1145_v19, %v5766_v17 }
 0x142   : > { %v982_v48 = vpop.permute.xlu1 %981  ;;  %v1143_v20 = vsel %vm1141_vm8, %v1110_v12, %v5686_v8  ;;  %v1211_v10 = vsel %vm1207_vm11, %v1178_v43, %v950_v23  ;;  %v8708_v43 = vld [vmem:[#allocation14_spill] sm:$0xff] }
 0x143   : > { %v984_v30 = vpop.permute.xlu0 %983 }
 0x146   : > { %v986_v49 = vpop.permute.xlu1 %985 }
 0x147   : > { %v5877_v29 = vpop.permute.xlu0 %987 }
 0x14a   : > { %v5879_v63 = vpop.permute.xlu1 %989 }
 0x14b   : > { %v5881_v11 = vpop.permute.xlu0 %991 }
 0x14e   : > { %v5883_v51 = vpop.permute.xlu1 %993 }
 0x14f   : > { %v5885_v28 = vpop.permute.xlu0 %995 }
 0x152   : > { %v5887_v2 = vpop.permute.xlu1 %997 }
 0x153   : > { %8704 = vst [vmem:[#allocation49_spill] sm:$0xff] %v5887_v2  ;;  %v5890_v32 = vpop.permute.xlu0 %999 }
 0x154   : > { %8705 = vst [vmem:[#allocation50_spill] sm:$0xff] %v5890_v32  ;;  %v1176_v32 = vsel %vm1174_vm10, %v1143_v20, %v5760_v44  ;;  %v1244_v44 = vsel %vm1240_vm12, %v1211_v10, %v982_v48  ;;  %v1083_v20 = vsel %vm1075_vm6, %v5158_v54, %v5544_v0 }
 0x155   : > { %v1209_v41 = vsel %vm1207_vm11, %v1176_v32, %v948_v62  ;;  %v1114_v62 = vsel %vm1108_vm7, %v1081_v21, %v5621_v34  ;;  %v1116_v36 = vsel %vm1108_vm7, %v1083_v20, %v5628_v57  ;;  %v8712_v20 = vld [vmem:[#allocation16_spill] sm:$0xff] }
 0x156   : > { %v5895_v4 = vpop.permute.xlu1 %1001  ;;  %v1242_v8 = vsel %vm1240_vm12, %v1209_v41, %v980_v50  ;;  %v1147_v50 = vsel %vm1141_vm8, %v1114_v62, %v5694_v45  ;;  %v1149_v34 = vsel %vm1141_vm8, %v1116_v36, %v5700_v46  ;;  %v1085_v46 = vsel %vm1075_vm6, %v5166_v60, %v5551_v6  ;;  %v8711_v62 = vld [vmem:[#allocation25_spill] sm:$0xff]  ;;  %v8713_v36 = vld [vmem:[#allocation26_spill] sm:$0xff] }
 0x157   : > { %v1012_v2 = vpop.permute.xlu0 %1011  ;;  %v1180_v39 = vsel %vm1174_vm10, %v1147_v50, %v5768_v40  ;;  %v1182_v54 = vsel %vm1174_vm10, %v1149_v34, %v5774_v55 }
 0x158   : > { %v1275_v15 = vsel %vm1273_vm13, %v1242_v8, %v1012_v2  ;;  %v1213_v2 = vsel %vm1207_vm11, %v1180_v39, %v5831_v35  ;;  %v1215_v45 = vsel %vm1207_vm11, %v1182_v54, %v5837_v27 }
 0x159   : > { %v1246_v0 = vsel %vm1240_vm12, %v1213_v2, %v984_v30  ;;  %v1248_v40 = vsel %vm1240_vm12, %v1215_v45, %v986_v49  ;;  %v8707_v30 = vld [vmem:[#allocation24_spill] sm:$0xff]  ;;  %v1087_v49 = vsel %vm1075_vm6, %v5193_v26, %v8708_v43 }
 0x15a   : > { %v1014_v1 = vpop.permute.xlu1 %1013  ;;  %v1120_v60 = vsel %vm1108_vm7, %v1087_v49, %v5639_v3 }
 0x15b   : > { %v1044_v24 = vpop.permute.xlu0 %1043  ;;  %v1277_v18 = vsel %vm1273_vm13, %v1244_v44, %v1014_v1  ;;  %v1118_v1 = vsel %vm1108_vm7, %v1085_v46, %v8707_v30 }
 0x15c   : > { %v1308_v12 = vsel %vm1306_vm14, %v1275_v15, %v1044_v24  ;;  %v1151_v8 = vsel %vm1141_vm8, %v1118_v1, %v5702_v37  ;;  %v1153_v15 = vsel %vm1141_vm8, %v1120_v60, %v5708_v47  ;;  %v8718_v1 = vld [vmem:[#allocation28_spill] sm:$0xff]  ;;  %v8719_v60 = vld [vmem:[#allocation42_spill] sm:$0xff] }
 0x15d   : > { %4251 = vmatprep.mubr.msk.bf16.mxu0 %vm1366_vm15, %v1308_v12  ;;  %v1184_v6 = vsel %vm1174_vm10, %v1151_v8, %v5776_v52  ;;  %v1186_v26 = vsel %vm1174_vm10, %v1153_v15, %v5782_v22 }
 0x15e   : > { %v1046_v17 = vpop.permute.xlu1 %1045  ;;  %v1217_v24 = vsel %vm1207_vm11, %v1184_v6, %v5841_v9  ;;  %v1219_v12 = vsel %vm1207_vm11, %v1186_v26, %v5845_v14  ;;  %v8710_v9 = vld [vmem:[#allocation5_spill] sm:$0xff]  ;;  %v8721_v26 = vld [vmem:[#allocation19_spill] sm:$0xff] }
 0x15f   : > { %v1310_v23 = vsel %vm1306_vm14, %v1277_v18, %v1046_v17  ;;  %v1016_v48 = vpop.permute.xlu0 %1015  ;;  %v1250_v37 = vsel %vm1240_vm12, %v1217_v24, %v5877_v29  ;;  %v1252_v52 = vsel %vm1240_vm12, %v1219_v12, %v5879_v63  ;;  %v8709_v18 = vld [vmem:[#allocation15_spill] sm:$0xff]  ;;  %v1091_v63 = vsel %vm1075_vm6, %v5223_v58, %v8712_v20  ;;  %v8723_v12 = vld [vmem:[#allocation29_spill] sm:$0xff]  ;;  %v8729_v20 = vld [vmem:[#allocation34_spill] sm:$0xff] }
 0x160   : > { %4252 = vmatmul.mubr.msk.bf16.vlgmr.msra.gmra.mrb[0].mxu0 %vm1366_vm15, %v1310_v23  ;;  %v1279_v57 = vsel %vm1273_vm13, %v1246_v0, %v1016_v48  ;;  %v1089_v17 = vsel %vm1075_vm6, %v8710_v9, %v8709_v18  ;;  %v1124_v39 = vsel %vm1108_vm7, %v1091_v63, %v8713_v36  ;;  %v8726_v9 = vld [vmem:[#allocation33_spill] sm:$0xff] }
 0x161   : > { %v1122_v14 = vsel %vm1108_vm7, %v1089_v17, %v8711_v62  ;;  %v1157_v2 = vsel %vm1141_vm8, %v1124_v39, %v5716_v5  ;;  %v8731_v39 = vld [vmem:[#allocation38_spill] sm:$0xff] }
 0x162   : > { %v1018_v32 = vpop.permute.xlu1 %1017  ;;  %v1155_v50 = vsel %vm1141_vm8, %v1122_v14, %v5710_v16  ;;  %v1190_v58 = vsel %vm1174_vm10, %v1157_v2, %v5790_v13  ;;  %v8728_v14 = vld [vmem:[#allocation37_spill] sm:$0xff]  ;;  %v8732_v2 = vld [vmem:[#allocation50_spill] sm:$0xff] }
 0x163   : > { %v1048_v19 = vpop.permute.xlu0 %1047  ;;  %v1281_v35 = vsel %vm1273_vm13, %v1248_v40, %v1018_v32  ;;  %v1188_v34 = vsel %vm1174_vm10, %v1155_v50, %v5784_v7  ;;  %v1223_v0 = vsel %vm1207_vm11, %v1190_v58, %v5853_v59  ;;  %v8730_v50 = vld [vmem:[#allocation43_spill] sm:$0xff] }
 0x164   : > { %v1312_v41 = vsel %vm1306_vm14, %v1279_v57, %v1048_v19  ;;  %v1221_v32 = vsel %vm1207_vm11, %v1188_v34, %v5849_v53  ;;  %v1256_v7 = vsel %vm1240_vm12, %v1223_v0, %v5883_v51  ;;  %v8714_v19 = vld [vmem:[#allocation17_spill] sm:$0xff]  ;;  %v8715_v53 = vld [vmem:[#allocation6_spill] sm:$0xff] }
 0x165   : > { %4255 = vmatprep.mubr.msk.bf16.mxu0 %vm1366_vm15, %v1312_v41  ;;  %v1254_v16 = vsel %vm1240_vm12, %v1221_v32, %v5881_v11  ;;  %v1093_v40 = vsel %vm1075_vm6, %v8715_v53, %v8714_v19  ;;  %v8716_v41 = vld [vmem:[#allocation27_spill] sm:$0xff] }
 0x166   : > { %v1050_v55 = vpop.permute.xlu1 %1049  ;;  %v1126_v59 = vsel %vm1108_vm7, %v1093_v40, %v8716_v41  ;;  %v8734_v40 = vld [vmem:[#allocation21_spill] sm:$0xff] }
 0x167   : > { %v1314_v27 = vsel %vm1306_vm14, %v1281_v35, %v1050_v55  ;;  %v1020_v10 = vpop.permute.xlu0 %1019  ;;  %v8717_v35 = vld [vmem:[#allocation18_spill] sm:$0xff]  ;;  %v1159_v55 = vsel %vm1141_vm8, %v1126_v59, %v5718_v61  ;;  %v8736_v59 = vld [vmem:[#allocation31_spill] sm:$0xff] }
 0x168   : > { %4256 = vmatmul.mubr.msk.bf16.gmra.mrb[4].mxu0 %vm1366_vm15, %v1314_v27  ;;  %v1283_v3 = vsel %vm1273_vm13, %v1250_v37, %v1020_v10  ;;  %v1095_v51 = vsel %vm1075_vm6, %v5258_v33, %v8717_v35  ;;  %v1192_v43 = vsel %vm1174_vm10, %v1159_v55, %v5792_v38  ;;  %v8720_v38 = vld [vmem:[#allocation49_spill] sm:$0xff]  ;;  %v8738_v35 = vld [vmem:[#allocation10_spill] sm:$0xff]  ;;  %v8739_v55 = vld [vmem:[#allocation35_spill] sm:$0xff] }
 0x169   : > { %v1128_v27 = vsel %vm1108_vm7, %v1095_v51, %v8718_v1  ;;  %v1225_v8 = vsel %vm1207_vm11, %v1192_v43, %v5855_v42  ;;  %v8722_v42 = vld [vmem:[#allocation7_spill] sm:$0xff] }
 0x16a   : > { %v1022_v44 = vpop.permute.xlu1 %1021  ;;  %v1161_v49 = vsel %vm1141_vm8, %v1128_v27, %v5724_v25  ;;  %v1258_v61 = vsel %vm1240_vm12, %v1225_v8, %v5885_v28  ;;  %v1097_v37 = vsel %vm1075_vm6, %v8722_v42, %v8721_v26  ;;  %v8740_v27 = vld [vmem:[#allocation32_spill] sm:$0xff] }
 0x16b   : > { %v1052_v21 = vpop.permute.xlu0 %1051  ;;  %v1285_v22 = vsel %vm1273_vm13, %v1252_v52, %v1022_v44  ;;  %v1194_v33 = vsel %vm1174_vm10, %v1161_v49, %v5798_v31  ;;  %v8724_v52 = vld [vmem:[#allocation20_spill] sm:$0xff]  ;;  %v8741_v49 = vld [vmem:[#allocation39_spill] sm:$0xff] }
 0x16c   : > { %v1316_v47 = vsel %vm1306_vm14, %v1283_v3, %v1052_v21  ;;  %v1227_v6 = vsel %vm1207_vm11, %v1194_v33, %v8719_v60  ;;  %v1130_v3 = vsel %vm1108_vm7, %v1097_v37, %v8723_v12 }
 0x16d   : > { %4259 = vmatprep.mubr.msk.bf16.mxu0 %vm1366_vm15, %v1316_v47  ;;  %v1260_v44 = vsel %vm1240_vm12, %v1227_v6, %v8720_v38  ;;  %v8725_v47 = vld [vmem:[#allocation8_spill] sm:$0xff]  ;;  %v1163_v17 = vsel %vm1141_vm8, %v1130_v3, %v8726_v9 }
 0x16e   : > { %v1054_v29 = vpop.permute.xlu1 %1053  ;;  %v1099_v18 = vsel %vm1075_vm6, %v8725_v47, %v8724_v52  ;;  %v8746_v47 = vld [vmem:[#allocation47_spill] sm:$0xff] }
 0x16f   : > { %v1318_v23 = vsel %vm1306_vm14, %v1285_v22, %v1054_v29  ;;  %v1024_v48 = vpop.permute.xlu0 %1023  ;;  %v8727_v29 = vld [vmem:[#allocation30_spill] sm:$0xff] }
 0x170   : > { %4260 = vmatmul.mubr.msk.bf16.gmra.mrb[8].mxu0 %vm1366_vm15, %v1318_v23  ;;  %v1287_v45 = vsel %vm1273_vm13, %v1254_v16, %v1024_v48  ;;  %v1132_v62 = vsel %vm1108_vm7, %v1099_v18, %v8727_v29  ;;  %v1196_v23 = vsel %vm1174_vm10, %v1163_v17, %v8728_v14  ;;  %v6117_v29 = vld [vmem:[%s8558_s2] ss:$0 sm:$0xff] }
 0x171   : > { %v1165_v63 = vsel %vm1141_vm8, %v1132_v62, %v8729_v20  ;;  %v1229_v48 = vsel %vm1207_vm11, %v1196_v23, %v8730_v50 }
 0x172   : > { %v1026_v54 = vpop.permute.xlu1 %1025  ;;  %v1198_v34 = vsel %vm1174_vm10, %v1165_v63, %v8731_v39  ;;  %v1262_v32 = vsel %vm1240_vm12, %v1229_v48, %v8732_v2 }
 0x173   : > { %v1056_v57 = vpop.permute.xlu0 %1055  ;;  %v1289_v13 = vsel %vm1273_vm13, %v1256_v7, %v1026_v54  ;;  %v8733_v54 = vld [vmem:[#allocation44_spill] sm:$0xff] }
 0x174   : > { %v1320_v5 = vsel %vm1306_vm14, %v1287_v45, %v1056_v57  ;;  %v1231_v58 = vsel %vm1207_vm11, %v1198_v34, %v8733_v54 }
 0x175   : > { %4263 = vmatprep.mubr.msk.bf16.mxu0 %vm1366_vm15, %v1320_v5  ;;  %v1264_v45 = vsel %vm1240_vm12, %v1231_v58, %v5895_v4 }
 0x176   : > { %v1058_v11 = vpop.permute.xlu1 %1057 }
 0x177   : > { %v1322_v46 = vsel %vm1306_vm14, %v1289_v13, %v1058_v11  ;;  %v1028_v30 = vpop.permute.xlu0 %1027  ;;  %v8735_v13 = vld [vmem:[#allocation9_spill] sm:$0xff] }
 0x178   : > { %4264 = vmatmul.mubr.msk.bf16.gmra.mrb[12].mxu0 %vm1366_vm15, %v1322_v46  ;;  %v1291_v15 = vsel %vm1273_vm13, %v1258_v61, %v1028_v30  ;;  %v1101_v11 = vsel %vm1075_vm6, %v8735_v13, %v8734_v40  ;;  %v8737_v46 = vld [vmem:[#allocation22_spill] sm:$0xff]  ;;  %v8743_v61 = vld [vmem:[#allocation45_spill] sm:$0xff] }
 0x179   : > { %v1134_v4 = vsel %vm1108_vm7, %v1101_v11, %v8736_v59  ;;  %v1103_v51 = vsel %vm1075_vm6, %v8738_v35, %v8737_v46  ;;  %vm2964_vm6 = vcmask 523264  }
 0x17a   : > { %v1030_v10 = vpop.permute.xlu1 %1029  ;;  %v1167_v30 = vsel %vm1141_vm8, %v1134_v4, %v8739_v55  ;;  %v1136_v43 = vsel %vm1108_vm7, %v1103_v51, %v8740_v27 }
 0x17b   : > { %v1060_v24 = vpop.permute.xlu0 %1059  ;;  %v1293_v31 = vsel %vm1273_vm13, %v1260_v44, %v1030_v10  ;;  %v1200_v8 = vsel %vm1174_vm10, %v1167_v30, %v8741_v49  ;;  %v8742_v10 = vld [vmem:[#allocation36_spill] sm:$0xff]  ;;  %v8745_v44 = vld [vmem:[#allocation46_spill] sm:$0xff] }
 0x17c   : > { %v1324_v25 = vsel %vm1306_vm14, %v1291_v15, %v1060_v24  ;;  %v1169_v33 = vsel %vm1141_vm8, %v1136_v43, %v8742_v10  ;;  %v1233_v60 = vsel %vm1207_vm11, %v1200_v8, %v8743_v61  ;;  %v8744_v15 = vld [vmem:[#allocation40_spill] sm:$0xff]  ;;  %vm3056_vm8 = vcmask 588800  }
 0x17d   : > { %4267 = vmatprep.mubr.msk.bf16.mxu0 %vm1366_vm15, %v1324_v25  ;;  %v1202_v24 = vsel %vm1174_vm10, %v1169_v33, %v8744_v15  ;;  %v8755_v49 = vld [vmem:[#allocation12_spill] sm:$0xff]  ;;  %v8756_v15 = vld [vmem:[#allocation41_spill] sm:$0xff] }
 0x17e   : > { %v1062_v28 = vpop.permute.xlu1 %1061  ;;  %v1235_v25 = vsel %vm1207_vm11, %v1202_v24, %v8745_v44  ;;  %v1799_v24 = vrot.slane %v8756_v15, 1  ;;  %vm3488_vm11 = vcmask 1044484  }
 0x17f   : > { %v1326_v21 = vsel %vm1306_vm14, %v1293_v31, %v1062_v28  ;;  %v1032_v22 = vpop.permute.xlu0 %1031 }
 0x180   : > { %4268 = vmatmul.mubr.msk.bf16.gmra.mrb[16].mxu0 %vm1366_vm15, %v1326_v21  ;;  %v1295_v16 = vsel %vm1273_vm13, %v1262_v32, %v1032_v22 }
 0x182   : > { %v1034_v36 = vpop.permute.xlu1 %1033 }
 0x183   : > { %v1064_v0 = vpop.permute.xlu0 %1063  ;;  %v1297_v7 = vsel %vm1273_vm13, %v1264_v45, %v1034_v36 }
 0x184   : > { %v1328_v57 = vsel %vm1306_vm14, %v1295_v16, %v1064_v0 }
 0x185   : > { %4271 = vmatprep.mubr.msk.bf16.mxu0 %vm1366_vm15, %v1328_v57 }
 0x186   : > { %v1066_v5 = vpop.permute.xlu1 %1065 }
 0x187   : > { %v1330_v19 = vsel %vm1306_vm14, %v1297_v7, %v1066_v5  ;;  %v1004_v53 = vpop.permute.xlu0 %1003 }
 0x188   : > { %4272 = vmatmul.mubr.msk.bf16.gmra.mrb[20].mxu0 %vm1366_vm15, %v1330_v19  ;;  %v1266_v38 = vsel %vm1240_vm12, %v1233_v60, %v1004_v53 }
 0x18a   : > { %v1006_v41 = vpop.permute.xlu1 %1005 }
 0x18b   : > { %v1036_v1 = vpop.permute.xlu0 %1035  ;;  %v1268_v37 = vsel %vm1240_vm12, %v1235_v25, %v1006_v41 }
 0x18c   : > { %v1299_v26 = vsel %vm1273_vm13, %v1266_v38, %v1036_v1 }
 0x18e   : > { %v1038_v6 = vpop.permute.xlu1 %1037 }
 0x18f   : > { %v1068_v42 = vpop.permute.xlu0 %1067  ;;  %v1301_v28 = vsel %vm1273_vm13, %v1268_v37, %v1038_v6 }
 0x190   : > { %v1332_v31 = vsel %vm1306_vm14, %v1299_v26, %v1068_v42 }
 0x191   : > { %4275 = vmatprep.mubr.msk.bf16.mxu0 %vm1366_vm15, %v1332_v31  ;;  %v8757_v31 = vld [vmem:[#allocation3_spill] sm:$0xff] }
 0x192   : > { %v1070_v12 = vpop.permute.xlu1 %1069 }
 0x193   : > { %v1334_v3 = vsel %vm1306_vm14, %v1301_v28, %v1070_v12  ;;  %v1008_v21 = vpop.permute.xlu0 %1007  ;;  %v8758_v28 = vrot.slane %v8757_v31, 1 }
 0x194   : > { %4276 = vmatmul.mubr.msk.bf16.gmra.mrb[24].mxu0 %vm1366_vm15, %v1334_v3  ;;  %v1270_v18 = vsel %vm1240_vm12, %v8746_v47, %v1008_v21 }
 0x195   : > { %v6180_v12 = vsel %vm753_vm4, %v8758_v28, %v1799_v24 }
 0x196   : > { %8759 = vst [vmem:[#allocation17_spill] sm:$0xff] %v6180_v12 }
 0x197   : > { %v1040_v52 = vpop.permute.xlu0 %1039 }
 0x198   : > { %v1303_v9 = vsel %vm1273_vm13, %v1270_v18, %v1040_v52 }
 0x19b   : > { %v1072_v17 = vpop.permute.xlu0 %1071 }
 0x19c   : > { %v1336_v22 = vsel %vm1306_vm14, %v1303_v9, %v1072_v17 }
 0x19d   : > { %4279 = vmatprep.mubr.msk.bf16.mxu0 %vm1366_vm15, %v1336_v22 }
 0x233   : > { %v4253_v62 = vpop.f32.mrb[0].mxu0 }
 0x234   : > { %v6120_v14 = vadd.f32 %v4253_v62, %v6117_v29  ;;  %v1437_v23 = vpop.f32.mrb[1].mxu0 }
 0x235   : > { %v6123_v20 = vadd.f32 %v6117_v29, %v1437_v23  ;;  %v4254_v63 = vpop.f32.mrb[2].mxu0 }
 0x236   : > { %8747 = vst [vmem:[#allocation2_spill] sm:$0xff] %v6120_v14  ;;  %v1566_v50 = vmax.f32 %v6120_v14, 0.0  ;;  %v6127_v48 = vadd.f32 %v4254_v63, %v6117_v29  ;;  %v1440_v36 = vpop.f32.mrb[3].mxu0 }
 0x237   : > { %8748 = vst [vmem:[#allocation24_spill] sm:$0xff] %v6123_v20  ;;  %v1564_v39 = vmax.f32 %v6123_v20, 0.0  ;;  %v6131_v34 = vadd.f32 %v6117_v29, %v1440_v36 }
 0x238   : > { %8749 = vst [vmem:[#allocation14_spill] sm:$0xff] %v6127_v48  ;;  %v1635_v2 = vrot.slane %v1566_v50, 7  ;;  %v1567_v32 = vmax.f32 %v6127_v48, 0.0 }
 0x239   : > { %8750 = vst [vmem:[#allocation15_spill] sm:$0xff] %v6131_v34  ;;  %v1632_v54 = vrot.slane %v1564_v39, 7  ;;  %v1565_v58 = vmax.f32 %v6131_v34, 0.0 }
 0x23a   : > { %v1636_v16 = vrot.slane %v1567_v32, 7  ;;  %v6136_v57 = vsel %vm491_vm0, 0.0, %v1635_v2 }
 0x23b   : > { %v1633_v0 = vrot.slane %v1565_v58, 7  ;;  %v4257_v45 = vpop.f32.mrb[4].mxu0  ;;  %8751 = vst [vmem:[#allocation5_spill] sm:$0xff] %v6136_v57  ;;  %v6139_v7 = vsel %vm491_vm0, 0.0, %v1632_v54  ;;  %v1887_v4 = vrot.slane %v6136_v57, 2  ;;  %v1806_v38 = vrot.slane %v6136_v57, 1 }
 0x23c   : > { %8752 = vst [vmem:[#allocation25_spill] sm:$0xff] %v6139_v7  ;;  %v6142_v5 = vsel %vm491_vm0, %v1635_v2, %v1636_v16  ;;  %v1748_v19 = vsel %vm491_vm0, %v1636_v16, 0.0  ;;  %v1453_v53 = vpop.f32.mrb[5].mxu0  ;;  %v1801_v46 = vrot.slane %v6139_v7, 1  ;;  %v4361_v51 = vpack.i.bf16 %v6139_v7, %v8706_v56 }
 0x23d   : > { %8753 = vst [vmem:[#allocation16_spill] sm:$0xff] %v6142_v5  ;;  %v1888_v40 = vrot.slane %v6142_v5, 2  ;;  %v1890_v13 = vrot.slane %v1748_v19, 2  ;;  %v4258_v11 = vpop.f32.mrb[6].mxu0  ;;  %v6147_v41 = vsel %vm491_vm0, %v1632_v54, %v1633_v0  ;;  %v1807_v61 = vrot.slane %v6142_v5, 1 }
 0x23e   : > { %8754 = vst [vmem:[#allocation26_spill] sm:$0xff] %v6147_v41  ;;  %v1456_v59 = vpop.f32.mrb[7].mxu0  ;;  %v1802_v35 = vrot.slane %v6147_v41, 1  ;;  %4362 = vrot.lane.b32.xlu1 %v4361_v51, %s5037_s29  ;;  %v1809_v60 = vrot.slane %v1748_v19, 1  ;;  %v4381_v6 = vpack.i.bf16 %v6136_v57, %v6147_v41  ;;  %v6167_v44 = vsel %vm491_vm0, %v1633_v0, 0.0 }
 0x23f   : > { %v1889_v55 = vsel %vm1876_vm9, %v1887_v4, %v1888_v40  ;;  %v1891_v30 = vsel %vm1876_vm9, %v1888_v40, %v1890_v13  ;;  %v4391_v25 = vpack.i.bf16 %v6142_v5, %v6136_v57  ;;  %v1808_v26 = vsel %vm753_vm4, %v1806_v38, %v1807_v61 }
 0x240   : > { %v1803_v1 = vsel %vm753_vm4, %v1801_v46, %v1802_v35  ;;  %v4376_v27 = vpack.i.bf16 %v1891_v30, %v1889_v55  ;;  %v6174_v42 = vsel %vm753_vm4, %v1807_v61, %v1809_v60  ;;  %v1804_v3 = vrot.slane %v6167_v44, 1 }
 0x241   : > { %v4366_v8 = vpack.i.bf16 %v1803_v1, %v8755_v49  ;;  %v6186_v52 = vadd.f32 %v4257_v45, %v6117_v29  ;;  %v4396_v47 = vpack.i.bf16 %v6174_v42, %v1808_v26  ;;  %v6191_v9 = vadd.f32 %v6117_v29, %v1453_v53 }
 0x242   : > { %4377 = vrot.lane.b32.xlu0 %v4376_v27, %s5035_s27  ;;  %v6196_v22 = vadd.f32 %v6117_v29, %v1456_v59  ;;  %v4406_v62 = vpack.i.bf16 %v1803_v1, %v6180_v12  ;;  %v1805_v23 = vsel %vm753_vm4, %v1802_v35, %v1804_v3  ;;  %v6203_v50 = vadd.f32 %v4258_v11, %v6117_v29 }
 0x243   : > { %v4261_v43 = vpop.f32.mrb[8].mxu0  ;;  %4367 = vrot.lane.b32.xlu1 %v4366_v8, %s5039_s12  ;;  %8760 = vst [vmem:[#allocation6_spill] sm:$0xff] %v6186_v52  ;;  %8761 = vst [vmem:[#allocation27_spill] sm:$0xff] %v6191_v9  ;;  %v1570_v63 = vmax.f32 %v6186_v52, 0.0  ;;  %v1568_v36 = vmax.f32 %v6191_v9, 0.0  ;;  %v4421_v2 = vpack.i.bf16 %v1808_v26, %v1805_v23  ;;  %v1883_v4 = vrot.slane %v6147_v41, 2 }
 0x244   : > { %v1469_v10 = vpop.f32.mrb[9].mxu0  ;;  %8762 = vst [vmem:[#allocation18_spill] sm:$0xff] %v6196_v22  ;;  %8763 = vst [vmem:[#allocation28_spill] sm:$0xff] %v6203_v50  ;;  %v1569_v39 = vmax.f32 %v6196_v22, 0.0  ;;  %v1571_v16 = vmax.f32 %v6203_v50, 0.0  ;;  %v6216_v40 = vadd.f32 %v4261_v43, %v6117_v29  ;;  %v1885_v51 = vrot.slane %v6167_v44, 2 }
 0x245   : > { %v4262_v33 = vpop.f32.mrb[10].mxu0  ;;  %v1641_v58 = vrot.slane %v1570_v63, 7  ;;  %v1638_v45 = vrot.slane %v1568_v36, 7  ;;  %v6223_v59 = vadd.f32 %v6117_v29, %v1469_v10  ;;  %v1882_v43 = vrot.slane %v6139_v7, 2 }
 0x246   : > { %v1472_v56 = vpop.f32.mrb[11].mxu0  ;;  %4382 = vrot.lane.b32.xlu0 %v4381_v6, %s5037_s29  ;;  %v1639_v53 = vrot.slane %v1569_v39, 7  ;;  %8764 = vst [vmem:[#allocation42_spill] sm:$0xff] %v6216_v40  ;;  %v1642_v11 = vrot.slane %v1571_v16, 7  ;;  %v6230_v35 = vadd.f32 %v4262_v33, %v6117_v29  ;;  %v1574_v30 = vmax.f32 %v6216_v40, 0.0 }
 0x247   : > { %4392 = vrot.lane.b32.xlu1 %v4391_v25, %s5040_s15  ;;  %v6220_v13 = vsel %vm491_vm0, 0.0, %v1641_v58  ;;  %8766 = vst [vmem:[#allocation19_spill] sm:$0xff] %v6223_v59  ;;  %v6227_v46 = vsel %vm491_vm0, 0.0, %v1638_v45  ;;  %v6238_v1 = vadd.f32 %v6117_v29, %v1472_v56  ;;  %v1572_v56 = vmax.f32 %v6223_v59, 0.0 }
 0x248   : > { %8765 = vst [vmem:[#allocation49_spill] sm:$0xff] %v6220_v13  ;;  %8767 = vst [vmem:[#allocation7_spill] sm:$0xff] %v6227_v46  ;;  %v6234_v55 = vsel %vm491_vm0, %v1638_v45, %v1639_v53  ;;  %v1897_v8 = vrot.slane %v6220_v13, 2  ;;  %v1811_v33 = vrot.slane %v6227_v46, 1  ;;  %v6249_v61 = vsel %vm491_vm0, %v1641_v58, %v1642_v11 }
 0x249   : > { %8768 = vst [vmem:[#allocation29_spill] sm:$0xff] %v6230_v35  ;;  %8769 = vst [vmem:[#allocation20_spill] sm:$0xff] %v6234_v55  ;;  %v6252_v60 = vsel %vm491_vm0, %v1642_v11, 0.0  ;;  %v6258_v15 = vsel %vm491_vm0, %v1639_v53, 0.0  ;;  %v1575_v24 = vmax.f32 %v6230_v35, 0.0  ;;  %v4441_v38 = vpack.i.bf16 %v6220_v13, %v6234_v55 }
 0x24a   : > { %4387 = vrot.lane.b32.xlu0 %v4376_v27, %s5041_s16  ;;  %8770 = vst [vmem:[#allocation8_spill] sm:$0xff] %v6238_v1  ;;  %8771 = vst [vmem:[#allocation33_spill] sm:$0xff] %v6249_v61  ;;  %v1884_v44 = vsel %vm1876_vm9, %v1882_v43, %v1883_v4  ;;  %v1647_v26 = vrot.slane %v1574_v30, 7  ;;  %v1573_v28 = vmax.f32 %v6238_v1, 0.0  ;;  %v1819_v39 = vrot.slane %v6252_v60, 1 }
 0x24b   : > { %v4265_v37 = vpop.f32.mrb[12].mxu0  ;;  %4397 = vrot.lane.b32.xlu1 %v4396_v47, %s5042_s17  ;;  %v1886_v47 = vsel %vm1876_vm9, %v1883_v4, %v1885_v51  ;;  %v1900_v58 = vrot.slane %v6252_v60, 2  ;;  %v8583_v16 = vrot.slane %v6234_v55, 1  ;;  %v1648_v53 = vrot.slane %v1575_v24, 7 }
 0x24c   : > { %v6183_v21 = vpop.f32.mrb[13].mxu0  ;;  %v6268_v3 = vadd.f32 %v4265_v37, %v6117_v29  ;;  %v4416_v36 = vpack.i.bf16 %v1886_v47, %v1884_v44  ;;  %v1644_v37 = vrot.slane %v1572_v56, 7  ;;  %v6287_v4 = vsel %vm491_vm0, 0.0, %v1647_v26 }
 0x24d   : > { %v4266_v18 = vpop.f32.mrb[14].mxu0  ;;  %8774 = vst [vmem:[#allocation34_spill] sm:$0xff] %v6287_v4  ;;  %v1645_v51 = vrot.slane %v1573_v28, 7  ;;  %v6306_v43 = vsel %vm491_vm0, %v1647_v26, %v1648_v53  ;;  %v6364_v23 = vsel %vm753_vm4, %v1811_v33, %v8583_v16  ;;  %v8815_v14 = vrot.slane %v6287_v4, 1 }
 0x24e   : > { %v6193_v17 = vpop.f32.mrb[15].mxu0  ;;  %4407 = vrot.lane.b32.xlu0 %v4406_v62, %s5033_s25  ;;  %8772 = vst [vmem:[#allocation30_spill] sm:$0xff] %v6268_v3  ;;  %v6274_v63 = vadd.f32 %v4266_v18, %v6117_v29  ;;  %v4446_v18 = vpack.i.bf16 %v6234_v55, %v6227_v46  ;;  %v1578_v30 = vmax.f32 %v6268_v3, 0.0  ;;  %v6297_v24 = vsel %vm491_vm0, 0.0, %v1644_v37  ;;  %8777 = vst [vmem:[#allocation50_spill] sm:$0xff] %v6306_v43 }
 0x24f   : > { %4402 = vrot.lane.b32.xlu1 %v4376_v27, %s5043_s20  ;;  %v6323_v26 = vsel %vm491_vm0, %v1645_v51, 0.0 }
 0x250   : > { %8773 = vst [vmem:[#allocation37_spill] sm:$0xff] %v6274_v63  ;;  %v1579_v60 = vmax.f32 %v6274_v63, 0.0 }
 0x252   : > { %4422 = vrot.lane.b32.xlu0 %v4421_v2, %s5039_s12 }
 0x253   : > { %v4269_v32 = vpop.f32.mrb[16].mxu0  ;;  %4412 = vrot.lane.b32.xlu1 %v4421_v2, %s5033_s25  ;;  %v1898_v2 = vrot.slane %v6249_v61, 2 }
 0x254   : > { %v1501_v54 = vpop.f32.mrb[17].mxu0  ;;  %v6293_v56 = vadd.f32 %v4269_v32, %v6117_v29  ;;  %v6309_v32 = vsel %vm491_vm0, %v1648_v53, 0.0  ;;  %v1654_v53 = vrot.slane %v1579_v60, 7 }
 0x255   : > { %v6211_v0 = vpop.f32.mrb[18].mxu0  ;;  %v1899_v44 = vsel %vm1876_vm9, %v1897_v8, %v1898_v2  ;;  %v1901_v28 = vsel %vm1876_vm9, %v1898_v2, %v1900_v58  ;;  %v6318_v8 = vsel %vm491_vm0, %v1644_v37, %v1645_v51  ;;  %v1653_v2 = vrot.slane %v1578_v30, 7 }
 0x256   : > { %v6213_v19 = vpop.f32.mrb[19].mxu0  ;;  %4442 = vrot.lane.b32.xlu0 %v4441_v38, %s5037_s29  ;;  %8775 = vst [vmem:[#allocation43_spill] sm:$0xff] %v6293_v56  ;;  %v6300_v38 = vadd.f32 %v6117_v29, %v1501_v54  ;;  %v6320_v58 = vpack.i.bf16 %v1901_v28, %v1899_v44  ;;  %v1582_v62 = vmax.f32 %v6293_v56, 0.0  ;;  %v6380_v33 = vsel %vm491_vm0, %v1654_v53, 0.0 }
 0x257   : > { %4417 = vrot.lane.b32.xlu1 %v4416_v36, %s5035_s27  ;;  %v6333_v30 = vadd.f32 %v6117_v29, %v6213_v19  ;;  %v5015_v19 = vld [vmem:[%s8559_s3] sm:$0xff]   ;;  %v6352_v60 = vsel %vm491_vm0, 0.0, %v1653_v2  ;;  %v6355_v44 = vsel %vm491_vm0, %v1653_v2, %v1654_v53  ;;  %v8782_v2 = vrot.slane %v6249_v61, 1 }
 0x258   : > { %8776 = vst [vmem:[#allocation38_spill] sm:$0xff] %v6300_v38  ;;  %v1580_v37 = vmax.f32 %v6300_v38, 0.0  ;;  %8780 = vst [vmem:[#allocation9_spill] sm:$0xff] %v6352_v60  ;;  %v1659_v28 = vrot.slane %v1582_v62, 7  ;;  %4283 = vmatprep.subr.bf16.mxu1 %v5015_v19  ;;  %v8783_v62 = vrot.slane %v6220_v13, 1 }
 0x259   : > { %8779 = vst [vmem:[#allocation21_spill] sm:$0xff] %v6333_v30  ;;  %8781 = vst [vmem:[#allocation31_spill] sm:$0xff] %v6355_v44  ;;  %v1581_v49 = vmax.f32 %v6333_v30, 0.0  ;;  %v8784_v35 = vmov %v8782_v2  ;;  %4284 = vmatpush3.bf16.msra.mxu1 %v5015_v19  ;;  %v8789_v19 = vrot.slane %v6258_v15, 1 }
 0x25a   : > { %4447 = vrot.lane.b32.xlu0 %v4446_v18, %s5040_s15  ;;  %v6313_v18 = vadd.f32 %v6211_v0, %v6117_v29  ;;  %v4431_v0 = vpack.i.bf16 %v6227_v46, %v6142_v5  ;;  %v1656_v45 = vrot.slane %v1580_v37, 7  ;;  %v1818_v63 = vsel %vm753_vm4, %v8783_v62, %v8782_v2 }
 0x25b   : > { %v6240_v27 = vpop.f32.mrb[20].mxu0  ;;  %4427 = vrot.lane.b32.xlu1 %v4416_v36, %s5041_s16  ;;  %v6377_v1 = vsel %vm753_vm4, %v8784_v35, %v1819_v39  ;;  %v6394_v35 = vadd.f32 %v6117_v29, %v6193_v17  ;;  %v1657_v22 = vrot.slane %v1581_v49, 7 }
 0x25c   : > { %v6245_v10 = vpop.f32.mrb[21].mxu0  ;;  %8778 = vst [vmem:[#allocation44_spill] sm:$0xff] %v6313_v18  ;;  %v1583_v36 = vmax.f32 %v6313_v18, 0.0  ;;  %v6384_v16 = vadd.f32 %v6240_v27, %v6117_v29  ;;  %v6402_v27 = vpack.i.bf16 %v6364_v23, %v6174_v42  ;;  %v4461_v17 = vpack.i.bf16 %v6377_v1, %v1818_v63 }
 0x25d   : > { %v6255_v6 = vpop.f32.mrb[22].mxu0  ;;  %v6388_v50 = vadd.f32 %v6117_v29, %v6245_v10  ;;  %8787 = vst [vmem:[#allocation35_spill] sm:$0xff] %v6394_v35  ;;  %v5016_v10 = vld [vmem:[%s8559_s3 + $0x8] sm:$0xff]   ;;  %v6420_v2 = vsel %vm491_vm0, 0.0, %v1656_v45 }
 0x25e   : > { %v6264_v25 = vpop.f32.mrb[23].mxu0  ;;  %4452 = vrot.lane.b32.xlu0 %v6320_v58, %s5035_s27  ;;  %v1660_v37 = vrot.slane %v1583_v36, 7  ;;  %8785 = vst [vmem:[#allocation22_spill] sm:$0xff] %v6384_v16  ;;  %v6398_v39 = vadd.f32 %v6255_v6, %v6117_v29  ;;  %v6409_v36 = vsel %vm491_vm0, 0.0, %v1659_v28  ;;  %v8790_v6 = vrot.slane %v6234_v55, 1  ;;  %8791 = vst [vmem:[#allocation39_spill] sm:$0xff] %v6420_v2  ;;  %4285 = vmatprep.subr.bf16.mxu1 %v5016_v10 }
 0x25f   : > { %4432 = vrot.lane.b32.xlu1 %v4431_v0, %s5037_s29  ;;  %v4436_v0 = vpack.i.bf16 %v6249_v61, %v6220_v13  ;;  %8786 = vst [vmem:[#allocation10_spill] sm:$0xff] %v6388_v50  ;;  %v1586_v30 = vmax.f32 %v6384_v16, 0.0  ;;  %v1584_v18 = vmax.f32 %v6388_v50, 0.0  ;;  %4286 = vmatpush3.bf16.msra.mxu1 %v5016_v10  ;;  %v8827_v5 = vrot.slane %v6409_v36, 1 }
 0x260   : > { %8788 = vst [vmem:[#allocation32_spill] sm:$0xff] %v6398_v39  ;;  %v6425_v53 = vsel %vm491_vm0, %v1659_v28, %v1660_v37  ;;  %v6448_v10 = vsel %vm491_vm0, %v1660_v37, 0.0 }
 0x261   : > { %v1665_v42 = vrot.slane %v1586_v30, 7 }
 0x262   : > { %4457 = vrot.lane.b32.xlu0 %v6320_v58, %s5041_s16 }
 0x263   : > { %4437 = vrot.lane.b32.xlu1 %v4436_v0, %s5040_s15  ;;  %v1815_v0 = vsel %vm753_vm4, %v8790_v6, %v8789_v19  ;;  %v6431_v19 = vadd.f32 %v6117_v29, %v6264_v25  ;;  %v1587_v6 = vmax.f32 %v6398_v39, 0.0  ;;  %v5017_v25 = vld [vmem:[%s8559_s3 + $0x10] sm:$0xff]  }
 0x264   : > { %v4491_v28 = vpack.i.bf16 %v1818_v63, %v1815_v0  ;;  %v6455_v63 = vsel %vm491_vm0, %v1657_v22, 0.0  ;;  %4287 = vmatprep.subr.bf16.mxu1 %v5017_v25  ;;  %v4496_v30 = vpack.i.bf16 %v1815_v0, %v6364_v23 }
 0x265   : > { %8792 = vst [vmem:[#allocation36_spill] sm:$0xff] %v6431_v19  ;;  %v1585_v34 = vmax.f32 %v6431_v19, 0.0  ;;  %v1666_v37 = vrot.slane %v1587_v6, 7  ;;  %4288 = vmatpush3.bf16.msra.mxu1 %v5017_v25  ;;  %v5018_v25 = vld [vmem:[%s8559_s3 + $0x18] sm:$0xff]  }
 0x266   : > { %4472 = vrot.lane.b32.xlu0 %v6402_v27, %s5033_s25  ;;  %4289 = vmatprep.subr.bf16.mxu1 %v5018_v25 }
 0x267   : > { %v4277_v47 = vpop.f32.mrb[24].mxu0  ;;  %4462 = vrot.lane.b32.xlu1 %v4461_v17, %s5042_s17  ;;  %v8798_v17 = vrot.slane %v6234_v55, 2 }
 0x268   : > { %v1533_v11 = vpop.f32.mrb[25].mxu0  ;;  %v6437_v62 = vadd.f32 %v4277_v47, %v6117_v29  ;;  %v6452_v47 = vsel %vm491_vm0, %v1656_v45, %v1657_v22 }
 0x269   : > { %v6337_v51 = vpop.f32.mrb[26].mxu0  ;;  %v6442_v48 = vadd.f32 %v6117_v29, %v1533_v11  ;;  %8795 = vst [vmem:[#allocation46_spill] sm:$0xff] %v6452_v47  ;;  %v1662_v11 = vrot.slane %v1584_v18, 7  ;;  %v8801_v6 = vmov %v8798_v17  ;;  %4290 = vmatpush3.bf16.msra.mxu1 %v5018_v25  ;;  %v8825_v41 = vrot.slane %v6452_v47, 1 }
 0x26a   : > { %v6344_v54 = vpop.f32.mrb[27].mxu0  ;;  %8793 = vst [vmem:[#allocation45_spill] sm:$0xff] %v6437_v62  ;;  %4492 = vrot.lane.b32.xlu0 %v4491_v28, %s5039_s12  ;;  %v6461_v49 = vadd.f32 %v6337_v51, %v6117_v29  ;;  %v1590_v45 = vmax.f32 %v6437_v62, 0.0  ;;  %v8799_v51 = vrot.slane %v6227_v46, 2 }
 0x26b   : > { %8794 = vst [vmem:[#allocation40_spill] sm:$0xff] %v6442_v48  ;;  %4467 = vrot.lane.b32.xlu1 %v6320_v58, %s5043_s20  ;;  %v6468_v22 = vadd.f32 %v6117_v29, %v6344_v54  ;;  %v1588_v18 = vmax.f32 %v6442_v48, 0.0  ;;  %v8800_v58 = vrot.slane %v6258_v15, 2  ;;  %v6500_v54 = vsel %vm491_vm0, %v1665_v42, %v1666_v37 }
 0x26c   : > { %8796 = vst [vmem:[#allocation47_spill] sm:$0xff] %v6461_v49  ;;  %v1894_v39 = vsel %vm1876_vm9, %v8799_v51, %v8798_v17  ;;  %v6492_v17 = vsel %vm491_vm0, 0.0, %v1665_v42  ;;  %v1663_v51 = vrot.slane %v1585_v34, 7  ;;  %v1671_v3 = vrot.slane %v1590_v45, 7 }
 0x26d   : > { %8797 = vst [vmem:[#allocation12_spill] sm:$0xff] %v6468_v22  ;;  %v1896_v19 = vsel %vm1876_vm9, %v8801_v6, %v8800_v58  ;;  %8802 = vst [vmem:[#allocation41_spill] sm:$0xff] %v6492_v17  ;;  %v1591_v58 = vmax.f32 %v6461_v49, 0.0  ;;  %v6497_v6 = vsel %vm491_vm0, 0.0, %v1662_v11  ;;  %v1668_v0 = vrot.slane %v1588_v18, 7 }
 0x26e   : > { %4497 = vrot.lane.b32.xlu0 %v4496_v30, %s5042_s17  ;;  %v6503_v30 = vsel %vm491_vm0, %v1666_v37, 0.0  ;;  %v4501_v23 = vpack.i.bf16 %v1896_v19, %v1894_v39  ;;  %v1589_v15 = vmax.f32 %v6468_v22, 0.0  ;;  %v6513_v39 = vsel %vm491_vm0, %v1662_v11, %v1663_v51 }
 0x26f   : > { %4477 = vrot.lane.b32.xlu1 %v4491_v28, %s5033_s25  ;;  %8803 = vst [vmem:[#allocation51_spill] sm:$0xff] %v6513_v39  ;;  %v6516_v19 = vsel %vm491_vm0, %v1663_v51, 0.0  ;;  %v1672_v37 = vrot.slane %v1591_v58, 7  ;;  %v4521_v49 = vpack.i.bf16 %v6287_v4, %v6318_v8  ;;  %v6525_v42 = vsel %vm491_vm0, 0.0, %v1671_v3 }
 0x270   : > { %8804 = vst [vmem:[#allocation52_spill] sm:$0xff] %v6525_v42  ;;  %v6528_v11 = vsel %vm491_vm0, 0.0, %v1668_v0  ;;  %v1669_v51 = vrot.slane %v1589_v15, 7  ;;  %v1938_v58 = vrot.slane %v6500_v54, 2  ;;  %v1940_v62 = vrot.slane %v6503_v30, 2 }
 0x271   : > { %8805 = vst [vmem:[#allocation53_spill] sm:$0xff] %v6528_v11  ;;  %v1852_v45 = vrot.slane %v6513_v39, 1  ;;  %v1854_v18 = vrot.slane %v6516_v19, 1  ;;  %v1933_v25 = vrot.slane %v6513_v39, 2  ;;  %v1935_v28 = vrot.slane %v6516_v19, 2 }
 0x272   : > { %4502 = vrot.lane.b32.xlu0 %v4501_v23, %s5043_s20  ;;  %v6538_v34 = vsel %vm491_vm0, %v1671_v3, %v1672_v37  ;;  %v6541_v22 = vsel %vm491_vm0, %v1672_v37, 0.0  ;;  %v1866_v15 = vrot.slane %v6525_v42, 1  ;;  %v1947_v48 = vrot.slane %v6525_v42, 2 }
 0x273   : > { %4482 = vrot.lane.b32.xlu1 %v4501_v23, %s5035_s27  ;;  %8806 = vst [vmem:[#allocation54_spill] sm:$0xff] %v6538_v34  ;;  %v1861_v40 = vrot.slane %v6528_v11, 1  ;;  %v6551_v19 = vsel %vm491_vm0, %v1668_v0, %v1669_v51  ;;  %v8808_v3 = vrot.slane %v6306_v43, 2  ;;  %v8809_v37 = vrot.slane %v6287_v4, 2 }
 0x274   : > { %8807 = vst [vmem:[#allocation55_spill] sm:$0xff] %v6551_v19  ;;  %v1942_v52 = vrot.slane %v6528_v11, 2  ;;  %v1867_v9 = vrot.slane %v6538_v34, 1  ;;  %v1869_v56 = vrot.slane %v6541_v22, 1  ;;  %v1759_v0 = vsel %vm491_vm0, %v1669_v51, 0.0 }
 0x275   : > { %v1909_v16 = vsel %vm1876_vm9, %v8809_v37, %v8808_v3  ;;  %v8811_v59 = vmov %v8808_v3  ;;  %v8812_v3 = vrot.slane %v6318_v8, 1  ;;  %v8813_v37 = vrot.slane %v6297_v24, 1 }
 0x276   : > { %4522 = vrot.lane.b32.xlu0 %v4521_v49, %s5037_s29  ;;  %v4526_v49 = vpack.i.bf16 %v6318_v8, %v6297_v24  ;;  %v8816_v51 = vrot.slane %v6309_v32, 1  ;;  %v1862_v12 = vrot.slane %v6551_v19, 1  ;;  %v8833_v11 = vrot.slane %v6409_v36, 2 }
 0x277   : > { %4487 = vrot.lane.b32.xlu1 %v6402_v27, %s5039_s12  ;;  %v8810_v27 = vrot.slane %v6309_v32, 2  ;;  %v1943_v32 = vrot.slane %v6551_v19, 2 }
 0x279   : > { %v1911_v50 = vsel %vm1876_vm9, %v8811_v59, %v8810_v27  ;;  %v6575_v59 = vsel %vm753_vm4, %v8813_v37, %v8812_v3  ;;  %v8814_v27 = vrot.slane %v6306_v43, 1  ;;  %v8818_v3 = vrot.slane %v6323_v26, 1 }
 0x27a   : > { %4527 = vrot.lane.b32.xlu0 %v4526_v49, %s5040_s15  ;;  %v4531_v55 = vpack.i.bf16 %v1911_v50, %v1909_v16  ;;  %v8819_v37 = vrot.slane %v6318_v8, 1  ;;  %v6606_v50 = vpack.i.bf16 %v6575_v59, %v6377_v1  ;;  %v8824_v1 = vrot.slane %v6455_v63, 1 }
 0x27b   : > { %4507 = vrot.lane.b32.xlu1 %v4501_v23, %s5041_s16  ;;  %v1828_v20 = vsel %vm753_vm4, %v8815_v14, %v8814_v27  ;;  %v8817_v49 = vmov %v8814_v27  ;;  %v1950_v23 = vrot.slane %v6541_v22, 2  ;;  %v1864_v14 = vrot.slane %v1759_v0, 1 }
 0x27c   : > { %v6587_v38 = vsel %vm753_vm4, %v8817_v49, %v8816_v51  ;;  %v6596_v13 = vsel %vm753_vm4, %v8819_v37, %v8818_v3  ;;  %v1945_v27 = vrot.slane %v1759_v0, 2  ;;  %v4511_v51 = vpack.i.bf16 %v6297_v24, %v6249_v61 }
 0x27d   : > { %v4516_v22 = vpack.i.bf16 %v6306_v43, %v6287_v4  ;;  %v4541_v16 = vpack.i.bf16 %v6587_v38, %v1828_v20  ;;  %v4571_v49 = vpack.i.bf16 %v1828_v20, %v6596_v13  ;;  %v8820_v0 = vrot.slane %v6355_v44, 2 }
 0x27e   : > { %4532 = vrot.lane.b32.xlu0 %v4531_v55, %s5035_s27  ;;  %v8821_v3 = vrot.slane %v6352_v60, 2  ;;  %v8822_v61 = vrot.slane %v6380_v33, 2  ;;  %v8826_v20 = vrot.slane %v6425_v53, 1 }
 0x27f   : > { %4512 = vrot.lane.b32.xlu1 %v4511_v51, %s5037_s29  ;;  %v8823_v4 = vmov %v8820_v0  ;;  %v6626_v51 = vsel %vm753_vm4, %v8825_v41, %v8824_v1  ;;  %v8832_v1 = vrot.slane %v6425_v53, 2 }
 0x280   : > { %v1919_v37 = vsel %vm1876_vm9, %v8821_v3, %v8820_v0  ;;  %v1921_v46 = vsel %vm1876_vm9, %v8823_v4, %v8822_v61  ;;  %v6633_v57 = vsel %vm753_vm4, %v8827_v5, %v8826_v20  ;;  %v8828_v0 = vrot.slane %v6452_v47, 2 }
 0x281   : > { %v8829_v3 = vrot.slane %v6420_v2, 2  ;;  %v8830_v4 = vrot.slane %v6455_v63, 2  ;;  %v1929_v42 = vsel %vm1876_vm9, %v8833_v11, %v8832_v1  ;;  %v8834_v5 = vrot.slane %v6448_v10, 2 }
 0x282   : > { %v8831_v7 = vmov %v8828_v0  ;;  %v8835_v20 = vmov %v8832_v1  ;;  %4537 = vrot.lane.b32.xlu0 %v4531_v55, %s5041_s16  ;;  %v6664_v11 = vsel %vm753_vm4, %v1852_v45, %v1854_v18  ;;  %v8838_v1 = vrot.slane %v6492_v17, 1 }
 0x283   : > { %v1924_v61 = vsel %vm1876_vm9, %v8829_v3, %v8828_v0  ;;  %v1926_v41 = vsel %vm1876_vm9, %v8831_v7, %v8830_v4  ;;  %v1931_v19 = vsel %vm1876_vm9, %v8835_v20, %v8834_v5  ;;  %v8836_v0 = vrot.slane %v6492_v17, 2  ;;  %v5019_v7 = vld [vmem:[%s8559_s3 + $0x20] ss:$0 sps:$4 sm:$0xff]   ;;  %4517 = vrot.lane.b32.xlu1 %v4516_v22, %s5040_s15 }
 0x284   : > { %v1941_v3 = vsel %vm1876_vm9, %v1938_v58, %v1940_v62  ;;  %v8837_v4 = vrot.slane %v6500_v54, 1  ;;  %v8840_v20 = vrot.slane %v6448_v10, 1  ;;  %v8841_v62 = vrot.slane %v6425_v53, 1  ;;  %4326 = vmatprep.subr.msk.bf16.mxu1 %vm3105_vm1, %v5019_v7 }
 0x285   : > { %v1939_v63 = vsel %vm1876_vm9, %v8836_v0, %v1938_v58  ;;  %v8842_v0 = vrot.slane %v6497_v6, 1  ;;  %v8843_v18 = vrot.slane %v6497_v6, 2  ;;  %v8844_v10 = vrot.slane %v6538_v34, 2 }
 0x286   : > { %v6671_v5 = vsel %vm753_vm4, %v8838_v1, %v8837_v4  ;;  %v6678_v58 = vsel %vm753_vm4, %v8841_v62, %v8840_v20  ;;  %v1936_v4 = vsel %vm1876_vm9, %v1933_v25, %v1935_v28  ;;  %v6694_v20 = vsel %vm753_vm4, %v1862_v12, %v1864_v14  ;;  %4552 = vrot.lane.b32.xlu0 %v6606_v50, %s5033_s25 }
 0x287   : > { %8839 = vst [vmem:[#allocation56_spill] sm:$0xff] %v6671_v5  ;;  %v6683_v39 = vsel %vm753_vm4, %v8842_v0, %v1852_v45  ;;  %v1934_v17 = vsel %vm1876_vm9, %v8843_v18, %v1933_v25  ;;  %v1949_v1 = vsel %vm1876_vm9, %v1947_v48, %v8844_v10  ;;  %8845 = vst [vmem:[#allocation57_spill] sm:$0xff] %v6694_v20  ;;  %v8847_v45 = vrot.slane %v6503_v30, 1 }
 0x288   : > { %v6697_v62 = vsel %vm753_vm4, %v1866_v15, %v1867_v9  ;;  %v8848_v22 = vrot.slane %v6500_v54, 1  ;;  %v6707_v28 = vsel %vm753_vm4, %v1867_v9, %v1869_v56  ;;  %v6710_v25 = vsel %vm753_vm4, %v1861_v40, %v1862_v12  ;;  %4542 = vrot.lane.b32.xlu1 %v4541_v16, %s5042_s17  ;;  %v8863_v56 = vld [vmem:[#allocation41_spill] sm:$0xff] }
 0x289   : > { %8846 = vst [vmem:[#allocation58_spill] sm:$0xff] %v6697_v62  ;;  %8849 = vst [vmem:[#allocation59_spill] sm:$0xff] %v6710_v25  ;;  %v3107_v48 = vsel %vm3105_vm1, %v5019_v7, 0  ;;  %v6712_v14 = vpack.i.bf16 %v1921_v46, %v1919_v37  ;;  %v6716_v15 = vpack.i.bf16 %v6633_v57, %v6626_v51  ;;  %v1905_v30 = vrot.slane %v6323_v26, 2  ;;  %v8862_v26 = vld [vmem:[#allocation51_spill] sm:$0xff] }
 0x28a   : > { %v6704_v0 = vsel %vm753_vm4, %v8848_v22, %v8847_v45  ;;  %4292 = vmatpush3.bf16.msra.mxu1 %v3107_v48  ;;  %v6721_v18 = vpack.i.bf16 %v1926_v41, %v1924_v61  ;;  %v6725_v12 = vpack.i.bf16 %v6683_v39, %v6678_v58  ;;  %v1944_v9 = vsel %vm1876_vm9, %v1942_v52, %v1943_v32 }
 0x28b   : > { %v1946_v40 = vsel %vm1876_vm9, %v1943_v32, %v1945_v27  ;;  %v6730_v46 = vpack.i.bf16 %v1931_v19, %v1929_v42  ;;  %v6738_v37 = vpack.i.bf16 %v6671_v5, %v6664_v11  ;;  %v6740_v61 = vpack.i.bf16 %v1936_v4, %v1934_v17  ;;  %4572 = vrot.lane.b32.xlu0 %v4571_v49, %s5039_s12  ;;  %v8861_v27 = vld [vmem:[#allocation23_spill] sm:$0xff] }
 0x28c   : > { %v8850_v16 = vmov %v8844_v10  ;;  %v6747_v42 = vpack.i.bf16 %v6710_v25, %v6704_v0  ;;  %v6749_v19 = vpack.i.bf16 %v1941_v3, %v1939_v63  ;;  %v6753_v32 = vadd.f32 %v6117_v29, %v6183_v21  ;;  %4547 = vrot.lane.b32.xlu1 %v4531_v55, %s5043_s20 }
 0x28d   : > { %v1951_v52 = vsel %vm1876_vm9, %v8850_v16, %v1950_v23  ;;  %v1902_v23 = vrot.slane %v6297_v24, 2  ;;  %v6764_v41 = vpack.i.bf16 %v6697_v62, %v6694_v20  ;;  %v6766_v63 = vpack.i.bf16 %v1946_v40, %v1944_v9  ;;  %v8870_v62 = vld [vmem:[#allocation16_spill] sm:$0xff] }
 0x28e   : > { %8851 = vst [vmem:[#allocation60_spill] sm:$0xff] %v6753_v32  ;;  %v4576_v29 = vpack.i.bf16 %v6596_v13, %v6575_v59  ;;  %v6770_v21 = vpack.i.bf16 %v1951_v52, %v1949_v1  ;;  %v1577_v7 = vmax.f32 %v6394_v35, 0.0  ;;  %v8855_v4 = vrot.slane %v6318_v8, 2 }
 0x28f   : > { %8852 = vst [vmem:[#allocation61_spill] sm:$0xff] %v6764_v41  ;;  %8853 = vst [vmem:[#allocation62_spill] sm:$0xff] %v6766_v63  ;;  %v1576_v22 = vmax.f32 %v6753_v32, 0.0  ;;  %v4596_v48 = vpack.i.bf16 %v6355_v44, %v6352_v60  ;;  %v1837_v52 = vrot.slane %v6355_v44, 1  ;;  %v4716_v35 = vpack.i.bf16 %v8863_v56, %v8862_v26 }
 0x290   : > { %8854 = vst [vmem:[#allocation63_spill] sm:$0xff] %v6770_v21  ;;  %v1904_v55 = vsel %vm1876_vm9, %v1902_v23, %v8855_v4  ;;  %v8856_v10 = vmov %v8855_v4  ;;  %4577 = vrot.lane.b32.xlu0 %v4576_v29, %s5042_s17  ;;  %4557 = vrot.lane.b32.xlu1 %v4571_v49, %s5033_s25  ;;  %v1651_v59 = vrot.slane %v1577_v7, 7  ;;  %v1839_v23 = vrot.slane %v6380_v33, 1 }
 0x291   : > { %v1906_v45 = vsel %vm1876_vm9, %v8856_v10, %v1905_v30  ;;  %v1650_v1 = vrot.slane %v1576_v22, 7  ;;  %v1836_v4 = vrot.slane %v6352_v60, 1  ;;  %vm3497_vm1 = vcmask 1047559  }
 0x292   : > { %v4581_v13 = vpack.i.bf16 %v1906_v45, %v1904_v55  ;;  %v1753_v40 = vsel %vm491_vm0, %v1651_v59, 0.0  ;;  %v1840_v10 = vsel %vm753_vm4, %v1837_v52, %v1839_v23  ;;  %v4373_v23 = vpop.permute.xlu0 %4372 }
 0x293   : > { %v6789_v9 = vsel %vm491_vm0, %v1650_v1, %v1651_v59  ;;  %v6797_v30 = vsel %vm491_vm0, 0.0, %v1650_v1  ;;  %v1834_v7 = vrot.slane %v1753_v40, 1  ;;  %v1838_v55 = vsel %vm753_vm4, %v1836_v4, %v1837_v52 }
 0x294   : > { %4582 = vrot.lane.b32.xlu0 %v4581_v13, %s5043_s20  ;;  %4562 = vrot.lane.b32.xlu1 %v4581_v13, %s5035_s27  ;;  %8857 = vst [vmem:[#allocation64_spill] sm:$0xff] %v6789_v9  ;;  %v4601_v49 = vpack.i.bf16 %v6352_v60, %v6789_v9  ;;  %8858 = vst [vmem:[#allocation65_spill] sm:$0xff] %v6797_v30  ;;  %v4606_v16 = vpack.i.bf16 %v6789_v9, %v6797_v30  ;;  %v1832_v29 = vrot.slane %v6789_v9, 1 }
 0x295   : > { %v1913_v45 = vrot.slane %v6789_v9, 2  ;;  %v1915_v22 = vrot.slane %v1753_v40, 2  ;;  %v1912_v59 = vrot.slane %v6797_v30, 2  ;;  %v4621_v1 = vpack.i.bf16 %v1840_v10, %v1838_v55 }
 0x296   : > { %v1835_v33 = vsel %vm753_vm4, %v1832_v29, %v1834_v7 }
 0x297   : > { %v1914_v40 = vsel %vm1876_vm9, %v1912_v59, %v1913_v45  ;;  %v1916_v52 = vsel %vm1876_vm9, %v1913_v45, %v1915_v22 }
 0x298   : > { %4597 = vrot.lane.b32.xlu0 %v4596_v48, %s5040_s15  ;;  %4567 = vrot.lane.b32.xlu1 %v6606_v50, %s5039_s12  ;;  %v4591_v50 = vpack.i.bf16 %v6797_v30, %v6306_v43  ;;  %v1042_v48 = vpop.permute.xlu1 %1041  ;;  %v4636_v7 = vpack.i.bf16 %v1916_v52, %v1914_v40  ;;  %v4666_v52 = vpack.i.bf16 %v6420_v2, %v6355_v44 }
 0x29c   : > { %4602 = vrot.lane.b32.xlu0 %v4601_v49, %s5037_s29  ;;  %4587 = vrot.lane.b32.xlu1 %v4581_v13, %s5041_s16  ;;  %v1831_v13 = vrot.slane %v6797_v30, 1  ;;  %v4631_v49 = vpack.i.bf16 %v1838_v55, %v1835_v33 }
 0x2a0   : > { %4607 = vrot.lane.b32.xlu0 %v4606_v16, %s5040_s15  ;;  %4592 = vrot.lane.b32.xlu1 %v4591_v50, %s5037_s29  ;;  %v1833_v16 = vsel %vm753_vm4, %v1831_v13, %v1832_v29  ;;  %v8859_v13 = vld [vmem:[#allocation48_spill] sm:$0xff] }
 0x2a1   : > { %v4626_v50 = vpack.i.bf16 %v1833_v16, %v6587_v38  ;;  %v4651_v22 = vpack.i.bf16 %v1835_v33, %v1833_v16  ;;  %v4676_v33 = vpack.i.bf16 %v6452_v47, %v6420_v2 }
 0x2a4   : > { %4612 = vrot.lane.b32.xlu0 %v6712_v14, %s5035_s27  ;;  %4617 = vrot.lane.b32.xlu1 %v6712_v14, %s5041_s16 }
 0x2a8   : > { %4622 = vrot.lane.b32.xlu0 %v4621_v1, %s5042_s17  ;;  %4632 = vrot.lane.b32.xlu1 %v4631_v49, %s5033_s25 }
 0x2ac   : > { %4627 = vrot.lane.b32.xlu0 %v4626_v50, %s5033_s25  ;;  %4637 = vrot.lane.b32.xlu1 %v4636_v7, %s5035_s27 }
 0x2b0   : > { %v6829_v4 = vpop.permute.xlu1 %4362  ;;  %4647 = vrot.lane.b32.xlu0 %v4631_v49, %s5039_s12  ;;  %4642 = vrot.lane.b32.xlu1 %v4626_v50, %s5039_s12  ;;  %v4671_v50 = vpack.i.bf16 %v6409_v36, %v6452_v47 }
 0x2b1   : > { %v4364_v29 = vunpack.i.l.bf16 %v6829_v4 }
 0x2b3   : > { %v1272_v59 = vsel %vm1240_vm12, %v8859_v13, %v4364_v29 }
 0x2b4   : > { %v6833_v55 = vpop.permute.xlu0 %4377  ;;  %v1305_v40 = vsel %vm1273_vm13, %v1272_v59, %v1042_v48  ;;  %4652 = vrot.lane.b32.xlu0 %v4651_v22, %s5042_s17  ;;  %4667 = vrot.lane.b32.xlu1 %v4666_v52, %s5037_s29  ;;  %v8860_v59 = vrot.slane %v6452_v47, 1  ;;  %vm3491_vm13 = vcmask 1045509  }
 0x2b5   : > { %v6838_v45 = vpop.permute.xlu1 %4367 }
 0x2b6   : > { %v4369_v38 = vunpack.i.l.bf16 %v6838_v45 }
 0x2b8   : > { %v6842_v1 = vpop.permute.xlu0 %4382  ;;  %v1338_v3 = vsel %vm1306_vm14, %v1305_v40, %v4369_v38  ;;  %4657 = vrot.lane.b32.xlu0 %v4636_v7, %s5043_s20  ;;  %4677 = vrot.lane.b32.xlu1 %v4676_v33, %s5040_s15  ;;  %v4375_v33 = vunpack.i.h.bf16 %v4373_v23 }
 0x2b9   : > { %v6849_v29 = vpop.permute.xlu1 %4392  ;;  %4280 = vmatmul.mubr.msk.bf16.gmra.mrb[28].mxu0 %vm1366_vm15, %v1338_v3  ;;  %v1841_v3 = vrot.slane %v6420_v2, 1  ;;  %vm3494_vm15 = vcmask 1046534  }
 0x2bb   : > { %v1843_v38 = vsel %vm753_vm4, %v1841_v3, %v8860_v59  ;;  %v4360_v3 = vunpack.i.h.bf16 %v8861_v27  ;;  %v8864_v27 = vld [vmem:[#allocation11_spill] sm:$0xff] }
 0x2bc   : > { %v6855_v49 = vpop.permute.xlu0 %4387  ;;  %4662 = vrot.lane.b32.xlu0 %v4636_v7, %s5041_s16  ;;  %4692 = vrot.lane.b32.xlu1 %v6716_v15, %s5033_s25  ;;  %v4701_v7 = vpack.i.bf16 %v1843_v38, %v1840_v10  ;;  %v4374_v10 = vunpack.i.l.bf16 %v4373_v23  ;;  %v4384_v23 = vunpack.i.l.bf16 %v6842_v1 }
 0x2bd   : > { %v6859_v48 = vpop.permute.xlu1 %4397 }
 0x2c0   : > { %v6864_v16 = vpop.permute.xlu0 %4407  ;;  %4672 = vrot.lane.b32.xlu0 %v4671_v50, %s5037_s29  ;;  %4697 = vrot.lane.b32.xlu1 %v6721_v18, %s5035_s27  ;;  %v4706_v50 = vpack.i.bf16 %v6626_v51, %v1843_v38  ;;  %v4711_v51 = vpack.i.bf16 %v6497_v6, %v6425_v53  ;;  %v2737_v38 = vsel %vm1108_vm7, %v8864_v27, %v4360_v3 }
 0x2c1   : > { %v6869_v13 = vpop.permute.xlu1 %4402  ;;  %v4409_v40 = vunpack.i.l.bf16 %v6864_v16 }
 0x2c3   : > { %v2738_v59 = vsel %vm1108_vm7, %v8757_v31, %v4409_v40  ;;  %v2769_v40 = vsel %vm1174_vm10, %v2737_v38, %v4374_v10  ;;  %v4395_v10 = vunpack.i.h.bf16 %v6849_v29  ;;  %v4400_v38 = vunpack.i.h.bf16 %v6859_v48 }
 0x2c4   : > { %v6877_v22 = vpop.permute.xlu0 %4422  ;;  %4682 = vrot.lane.b32.xlu0 %v6730_v46, %s5035_s27  ;;  %4702 = vrot.lane.b32.xlu1 %v4701_v7, %s5039_s12  ;;  %v2770_v47 = vsel %vm1174_vm10, %v2738_v59, %v4375_v33 }
 0x2c5   : > { %v6883_v52 = vpop.permute.xlu1 %4412  ;;  %v4424_v33 = vunpack.i.l.bf16 %v6877_v22  ;;  %v2802_v2 = vsel %vm1240_vm12, %v2770_v47, %v4384_v23  ;;  %v4425_v32 = vunpack.i.h.bf16 %v6877_v22 }
 0x2c7   : > { %v2834_v47 = vsel %vm1306_vm14, %v2802_v2, %v4424_v33 }
 0x2c8   : > { %4687 = vrot.lane.b32.xlu0 %v4701_v7, %s5033_s25  ;;  %4707 = vrot.lane.b32.xlu1 %v4706_v50, %s5042_s17  ;;  %v6891_v17 = vpop.permute.xlu0 %4442  ;;  %v4365_v7 = vunpack.i.h.bf16 %v6829_v4  ;;  %v4370_v50 = vunpack.i.h.bf16 %v6838_v45 }
 0x2c9   : > { %v6896_v44 = vpop.permute.xlu1 %4417 }
 0x2ca   : > { %v2801_v4 = vsel %vm1240_vm12, %v2769_v40, %v4365_v7  ;;  %v4399_v7 = vunpack.i.l.bf16 %v6859_v48  ;;  %v4420_v43 = vunpack.i.h.bf16 %v6896_v44 }
 0x2cb   : > { %v2833_v45 = vsel %vm1306_vm14, %v2801_v4, %v4370_v50  ;;  %v4405_v50 = vunpack.i.h.bf16 %v6869_v13  ;;  %v4404_v4 = vunpack.i.l.bf16 %v6869_v13 }
 0x2cc   : > { %4717 = vrot.lane.b32.xlu0 %v4716_v35, %s5037_s29  ;;  %4712 = vrot.lane.b32.xlu1 %v4711_v51, %s5037_s29  ;;  %v6909_v59 = vpop.permute.xlu0 %4447  ;;  %v4394_v51 = vunpack.i.l.bf16 %v6849_v29 }
 0x2cd   : > { %v4428_v3 = vpop.permute.xlu1 %4427  ;;  %v4449_v22 = vunpack.i.l.bf16 %v6909_v59 }
 0x2ce   : > { %v4430_v60 = vunpack.i.h.bf16 %v4428_v3  ;;  %v4429_v35 = vunpack.i.l.bf16 %v4428_v3 }
 0x2d0   : > { %4722 = vrot.lane.b32.xlu0 %v6749_v19, %s5035_s27  ;;  %4732 = vrot.lane.b32.xlu1 %v6738_v37, %s5033_s25  ;;  %v2867_v23 = vsel %vm2865_vm2, %v2834_v47, %v4430_v60  ;;  %v2866_v40 = vsel %vm2865_vm2, %v2833_v45, %v4429_v35  ;;  %v6925_v3 = vpop.permute.xlu0 %4452  ;;  %v8866_v47 = vld [vmem:[#allocation52_spill] sm:$0xff] }
 0x2d1   : > { %v6929_v29 = vpop.permute.xlu1 %4432  ;;  %v2899_v2 = vsel %vm2898_vm3, %v2866_v40, %v4394_v51  ;;  %v2900_v33 = vsel %vm2898_vm3, %v2867_v23, %v4395_v10  ;;  %v8865_v51 = vld [vmem:[#allocation55_spill] sm:$0xff] }
 0x2d2   : > { %v2932_v48 = vsel %vm2931_vm5, %v2899_v2, %v4399_v7  ;;  %v2933_v60 = vsel %vm2931_vm5, %v2900_v33, %v4400_v38  ;;  %v4746_v10 = vpack.i.bf16 %v8866_v47, %v8865_v51  ;;  %v8867_v7 = vld [vmem:[#allocation53_spill] sm:$0xff]  ;;  %v4419_v33 = vunpack.i.l.bf16 %v6896_v44 }
 0x2d3   : > { %v2965_v35 = vsel %vm2964_vm6, %v2932_v48, %v4404_v4  ;;  %v2966_v13 = vsel %vm2964_vm6, %v2933_v60, %v4405_v50  ;;  %v4741_v2 = vpack.i.bf16 %v8867_v7, %v6500_v54  ;;  %v4410_v50 = vunpack.i.h.bf16 %v6864_v16  ;;  %v8868_v60 = vld [vmem:[#allocation25_spill] sm:$0xff] }
 0x2d4   : > { %4727 = vrot.lane.b32.xlu0 %v6725_v12, %s5033_s25  ;;  %4737 = vrot.lane.b32.xlu1 %v6740_v61, %s5035_s27  ;;  %v6941_v45 = vpop.permute.xlu0 %4457  ;;  %v2997_v23 = vpack.c.bf16 %v2966_v13, %v2965_v35  ;;  %v4385_v16 = vunpack.i.h.bf16 %v6842_v1  ;;  %v4389_v1 = vunpack.i.l.bf16 %v6855_v49  ;;  %v4434_v27 = vunpack.i.l.bf16 %v6929_v29 }
 0x2d5   : > { %v6945_v40 = vpop.permute.xlu1 %4437  ;;  %v2739_v35 = vsel %vm1108_vm7, %v8868_v60, %v4410_v50  ;;  %v4415_v50 = vunpack.i.h.bf16 %v6883_v52  ;;  %v4435_v44 = vunpack.i.h.bf16 %v6929_v29  ;;  %v4390_v47 = vunpack.i.h.bf16 %v6855_v49 }
 0x2d6   : > { %4293 = vmatprep.mubr.msk.bf16.mxu1 %vm3056_vm8, %v2997_v23 }
 0x2d8   : > { %4747 = vrot.lane.b32.xlu0 %v4746_v10, %s5037_s29  ;;  %4742 = vrot.lane.b32.xlu1 %v4741_v2, %s5037_s29  ;;  %v6952_v38 = vpop.permute.xlu0 %4472  ;;  %v2771_v10 = vsel %vm1174_vm10, %v2739_v35, %v4419_v33  ;;  %v4414_v33 = vunpack.i.l.bf16 %v6883_v52  ;;  %v4380_v52 = vunpack.i.h.bf16 %v6833_v55 }
 0x2d9   : > { %v6955_v4 = vpop.permute.xlu1 %4462  ;;  %v2803_v2 = vsel %vm1240_vm12, %v2771_v10, %v4385_v16  ;;  %v4474_v60 = vunpack.i.l.bf16 %v6952_v38  ;;  %v8869_v10 = vld [vmem:[#allocation5_spill] sm:$0xff] }
 0x2da   : > { %v2835_v35 = vsel %vm1306_vm14, %v2803_v2, %v4425_v32  ;;  %v2741_v16 = vsel %vm1108_vm7, %v8869_v10, %v4415_v50  ;;  %v4379_v32 = vunpack.i.l.bf16 %v6833_v55 }
 0x2db   : > { %v2868_v2 = vsel %vm2865_vm2, %v2835_v35, %v4389_v1  ;;  %v4450_v35 = vunpack.i.h.bf16 %v6909_v59 }
 0x2dc   : > { %4752 = vrot.lane.b32.xlu0 %v6770_v21, %s5035_s27  ;;  %4762 = vrot.lane.b32.xlu1 %v6764_v41, %s5033_s25  ;;  %v6962_v48 = vpop.permute.xlu0 %4492  ;;  %v2742_v21 = vsel %vm1108_vm7, %v8870_v62, %v4474_v60  ;;  %v4444_v41 = vunpack.i.l.bf16 %v6891_v17  ;;  %v2773_v62 = vsel %vm1174_vm10, %v2741_v16, %v4379_v32  ;;  %v2901_v29 = vsel %vm2898_vm3, %v2868_v2, %v4449_v22 }
 0x2dd   : > { %v6966_v13 = vpop.permute.xlu1 %4467  ;;  %v2774_v60 = vsel %vm1174_vm10, %v2742_v21, %v4380_v52  ;;  %v4494_v20 = vunpack.i.l.bf16 %v6962_v48  ;;  %v4465_v22 = vunpack.i.h.bf16 %v6955_v4 }
 0x2de   : > { %v2806_v16 = vsel %vm1240_vm12, %v2774_v60, %v4444_v41 }
 0x2df   : > { %v2838_v41 = vsel %vm1306_vm14, %v2806_v16, %v4494_v20  ;;  %v4470_v16 = vunpack.i.h.bf16 %v6966_v13 }
 0x2e0   : > { %4757 = vrot.lane.b32.xlu0 %v6747_v42, %s5033_s25  ;;  %4767 = vrot.lane.b32.xlu1 %v6766_v63, %s5035_s27  ;;  %v4498_v23 = vpop.permute.xlu0 %4497  ;;  %v8871_v63 = vld [vmem:[#allocation26_spill] sm:$0xff] }
 0x2e1   : > { %v6975_v9 = vpop.permute.xlu1 %4477  ;;  %v2740_v50 = vsel %vm1108_vm7, %v8871_v63, %v4414_v33  ;;  %v2805_v63 = vsel %vm1240_vm12, %v2773_v62, %v4435_v44  ;;  %v4440_v33 = vunpack.i.h.bf16 %v6945_v40  ;;  %v4499_v21 = vunpack.i.l.bf16 %v4498_v23 }
 0x2e2   : > { %v2772_v25 = vsel %vm1174_vm10, %v2740_v50, %v4420_v43  ;;  %v4439_v43 = vunpack.i.l.bf16 %v6945_v40  ;;  %v4464_v40 = vunpack.i.l.bf16 %v6955_v4 }
 0x2e3   : > { %v2804_v49 = vsel %vm1240_vm12, %v2772_v25, %v4434_v27  ;;  %v4500_v25 = vunpack.i.h.bf16 %v4498_v23 }
 0x2e4   : > { %v4503_v30 = vpop.permute.xlu0 %4502 }
 0x2e5   : > { %v6984_v31 = vpop.permute.xlu1 %4482  ;;  %v4504_v27 = vunpack.i.l.bf16 %v4503_v30  ;;  %v4505_v44 = vunpack.i.h.bf16 %v4503_v30 }
 0x2e8   : > { %v6999_v10 = vpop.permute.xlu0 %4522 }
 0x2e9   : > { %v4488_v55 = vpop.permute.xlu1 %4487 }
 0x2ea   : > { %v4489_v1 = vunpack.i.l.bf16 %v4488_v55  ;;  %v4490_v5 = vunpack.i.h.bf16 %v4488_v55 }
 0x2ec   : > { %v2836_v52 = vsel %vm1306_vm14, %v2804_v49, %v4489_v1  ;;  %v7014_v59 = vpop.permute.xlu0 %4527  ;;  %v2837_v60 = vsel %vm1306_vm14, %v2805_v63, %v4490_v5  ;;  %v2934_v1 = vsel %vm2931_vm5, %v2901_v29, %v4499_v21 }
 0x2ed   : > { %v2869_v32 = vsel %vm2865_vm2, %v2836_v52, %v4390_v47  ;;  %v4508_v2 = vpop.permute.xlu1 %4507  ;;  %v2967_v4 = vsel %vm2964_vm6, %v2934_v1, %v4504_v27  ;;  %v4445_v1 = vunpack.i.h.bf16 %v6891_v17  ;;  %v4485_v17 = vunpack.i.h.bf16 %v6984_v31 }
 0x2ee   : > { %v2902_v50 = vsel %vm2898_vm3, %v2869_v32, %v4450_v35  ;;  %v4510_v62 = vunpack.i.h.bf16 %v4508_v2  ;;  %v4509_v55 = vunpack.i.l.bf16 %v4508_v2  ;;  %v4469_v35 = vunpack.i.l.bf16 %v6966_v13 }
 0x2ef   : > { %v2935_v49 = vsel %vm2931_vm5, %v2902_v50, %v4500_v25  ;;  %v4475_v50 = vunpack.i.h.bf16 %v6952_v38 }
 0x2f0   : > { %v2871_v23 = vsel %vm2865_vm2, %v2838_v41, %v4510_v62  ;;  %v2870_v47 = vsel %vm2865_vm2, %v2837_v60, %v4509_v55  ;;  %v7026_v52 = vpop.permute.xlu0 %4532  ;;  %v2968_v30 = vsel %vm2964_vm6, %v2935_v49, %v4505_v44 }
 0x2f1   : > { %v2903_v20 = vsel %vm2898_vm3, %v2870_v47, %v4439_v43  ;;  %v2904_v5 = vsel %vm2898_vm3, %v2871_v23, %v4440_v33  ;;  %v4513_v63 = vpop.permute.xlu1 %4512  ;;  %v2998_v29 = vpack.c.bf16 %v2968_v30, %v2967_v4  ;;  %v4480_v23 = vunpack.i.h.bf16 %v6975_v9 }
 0x2f2   : > { %v2936_v21 = vsel %vm2931_vm5, %v2903_v20, %v4464_v40  ;;  %v2937_v25 = vsel %vm2931_vm5, %v2904_v5, %v4465_v22  ;;  %v4484_v22 = vunpack.i.l.bf16 %v6984_v31  ;;  %v8872_v40 = vld [vmem:[#allocation7_spill] sm:$0xff]  ;;  %v4479_v4 = vunpack.i.l.bf16 %v6975_v9 }
 0x2f3   : > { %v2969_v32 = vsel %vm2964_vm6, %v2936_v21, %v4469_v35  ;;  %4294 = vmatmul.mubr.msk.bf16.vlgmr.msra.gmra.mrb[0].mxu1 %vm3056_vm8, %v2998_v29  ;;  %v2970_v27 = vsel %vm2964_vm6, %v2937_v25, %v4470_v16  ;;  %v2743_v41 = vsel %vm1108_vm7, %v8872_v40, %v4475_v50  ;;  %v4495_v35 = vunpack.i.h.bf16 %v6962_v48  ;;  %v8873_v16 = vld [vmem:[#allocation49_spill] sm:$0xff] }
 0x2f4   : > { %v7038_v2 = vpop.permute.xlu0 %4537  ;;  %v2999_v43 = vpack.c.bf16 %v2970_v27, %v2969_v32  ;;  %v2775_v60 = vsel %vm1174_vm10, %v2743_v41, %v4484_v22  ;;  %v4454_v5 = vunpack.i.l.bf16 %v6925_v3  ;;  %v2745_v29 = vsel %vm1108_vm7, %v8873_v16, %v4480_v23  ;;  %v8875_v41 = vld [vmem:[#allocation20_spill] sm:$0xff] }
 0x2f5   : > { %v7041_v44 = vpop.permute.xlu1 %4517  ;;  %v2807_v30 = vsel %vm1240_vm12, %v2775_v60, %v4445_v1  ;;  %v4529_v25 = vunpack.i.l.bf16 %v7014_v59  ;;  %v4514_v27 = vunpack.i.l.bf16 %v4513_v63  ;;  %v4455_v9 = vunpack.i.h.bf16 %v6925_v3 }
 0x2f6   : > { %4297 = vmatprep.mubr.msk.bf16.mxu1 %vm3056_vm8, %v2999_v43  ;;  %v2839_v32 = vsel %vm1306_vm14, %v2807_v30, %v4495_v35  ;;  %v8874_v43 = vld [vmem:[#allocation33_spill] sm:$0xff]  ;;  %v4459_v50 = vunpack.i.l.bf16 %v6941_v45  ;;  %v4515_v22 = vunpack.i.h.bf16 %v4513_v63  ;;  %v4460_v40 = vunpack.i.h.bf16 %v6941_v45 }
 0x2f7   : > { %v2744_v31 = vsel %vm1108_vm7, %v8875_v41, %v4479_v4  ;;  %v2777_v60 = vsel %vm1174_vm10, %v2745_v29, %v4454_v5  ;;  %v4524_v30 = vunpack.i.l.bf16 %v6999_v10  ;;  %v4530_v63 = vunpack.i.h.bf16 %v7014_v59 }
 0x2f8   : > { %v7044_v33 = vpop.permute.xlu0 %4552  ;;  %v2776_v23 = vsel %vm1174_vm10, %v2744_v31, %v4485_v17  ;;  %v2809_v5 = vsel %vm1240_vm12, %v2777_v60, %v4515_v22  ;;  %v4520_v29 = vunpack.i.h.bf16 %v7041_v44  ;;  %v4519_v41 = vunpack.i.l.bf16 %v7041_v44 }
 0x2f9   : > { %v4554_v38 = vunpack.i.l.bf16 %v7044_v33  ;;  %v2808_v16 = vsel %vm1240_vm12, %v2776_v23, %v4514_v27 }
 0x2fa   : > { %v7046_v13 = vpop.permute.xlu1 %4542 }
 0x2fb   : > { %v2746_v48 = vsel %vm1108_vm7, %v8874_v43, %v4554_v38  ;;  %v2872_v38 = vsel %vm2865_vm2, %v2839_v32, %v4459_v50  ;;  %v4544_v44 = vunpack.i.l.bf16 %v7046_v13 }
 0x2fc   : > { %v2778_v3 = vsel %vm1174_vm10, %v2746_v48, %v4455_v9  ;;  %v2905_v45 = vsel %vm2898_vm3, %v2872_v38, %v4529_v25  ;;  %v4545_v25 = vunpack.i.h.bf16 %v7046_v13 }
 0x2fd   : > { %v7050_v62 = vpop.permute.xlu0 %4572  ;;  %v2810_v32 = vsel %vm1240_vm12, %v2778_v3, %v4524_v30 }
 0x2fe   : > { %v7052_v55 = vpop.permute.xlu1 %4547  ;;  %v4574_v17 = vunpack.i.l.bf16 %v7050_v62 }
 0x300   : > { %v2842_v30 = vsel %vm1306_vm14, %v2810_v32, %v4574_v17 }
 0x302   : > { %v4578_v49 = vpop.permute.xlu0 %4577  ;;  %v7059_v47 = vpop.permute.xlu1 %4557 }
 0x303   : > { %v4579_v48 = vunpack.i.l.bf16 %v4578_v49  ;;  %v4580_v27 = vunpack.i.h.bf16 %v4578_v49 }
 0x306   : > { %v4583_v20 = vpop.permute.xlu0 %4582  ;;  %v7069_v21 = vpop.permute.xlu1 %4562 }
 0x307   : > { %v4584_v50 = vunpack.i.l.bf16 %v4583_v20  ;;  %v4585_v60 = vunpack.i.h.bf16 %v4583_v20 }
 0x30a   : > { %v7081_v1 = vpop.permute.xlu0 %4597  ;;  %v4568_v35 = vpop.permute.xlu1 %4567 }
 0x30b   : > { %v4569_v4 = vunpack.i.l.bf16 %v4568_v35  ;;  %v4570_v43 = vunpack.i.h.bf16 %v4568_v35 }
 0x30d   : > { %v2840_v9 = vsel %vm1306_vm14, %v2808_v16, %v4569_v4  ;;  %v2841_v3 = vsel %vm1306_vm14, %v2809_v5, %v4570_v43  ;;  %v2938_v4 = vsel %vm2931_vm5, %v2905_v45, %v4579_v48  ;;  %v4550_v43 = vunpack.i.h.bf16 %v7052_v55 }
 0x30e   : > { %v7096_v59 = vpop.permute.xlu0 %4602  ;;  %v2873_v22 = vsel %vm2865_vm2, %v2840_v9, %v4460_v40  ;;  %v4588_v31 = vpop.permute.xlu1 %4587 }
 0x30f   : > { %v2906_v23 = vsel %vm2898_vm3, %v2873_v22, %v4530_v63  ;;  %v4590_v38 = vunpack.i.h.bf16 %v4588_v31  ;;  %v4589_v35 = vunpack.i.l.bf16 %v4588_v31  ;;  %v4549_v63 = vunpack.i.l.bf16 %v7052_v55 }
 0x310   : > { %v2939_v16 = vsel %vm2931_vm5, %v2906_v23, %v4580_v27  ;;  %v2971_v22 = vsel %vm2964_vm6, %v2938_v4, %v4584_v50  ;;  %v4555_v23 = vunpack.i.h.bf16 %v7044_v33 }
 0x311   : > { %v2875_v49 = vsel %vm2865_vm2, %v2842_v30, %v4590_v38  ;;  %v2874_v40 = vsel %vm2865_vm2, %v2841_v3, %v4589_v35  ;;  %v2972_v20 = vsel %vm2964_vm6, %v2939_v16, %v4585_v60  ;;  %v4559_v35 = vunpack.i.l.bf16 %v7059_v47 }
 0x312   : > { %v4608_v9 = vpop.permute.xlu0 %4607  ;;  %v2907_v13 = vsel %vm2898_vm3, %v2874_v40, %v4519_v41  ;;  %v2908_v17 = vsel %vm2898_vm3, %v2875_v49, %v4520_v29  ;;  %v7113_v5 = vpop.permute.xlu1 %4592  ;;  %v3000_v45 = vpack.c.bf16 %v2972_v20, %v2971_v22  ;;  %v2747_v30 = vsel %vm1108_vm7, %v6297_v24, %v4555_v23 }
 0x313   : > { %v2940_v32 = vsel %vm2931_vm5, %v2907_v13, %v4544_v44  ;;  %v2941_v48 = vsel %vm2931_vm5, %v2908_v17, %v4545_v25  ;;  %v4564_v25 = vunpack.i.l.bf16 %v7069_v21  ;;  %v4565_v3 = vunpack.i.h.bf16 %v7069_v21 }
 0x314   : > { %v2973_v27 = vsel %vm2964_vm6, %v2940_v32, %v4549_v63  ;;  %4298 = vmatmul.mubr.msk.bf16.gmra.mrb[4].mxu1 %vm3056_vm8, %v3000_v45  ;;  %v2974_v50 = vsel %vm2964_vm6, %v2941_v48, %v4550_v43  ;;  %v4594_v4 = vunpack.i.l.bf16 %v7113_v5  ;;  %v4525_v49 = vunpack.i.h.bf16 %v6999_v10 }
 0x315   : > { %v3001_v29 = vpack.c.bf16 %v2974_v50, %v2973_v27  ;;  %v2779_v16 = vsel %vm1174_vm10, %v2747_v30, %v4564_v25  ;;  %v2748_v40 = vsel %vm1108_vm7, %v6318_v8, %v4559_v35  ;;  %v4540_v21 = vunpack.i.h.bf16 %v7038_v2 }
 0x316   : > { %v7120_v31 = vpop.permute.xlu0 %4612  ;;  %v7123_v41 = vpop.permute.xlu1 %4617  ;;  %v2780_v63 = vsel %vm1174_vm10, %v2748_v40, %v4565_v3  ;;  %v2811_v22 = vsel %vm1240_vm12, %v2779_v16, %v4525_v49  ;;  %v4575_v13 = vunpack.i.h.bf16 %v7050_v62  ;;  %v4610_v45 = vunpack.i.h.bf16 %v4608_v9 }
 0x317   : > { %4301 = vmatprep.mubr.msk.bf16.mxu1 %vm3056_vm8, %v3001_v29  ;;  %v2812_v17 = vsel %vm1240_vm12, %v2780_v63, %v4594_v4  ;;  %v4609_v32 = vunpack.i.l.bf16 %v4608_v9  ;;  %v4539_v27 = vunpack.i.l.bf16 %v7038_v2  ;;  %v5020_v63 = vld [vmem:[%s8558_s2] ss:$0 sm:$0xff] }
 0x318   : > { %v2843_v8 = vsel %vm1306_vm14, %v2811_v22, %v4575_v13 }
 0x319   : > { %v2876_v25 = vsel %vm2865_vm2, %v2843_v8, %v4539_v27 }
 0x31a   : > { %v7126_v60 = vpop.permute.xlu0 %4622  ;;  %v7128_v55 = vpop.permute.xlu1 %4632  ;;  %v2909_v35 = vsel %vm2898_vm3, %v2876_v25, %v4609_v32 }
 0x31e   : > { %v7132_v38 = vpop.permute.xlu0 %4627  ;;  %v7135_v44 = vpop.permute.xlu1 %4637 }
 0x322   : > { %v7143_v33 = vpop.permute.xlu0 %4647  ;;  %v7147_v20 = vpop.permute.xlu1 %4642 }
 0x323   : > { %v4644_v24 = vunpack.i.l.bf16 %v7147_v20 }
 0x325   : > { %v2844_v10 = vsel %vm1306_vm14, %v2812_v17, %v4644_v24 }
 0x326   : > { %v4653_v43 = vpop.permute.xlu0 %4652  ;;  %v2877_v48 = vsel %vm2865_vm2, %v2844_v10, %v4540_v21 }
 0x327   : > { %v4655_v50 = vunpack.i.h.bf16 %v4653_v43  ;;  %v4654_v29 = vunpack.i.l.bf16 %v4653_v43  ;;  %v2910_v23 = vsel %vm2898_vm3, %v2877_v48, %v4610_v45 }
 0x329   : > { %v2942_v16 = vsel %vm2931_vm5, %v2909_v35, %v4654_v29  ;;  %v2943_v9 = vsel %vm2931_vm5, %v2910_v23, %v4655_v50 }
 0x32a   : > { %v4658_v62 = vpop.permute.xlu0 %4657 }
 0x32b   : > { %v4660_v30 = vunpack.i.h.bf16 %v4658_v62  ;;  %v4659_v3 = vunpack.i.l.bf16 %v4658_v62 }
 0x32d   : > { %v2975_v4 = vsel %vm2964_vm6, %v2942_v16, %v4659_v3  ;;  %v2976_v49 = vsel %vm2964_vm6, %v2943_v9, %v4660_v30 }
 0x32e   : > { %v3002_v2 = vpack.c.bf16 %v2976_v49, %v2975_v4 }
 0x330   : > { %4302 = vmatmul.mubr.msk.bf16.gmra.mrb[8].mxu1 %vm3056_vm8, %v3002_v2 }
 0x38c   : > { %v4281_v40 = vpop.f32.mrb[28].mxu0 }
 0x38d   : > { %v7170_v22 = vadd.f32 %v5020_v63, %v4281_v40  ;;  %v1549_v24 = vpop.f32.mrb[29].mxu0 }
 0x38e   : > { %v7172_v21 = vadd.f32 %v5020_v63, %v1549_v24  ;;  %v4282_v13 = vpop.f32.mrb[30].mxu0 }
 0x38f   : > { %v1594_v17 = vmax.f32 %v7170_v22, 0.0  ;;  %v7175_v10 = vadd.f32 %v5020_v63, %v4282_v13  ;;  %v1552_v43 = vpop.f32.mrb[31].mxu0 }
 0x390   : > { %v1592_v45 = vmax.f32 %v7172_v21, 0.0  ;;  %v7178_v32 = vadd.f32 %v5020_v63, %v1552_v43 }
 0x391   : > { %v1677_v8 = vrot.slane %v1594_v17, 7  ;;  %v1595_v48 = vmax.f32 %v7175_v10, 0.0 }
 0x392   : > { %v1674_v27 = vrot.slane %v1592_v45, 7  ;;  %v1593_v50 = vmax.f32 %v7178_v32, 0.0 }
 0x393   : > { %v7183_v29 = vsel %vm491_vm0, 0.0, %v1677_v8  ;;  %v1678_v23 = vrot.slane %v1595_v48, 7 }
 0x394   : > { %v7186_v25 = vsel %vm491_vm0, 0.0, %v1674_v27  ;;  %v1675_v62 = vrot.slane %v1593_v50, 7  ;;  %v1959_v35 = vrot.slane %v7183_v29, 1 }
 0x395   : > { %8876 = vst [vmem:[#allocation48_spill] sm:$0xff] %v7186_v25  ;;  %v1762_v30 = vsel %vm491_vm0, %v1678_v23, 0.0  ;;  %v4771_v3 = vpack.i.bf16 %v7186_v25, %v6538_v34  ;;  %v1871_v16 = vrot.slane %v7186_v25, 1  ;;  %v1952_v9 = vrot.slane %v7186_v25, 2 }
 0x396   : > { %v7195_v4 = vsel %vm491_vm0, %v1674_v27, %v1675_v62  ;;  %v1761_v49 = vsel %vm491_vm0, %v1675_v62, 0.0  ;;  %v1962_v13 = vrot.slane %v1762_v30, 1  ;;  %v1967_v17 = vrot.slane %v1762_v30, 2 }
 0x397   : > { %8877 = vst [vmem:[#allocation23_spill] sm:$0xff] %v7195_v4  ;;  %v1872_v2 = vrot.slane %v7195_v4, 1  ;;  %v1874_v40 = vrot.slane %v1761_v49, 1  ;;  %v1953_v63 = vrot.slane %v7195_v4, 2  ;;  %v1955_v24 = vrot.slane %v1761_v49, 2  ;;  %4772 = vrot.lane.b32.xlu1 %v4771_v3, %s5037_s29 }
 0x398   : > { %v4776_v43 = vpack.i.bf16 %v7183_v29, %v7195_v4  ;;  %v7204_v45 = vsel %vm491_vm0, %v1677_v8, %v1678_v23  ;;  %v1964_v23 = vrot.slane %v7183_v29, 2  ;;  %vm3479_vm0 = vcmask 1041409  }
 0x399   : > { %v1960_v48 = vrot.slane %v7204_v45, 1  ;;  %v1965_v27 = vrot.slane %v7204_v45, 2  ;;  %v7209_v50 = vsel %vm753_vm4, %v1871_v16, %v1872_v2  ;;  %v7212_v62 = vsel %vm753_vm4, %v1872_v2, %v1874_v40 }
 0x39a   : > { %4777 = vrot.lane.b32.xlu0 %v4776_v43, %s5037_s29  ;;  %v4781_v30 = vpack.i.bf16 %v7209_v50, %v6707_v28  ;;  %v1954_v3 = vsel %vm1876_vm9, %v1952_v9, %v1953_v63  ;;  %v1956_v8 = vsel %vm1876_vm9, %v1953_v63, %v1955_v24  ;;  %v4966_v9 = vpack.i.bf16 %v7204_v45, %v7183_v29 }
 0x39b   : > { %2223 = vrot.lane.b32.xlu1 %v7204_v45, %s5037_s29  ;;  %v7223_v16 = vsel %vm753_vm4, %v1959_v35, %v1960_v48  ;;  %v7225_v49 = vpack.i.bf16 %v1956_v8, %v1954_v3  ;;  %v7230_v40 = vsel %vm753_vm4, %v1960_v48, %v1962_v13  ;;  %v1966_v24 = vsel %vm1876_vm9, %v1964_v23, %v1965_v27  ;;  %v8886_v48 = vld [vmem:[#allocation61_spill] sm:$0xff]  ;;  %v8888_v3 = vld [vmem:[#allocation62_spill] sm:$0xff]  ;;  %v7317_v23 = vpop.permute.xlu0 %4662 }
 0x39c   : > { %v4951_v2 = vpack.i.bf16 %v7223_v16, %v7212_v62  ;;  %v4976_v63 = vpack.i.bf16 %v7230_v40, %v7223_v16  ;;  %v1968_v43 = vsel %vm1876_vm9, %v1965_v27, %v1967_v17  ;;  %v4821_v13 = vpack.i.bf16 %v6425_v53, %v6409_v36 }
 0x39d   : > { %v7239_v35 = vpack.i.bf16 %v1968_v43, %v1966_v24  ;;  %v8891_v24 = vld [vmem:[#allocation52_spill] sm:$0xff]  ;;  %vm3482_vm4 = vcmask 1042434   ;;  %vm3485_vm9 = vcmask 1043459  }
 0x39e   : > { %4782 = vrot.lane.b32.xlu0 %v4781_v30, %s5033_s25  ;;  %v4921_v43 = vpack.i.bf16 %v6538_v34, %v8891_v24 }
 0x39f   : > { %2031 = vrot.lane.b32.xlu1 %v7212_v62, %s5033_s25 }
 0x3a2   : > { %4787 = vrot.lane.b32.xlu0 %v6712_v14, %s5043_s20  ;;  %v4826_v14 = vpack.i.bf16 %v8862_v26, %v6497_v6 }
 0x3a3   : > { %4792 = vrot.lane.b32.xlu1 %v7225_v49, %s5035_s27 }
 0x3a6   : > { %4802 = vrot.lane.b32.xlu0 %v6716_v15, %s5039_s12  ;;  %v8878_v15 = vpack.i.bf16 %v6678_v58, %v6633_v57  ;;  %v4871_v57 = vpack.i.bf16 %v6500_v54, %v8863_v56  ;;  %v7284_v58 = vpop.permute.xlu1 %4667 }
 0x3a7   : > { %4797 = vrot.lane.b32.xlu1 %v6721_v18, %s5043_s20 }
 0x3aa   : > { %4812 = vrot.lane.b32.xlu0 %v6721_v18, %s5041_s16  ;;  %v8879_v18 = vpack.i.bf16 %v6664_v11, %v6683_v39  ;;  %v4876_v39 = vpack.i.bf16 %v8865_v51, %v8867_v7  ;;  %v8880_v11 = vld [vmem:[#allocation56_spill] sm:$0xff] }
 0x3ab   : > { %4807 = vrot.lane.b32.xlu1 %v6725_v12, %s5039_s12  ;;  %v8881_v12 = vpack.i.bf16 %v6704_v0, %v8880_v11  ;;  %v4936_v11 = vpack.i.bf16 %v7212_v62, %v7209_v50 }
 0x3ae   : > { %4822 = vrot.lane.b32.xlu0 %v4821_v13, %s5040_s15 }
 0x3af   : > { %4817 = vrot.lane.b32.xlu1 %v6730_v46, %s5041_s16 }
 0x3b2   : > { %4832 = vrot.lane.b32.xlu0 %v8878_v15, %s5042_s17  ;;  %v7329_v15 = vpop.permute.xlu0 %4672 }
 0x3b3   : > { %4827 = vrot.lane.b32.xlu1 %v4826_v14, %s5040_s15  ;;  %v8892_v14 = vld [vmem:[#allocation63_spill] sm:$0xff] }
 0x3b6   : > { %4842 = vrot.lane.b32.xlu0 %v6730_v46, %s5043_s20  ;;  %v7295_v46 = vpop.permute.xlu1 %4677 }
 0x3b7   : > { %4837 = vrot.lane.b32.xlu1 %v8879_v18, %s5042_s17  ;;  %v4926_v18 = vpack.i.bf16 %v7195_v4, %v7186_v25  ;;  %v4664_v25 = vunpack.i.l.bf16 %v7317_v23 }
 0x3ba   : > { %4852 = vrot.lane.b32.xlu0 %v6738_v37, %s5039_s12  ;;  %v8882_v37 = vld [vmem:[#allocation57_spill] sm:$0xff]  ;;  %v7307_v27 = vpop.permute.xlu1 %4692 }
 0x3bb   : > { %4847 = vrot.lane.b32.xlu1 %v6740_v61, %s5043_s20 }
 0x3be   : > { %4862 = vrot.lane.b32.xlu0 %v6740_v61, %s5041_s16  ;;  %v8883_v61 = vld [vmem:[#allocation59_spill] sm:$0xff]  ;;  %v7324_v13 = vpop.permute.xlu1 %4697 }
 0x3bf   : > { %4857 = vrot.lane.b32.xlu1 %v6747_v42, %s5039_s12  ;;  %v8884_v42 = vpack.i.bf16 %v8882_v37, %v8883_v61  ;;  %v8896_v61 = vld [vmem:[#allocation3_spill] sm:$0xff] }
 0x3c2   : > { %4872 = vrot.lane.b32.xlu0 %v4871_v57, %s5040_s15  ;;  %v8893_v57 = vld [vmem:[#allocation58_spill] sm:$0xff] }
 0x3c3   : > { %4867 = vrot.lane.b32.xlu1 %v6749_v19, %s5041_s16 }
 0x3c6   : > { %4882 = vrot.lane.b32.xlu0 %v8881_v12, %s5042_s17  ;;  %v7303_v17 = vpop.f32.mrb[0].mxu1  ;;  %v7342_v12 = vpop.permute.xlu0 %4682 }
 0x3c7   : > { %4877 = vrot.lane.b32.xlu1 %v4876_v39, %s5040_s15  ;;  %8885 = vst [vmem:[#allocation51_spill] sm:$0xff] %v7303_v17  ;;  %v7309_v0 = vpop.f32.mrb[1].mxu1  ;;  %v8894_v39 = vpack.i.bf16 %v6707_v28, %v8893_v57  ;;  %v4604_v17 = vunpack.i.l.bf16 %v7096_v59 }
 0x3c8   : > { %8887 = vst [vmem:[#allocation41_spill] sm:$0xff] %v7309_v0  ;;  %v7313_v8 = vpop.f32.mrb[2].mxu1 }
 0x3c9   : > { %8889 = vst [vmem:[#allocation55_spill] sm:$0xff] %v7313_v8 }
 0x3ca   : > { %4892 = vrot.lane.b32.xlu0 %v6749_v19, %s5043_s20  ;;  %v7315_v19 = vpop.f32.mrb[3].mxu1  ;;  %v7352_v28 = vpop.permute.xlu0 %4687 }
 0x3cb   : > { %4887 = vrot.lane.b32.xlu1 %v8884_v42, %s5042_s17  ;;  %8890 = vst [vmem:[#allocation53_spill] sm:$0xff] %v7315_v19  ;;  %v8914_v19 = vld [vmem:[#allocation22_spill] sm:$0xff] }
 0x3ce   : > { %4902 = vrot.lane.b32.xlu0 %v8886_v48, %s5039_s12  ;;  %v7360_v62 = vpop.permute.xlu0 %4717 }
 0x3cf   : > { %4897 = vrot.lane.b32.xlu1 %v8888_v3, %s5043_s20 }
 0x3d2   : > { %4912 = vrot.lane.b32.xlu0 %v8888_v3, %s5041_s16  ;;  %v8898_v3 = vld [vmem:[#allocation13_spill] sm:$0xff]  ;;  %v7383_v45 = vpop.permute.xlu0 %4722 }
 0x3d3   : > { %4907 = vrot.lane.b32.xlu1 %v4781_v30, %s5039_s12  ;;  %v7337_v30 = vpop.permute.xlu1 %4702 }
 0x3d6   : > { %4922 = vrot.lane.b32.xlu0 %v4921_v43, %s5040_s15  ;;  %v8899_v43 = vld [vmem:[#allocation17_spill] sm:$0xff]  ;;  %v7394_v16 = vpop.permute.xlu0 %4727 }
 0x3d7   : > { %4917 = vrot.lane.b32.xlu1 %v8892_v14, %s5041_s16  ;;  %v7347_v37 = vpop.permute.xlu1 %4707 }
 0x3da   : > { %4932 = vrot.lane.b32.xlu0 %v8894_v39, %s5042_s17 }
 0x3db   : > { %4927 = vrot.lane.b32.xlu1 %v4926_v18, %s5040_s15  ;;  %v7356_v50 = vpop.permute.xlu1 %4712 }
 0x3de   : > { %4942 = vrot.lane.b32.xlu0 %v8892_v14, %s5043_s20  ;;  %v4981_v14 = vpack.i.bf16 %v8899_v43, %v8898_v3  ;;  %v8908_v3 = vld [vmem:[#allocation27_spill] sm:$0xff]  ;;  %v4629_v43 = vunpack.i.l.bf16 %v7132_v38 }
 0x3df   : > { %4937 = vrot.lane.b32.xlu1 %v4936_v11, %s5042_s17  ;;  %v7370_v48 = vpop.permute.xlu1 %4732  ;;  %v8905_v11 = vld [vmem:[#allocation2_spill] sm:$0xff] }
 0x3e2   : > { %4952 = vrot.lane.b32.xlu0 %v4951_v2, %s5039_s12  ;;  %v8895_v2 = vld [vmem:[#allocation11_spill] sm:$0xff] }
 0x3e3   : > { %4947 = vrot.lane.b32.xlu1 %v7225_v49, %s5043_s20  ;;  %v4971_v42 = vpack.i.bf16 %v8896_v61, %v8895_v2  ;;  %v7391_v57 = vpop.permute.xlu1 %4737  ;;  %v7406_v2 = vpop.permute.xlu0 %4747  ;;  %v8907_v61 = vld [vmem:[#allocation43_spill] sm:$0xff] }
 0x3e6   : > { %4957 = vrot.lane.b32.xlu0 %v7225_v49, %s5041_s16 }
 0x3e7   : > { %2319 = vrot.lane.b32.xlu1 %v7230_v40, %s5039_s12  ;;  %v7372_v49 = vpop.f32.mrb[4].mxu1  ;;  %v8903_v40 = vld [vmem:[#allocation24_spill] sm:$0xff]  ;;  %v7400_v39 = vpop.permute.xlu1 %4742 }
 0x3e8   : > { %8897 = vst [vmem:[#allocation25_spill] sm:$0xff] %v7372_v49  ;;  %v7380_v29 = vpop.f32.mrb[5].mxu1 }
 0x3e9   : > { %8900 = vst [vmem:[#allocation5_spill] sm:$0xff] %v7380_v29  ;;  %v4534_v29 = vunpack.i.l.bf16 %v7026_v52 }
 0x3ea   : > { %4967 = vrot.lane.b32.xlu0 %v4966_v9, %s5040_s15  ;;  %v7385_v9 = vpop.f32.mrb[6].mxu1 }
 0x3eb   : > { %4962 = vrot.lane.b32.xlu1 %v7239_v35, %s5041_s16  ;;  %8901 = vst [vmem:[#allocation16_spill] sm:$0xff] %v7385_v9  ;;  %v7387_v18 = vpop.f32.mrb[7].mxu1  ;;  %v8913_v9 = vld [vmem:[#allocation19_spill] sm:$0xff] }
 0x3ec   : > { %8902 = vst [vmem:[#allocation26_spill] sm:$0xff] %v7387_v18 }
 0x3ee   : > { %4977 = vrot.lane.b32.xlu0 %v4976_v63, %s5042_s17  ;;  %v8904_v63 = vld [vmem:[#allocation4_spill] sm:$0xff] }
 0x3ef   : > { %4972 = vrot.lane.b32.xlu1 %v4971_v42, %s5040_s15  ;;  %v7410_v42 = vpop.permute.xlu1 %4762 }
 0x3f2   : > { %4987 = vrot.lane.b32.xlu0 %v7239_v35, %s5043_s20  ;;  %v8906_v35 = vld [vmem:[#allocation38_spill] sm:$0xff] }
 0x3f3   : > { %4982 = vrot.lane.b32.xlu1 %v4981_v14, %s5042_s17  ;;  %v7415_v14 = vpop.permute.xlu0 %4752 }
 0x3f4   : > { %8909 = vst [vmem:[#allocation7_spill] sm:$0xff] %v7415_v14 }
 0x3f6   : > { %3302 = vrot.lane.b32.xlu0 %v8903_v40, %s5044_s11  ;;  %v8910_v40 = vld [vmem:[#allocation6_spill] sm:$0xff] }
 0x3f7   : > { %4992 = vrot.lane.b32.xlu1 %v8904_v63, %s5043_s20  ;;  %v8911_v63 = vld [vmem:[#allocation10_spill] sm:$0xff]  ;;  %v7432_v8 = vpop.permute.xlu0 %4757 }
 0x3fa   : > { %3306 = vrot.lane.b32.xlu0 %v8905_v11, %s5044_s11  ;;  %v7421_v11 = vpop.permute.xlu1 %4767 }
 0x3fb   : > { %3334 = vrot.lane.b32.xlu1 %v8906_v35, %s5044_s11  ;;  %v4560_v35 = vunpack.i.h.bf16 %v7059_v47 }
 0x3fe   : > { %3338 = vrot.lane.b32.xlu0 %v8907_v61, %s5044_s11  ;;  %v8912_v61 = vld [vmem:[#allocation50_spill] sm:$0xff] }
 0x3ff   : > { %3310 = vrot.lane.b32.xlu1 %v8908_v3, %s5044_s11  ;;  %v2750_v18 = vsel %vm1108_vm7, %v8912_v61, %v4629_v43  ;;  %v4535_v3 = vunpack.i.h.bf16 %v7026_v52  ;;  %v4640_v52 = vunpack.i.h.bf16 %v7135_v44 }
 0x401   : > { %v2782_v47 = vsel %vm1174_vm10, %v2750_v18, %v4535_v3  ;;  %v4639_v18 = vunpack.i.l.bf16 %v7135_v44  ;;  %v4649_v3 = vunpack.i.l.bf16 %v7143_v33 }
 0x402   : > { %3314 = vrot.lane.b32.xlu0 %v8910_v40, %s5044_s11  ;;  %v4630_v40 = vunpack.i.h.bf16 %v7132_v38  ;;  %v4634_v38 = vunpack.i.l.bf16 %v7128_v55 }
 0x403   : > { %3342 = vrot.lane.b32.xlu1 %v8911_v63, %s5044_s11  ;;  %v7434_v63 = vpop.f32.mrb[8].mxu1 }
 0x404   : > { %8915 = vst [vmem:[#allocation49_spill] sm:$0xff] %v7434_v63  ;;  %v7438_v49 = vpop.f32.mrb[9].mxu1  ;;  %v8919_v63 = vld [vmem:[#allocation42_spill] sm:$0xff] }
 0x405   : > { %8916 = vst [vmem:[#allocation33_spill] sm:$0xff] %v7438_v49  ;;  %v7447_v0 = vpop.f32.mrb[10].mxu1  ;;  %v4645_v49 = vunpack.i.h.bf16 %v7147_v20  ;;  %v4669_v20 = vunpack.i.l.bf16 %v7284_v58 }
 0x406   : > { %3318 = vrot.lane.b32.xlu0 %v8913_v9, %s5044_s11  ;;  %v8917_v9 = vld [vmem:[#allocation34_spill] sm:$0xff]  ;;  %8918 = vst [vmem:[#allocation20_spill] sm:$0xff] %v7447_v0  ;;  %v2814_v0 = vsel %vm1240_vm12, %v2782_v47, %v4604_v17  ;;  %v8926_v17 = vld [vmem:[#allocation64_spill] sm:$0xff] }
 0x407   : > { %3346 = vrot.lane.b32.xlu1 %v8914_v19, %s5044_s11  ;;  %v2749_v61 = vsel %vm1108_vm7, %v8917_v9, %v4560_v35  ;;  %v4595_v19 = vunpack.i.h.bf16 %v7113_v5  ;;  %v7455_v35 = vpop.f32.mrb[11].mxu1  ;;  %v8921_v9 = vld [vmem:[#allocation40_spill] sm:$0xff]  ;;  %v8922_v5 = vld [vmem:[#allocation65_spill] sm:$0xff]  ;;  %v2752_v47 = vsel %vm1108_vm7, %v8926_v17, %v4634_v38  ;;  %v4600_v38 = vunpack.i.h.bf16 %v7081_v1 }
 0x408   : > { %8920 = vst [vmem:[#allocation56_spill] sm:$0xff] %v7455_v35  ;;  %v2751_v4 = vsel %vm1108_vm7, %v8922_v5, %v4630_v40  ;;  %v2781_v44 = vsel %vm1174_vm10, %v2749_v61, %v4534_v29  ;;  %v8925_v40 = vld [vmem:[#allocation60_spill] sm:$0xff]  ;;  %v2846_v5 = vsel %vm1306_vm14, %v2814_v0, %v4649_v3  ;;  %v8927_v61 = vld [vmem:[#allocation45_spill] sm:$0xff]  ;;  %v4650_v0 = vunpack.i.h.bf16 %v7143_v33 }
 0x409   : > { %v7440_v43 = vpop.permute.xlu1 %4772  ;;  %v2813_v35 = vsel %vm1240_vm12, %v2781_v44, %v4595_v19  ;;  %v2784_v19 = vsel %vm1174_vm10, %v2752_v47, %v4640_v52  ;;  %v4620_v3 = vunpack.i.h.bf16 %v7123_v41  ;;  %v4625_v33 = vunpack.i.h.bf16 %v7126_v60 }
 0x40a   : > { %3322 = vrot.lane.b32.xlu0 %v8919_v63, %s5044_s11  ;;  %v4665_v63 = vunpack.i.h.bf16 %v7317_v23  ;;  %v2783_v23 = vsel %vm1174_vm10, %v2751_v4, %v4639_v18  ;;  %v2845_v29 = vsel %vm1306_vm14, %v2813_v35, %v4645_v49  ;;  %v4599_v4 = vunpack.i.l.bf16 %v7081_v1 }
 0x40b   : > { %3350 = vrot.lane.b32.xlu1 %v8921_v9, %s5044_s11  ;;  %v4704_v9 = vunpack.i.l.bf16 %v7337_v30  ;;  %v2878_v44 = vsel %vm2865_vm2, %v2845_v29, %v4664_v25  ;;  %v2816_v49 = vsel %vm1240_vm12, %v2784_v19, %v4669_v20  ;;  %v8928_v25 = vld [vmem:[#allocation30_spill] sm:$0xff]  ;;  %v4619_v1 = vunpack.i.l.bf16 %v7123_v41 }
 0x40c   : > { %v7464_v34 = vpop.permute.xlu0 %4777  ;;  %v2911_v35 = vsel %vm2898_vm3, %v2878_v44, %v4599_v4  ;;  %v4680_v29 = vunpack.i.h.bf16 %v7295_v46  ;;  %v8929_v19 = vld [vmem:[#allocation14_spill] sm:$0xff]  ;;  %v4709_v44 = vunpack.i.l.bf16 %v7347_v37 }
 0x40d   : > { %8923 = vst [vmem:[#allocation57_spill] sm:$0xff] %v7464_v34  ;;  %v7468_v14 = vpop.permute.xlu1 %2223  ;;  %v2848_v52 = vsel %vm1306_vm14, %v2816_v49, %v4704_v9 }
 0x40e   : > { %8924 = vst [vmem:[#allocation59_spill] sm:$0xff] %v7468_v14  ;;  %3326 = vrot.lane.b32.xlu0 %v8925_v40, %s5044_s11  ;;  %v4605_v14 = vunpack.i.h.bf16 %v7096_v59  ;;  %v2879_v40 = vsel %vm2865_vm2, %v2846_v5, %v4665_v63  ;;  %v2881_v17 = vsel %vm2865_vm2, %v2848_v52, %v4620_v3  ;;  %v4635_v52 = vunpack.i.h.bf16 %v7128_v55 }
 0x40f   : > { %3354 = vrot.lane.b32.xlu1 %v8927_v61, %s5044_s11  ;;  %v2912_v63 = vsel %vm2898_vm3, %v2879_v40, %v4600_v38  ;;  %v4679_v61 = vunpack.i.l.bf16 %v7295_v46  ;;  %v2914_v46 = vsel %vm2898_vm3, %v2881_v17, %v4680_v29  ;;  %v4689_v55 = vunpack.i.l.bf16 %v7352_v28 }
 0x410   : > { %v7485_v34 = vpop.permute.xlu0 %4782  ;;  %v2815_v59 = vsel %vm1240_vm12, %v2783_v23, %v4605_v14  ;;  %v4624_v14 = vunpack.i.l.bf16 %v7126_v60  ;;  %v2945_v41 = vsel %vm2931_vm5, %v2912_v63, %v4625_v33  ;;  %v4710_v60 = vunpack.i.h.bf16 %v7347_v37  ;;  %v8931_v33 = vld [vmem:[#allocation44_spill] sm:$0xff] }
 0x411   : > { %v7491_v18 = vpop.permute.xlu1 %2031  ;;  %v2847_v9 = vsel %vm1306_vm14, %v2815_v59, %v4650_v0 }
 0x412   : > { %3330 = vrot.lane.b32.xlu0 %v8928_v25, %s5044_s11  ;;  %v2880_v49 = vsel %vm2865_vm2, %v2847_v9, %v4619_v1  ;;  %v2947_v63 = vsel %vm2931_vm5, %v2914_v46, %v4710_v60  ;;  %v4690_v1 = vunpack.i.h.bf16 %v7352_v28  ;;  %v4614_v28 = vunpack.i.l.bf16 %v7120_v31 }
 0x413   : > { %3358 = vrot.lane.b32.xlu1 %v7172_v21, %s5044_s11  ;;  %v2944_v21 = vsel %vm2931_vm5, %v2911_v35, %v4624_v14  ;;  %v2913_v25 = vsel %vm2898_vm3, %v2880_v49, %v4679_v61  ;;  %v8930_v35 = vld [vmem:[#allocation15_spill] sm:$0xff]  ;;  %v4670_v61 = vunpack.i.h.bf16 %v7284_v58  ;;  %v4615_v60 = vunpack.i.h.bf16 %v7120_v31 }
 0x414   : > { %v4788_v20 = vpop.permute.xlu0 %4787  ;;  %v4700_v49 = vunpack.i.h.bf16 %v7324_v13 }
 0x415   : > { %v4790_v47 = vunpack.i.h.bf16 %v4788_v20  ;;  %v4789_v23 = vunpack.i.l.bf16 %v4788_v20  ;;  %v7507_v5 = vpop.permute.xlu1 %4792 }
 0x416   : > { %3308 = vrot.lane.b32.xlu0 %v8929_v19, %s5044_s11  ;;  %v8934_v19 = vld [vmem:[#allocation18_spill] sm:$0xff] }
 0x417   : > { %v2978_v40 = vsel %vm2964_vm6, %v2945_v41, %v4790_v47  ;;  %v2977_v38 = vsel %vm2964_vm6, %v2944_v21, %v4789_v23  ;;  %3362 = vrot.lane.b32.xlu1 %v7170_v22, %s5044_s11  ;;  %v2946_v22 = vsel %vm2931_vm5, %v2913_v25, %v4709_v44  ;;  %v8932_v23 = vld [vmem:[#allocation9_spill] sm:$0xff]  ;;  %v4694_v21 = vunpack.i.l.bf16 %v7307_v27  ;;  %v8935_v44 = vld [vmem:[#allocation39_spill] sm:$0xff] }
 0x418   : > { %v7522_v4 = vpop.permute.xlu0 %4802  ;;  %v3003_v0 = vpack.c.bf16 %v2978_v40, %v2977_v38  ;;  %v2753_v29 = vsel %vm1108_vm7, %v8932_v23, %v4635_v52  ;;  %v8933_v41 = vld [vmem:[#allocation21_spill] sm:$0xff]  ;;  %v2755_v40 = vsel %vm1108_vm7, %v8935_v44, %v4690_v1  ;;  %v8936_v38 = vld [vmem:[#allocation31_spill] sm:$0xff]  ;;  %v4705_v52 = vunpack.i.h.bf16 %v7337_v30 }
 0x419   : > { %v4798_v59 = vpop.permute.xlu1 %4797  ;;  %v2754_v58 = vsel %vm1108_vm7, %v8936_v38, %v4689_v55  ;;  %v4804_v1 = vunpack.i.l.bf16 %v7522_v4  ;;  %v4675_v30 = vunpack.i.h.bf16 %v7329_v15  ;;  %v4674_v55 = vunpack.i.l.bf16 %v7329_v15 }
 0x41a   : > { %v4800_v37 = vunpack.i.h.bf16 %v4798_v59  ;;  %v4799_v3 = vunpack.i.l.bf16 %v4798_v59  ;;  %3304 = vrot.lane.b32.xlu0 %v8930_v35, %s5044_s11  ;;  %4305 = vmatprep.mubr.msk.bf16.mxu1 %vm3056_vm8, %v3003_v0  ;;  %v2785_v0 = vsel %vm1174_vm10, %v2753_v29, %v4614_v28  ;;  %v4699_v59 = vunpack.i.l.bf16 %v7324_v13  ;;  %v8938_v35 = vld [vmem:[#allocation28_spill] sm:$0xff] }
 0x41b   : > { %3340 = vrot.lane.b32.xlu1 %v8931_v33, %s5044_s11  ;;  %v4714_v33 = vunpack.i.l.bf16 %v7356_v50  ;;  %v8939_v13 = vld [vmem:[#allocation36_spill] sm:$0xff] }
 0x41c   : > { %v2980_v14 = vsel %vm2964_vm6, %v2947_v63, %v4800_v37  ;;  %v2979_v20 = vsel %vm2964_vm6, %v2946_v22, %v4799_v3  ;;  %v4813_v9 = vpop.permute.xlu0 %4812  ;;  %v2817_v37 = vsel %vm1240_vm12, %v2785_v0, %v4670_v61  ;;  %v8937_v3 = vld [vmem:[#allocation46_spill] sm:$0xff]  ;;  %v2786_v22 = vsel %vm1174_vm10, %v2754_v58, %v4615_v60 }
 0x41d   : > { %v7538_v17 = vpop.permute.xlu1 %4807  ;;  %v3004_v47 = vpack.c.bf16 %v2980_v14, %v2979_v20  ;;  %v2756_v31 = vsel %vm1108_vm7, %v8937_v3, %v4694_v21  ;;  %v2787_v63 = vsel %vm1174_vm10, %v2755_v40, %v4699_v59  ;;  %v4815_v14 = vunpack.i.h.bf16 %v4813_v9  ;;  %v8940_v40 = vld [vmem:[#allocation8_spill] sm:$0xff] }
 0x41e   : > { %3336 = vrot.lane.b32.xlu0 %v8933_v41, %s5044_s11  ;;  %v4814_v20 = vunpack.i.l.bf16 %v4813_v9  ;;  %v2788_v23 = vsel %vm1174_vm10, %v2756_v31, %v4700_v49  ;;  %v2849_v29 = vsel %vm1306_vm14, %v2817_v37, %v4705_v52  ;;  %v2818_v28 = vsel %vm1240_vm12, %v2786_v22, %v4674_v55 }
 0x41f   : > { %3312 = vrot.lane.b32.xlu1 %v8934_v19, %s5044_s11  ;;  %4306 = vmatmul.mubr.msk.bf16.gmra.mrb[12].mxu1 %vm3056_vm8, %v3004_v47  ;;  %v2819_v19 = vsel %vm1240_vm12, %v2787_v63, %v4675_v30  ;;  %v2820_v15 = vsel %vm1240_vm12, %v2788_v23, %v4714_v33  ;;  %v4805_v9 = vunpack.i.h.bf16 %v7522_v4  ;;  %v2850_v38 = vsel %vm1306_vm14, %v2818_v28, %v4804_v1  ;;  %v8942_v30 = vld [vmem:[#allocation29_spill] sm:$0xff] }
 0x420   : > { %v4823_v46 = vpop.permute.xlu0 %4822  ;;  %v4809_v58 = vunpack.i.l.bf16 %v7538_v17  ;;  %v2882_v0 = vsel %vm2865_vm2, %v2849_v29, %v4814_v20  ;;  %v2883_v49 = vsel %vm2865_vm2, %v2850_v38, %v4815_v14 }
 0x421   : > { %v4818_v25 = vpop.permute.xlu1 %4817  ;;  %v4825_v61 = vunpack.i.h.bf16 %v4823_v46  ;;  %v4824_v21 = vunpack.i.l.bf16 %v4823_v46  ;;  %v8941_v46 = vld [vmem:[#allocation32_spill] sm:$0xff]  ;;  %v2851_v23 = vsel %vm1306_vm14, %v2819_v19, %v4805_v9  ;;  %v4729_v19 = vunpack.i.l.bf16 %v7394_v16 }
 0x422   : > { %3316 = vrot.lane.b32.xlu0 %v8938_v35, %s5044_s11  ;;  %v4820_v59 = vunpack.i.h.bf16 %v4818_v25  ;;  %v4819_v52 = vunpack.i.l.bf16 %v4818_v25  ;;  %v2852_v29 = vsel %vm1306_vm14, %v2820_v15, %v4809_v58  ;;  %v8945_v58 = vld [vmem:[#allocation47_spill] sm:$0xff] }
 0x423   : > { %3344 = vrot.lane.b32.xlu1 %v8939_v13, %s5044_s11  ;;  %v2915_v3 = vsel %vm2898_vm3, %v2882_v0, %v4824_v21  ;;  %v2916_v31 = vsel %vm2898_vm3, %v2883_v49, %v4825_v61  ;;  %v8944_v0 = vld [vmem:[#allocation35_spill] sm:$0xff]  ;;  %v4730_v49 = vunpack.i.h.bf16 %v7394_v16  ;;  %v4739_v16 = vunpack.i.l.bf16 %v7391_v57 }
 0x424   : > { %v4833_v47 = vpop.permute.xlu0 %4832  ;;  %v2885_v28 = vsel %vm2865_vm2, %v2852_v29, %v4820_v59 }
 0x425   : > { %v4828_v41 = vpop.permute.xlu1 %4827  ;;  %v4835_v60 = vunpack.i.h.bf16 %v4833_v47  ;;  %v4834_v44 = vunpack.i.l.bf16 %v4833_v47  ;;  %v8943_v47 = vld [vmem:[#allocation12_spill] sm:$0xff] }
 0x426   : > { %3320 = vrot.lane.b32.xlu0 %v8940_v40, %s5044_s11  ;;  %v4830_v1 = vunpack.i.h.bf16 %v4828_v41  ;;  %v4829_v13 = vunpack.i.l.bf16 %v4828_v41  ;;  %v2884_v41 = vsel %vm2865_vm2, %v2851_v23, %v4819_v52 }
 0x427   : > { %3348 = vrot.lane.b32.xlu1 %v8941_v46, %s5044_s11  ;;  %v2948_v63 = vsel %vm2931_vm5, %v2915_v3, %v4834_v44  ;;  %v2949_v33 = vsel %vm2931_vm5, %v2916_v31, %v4835_v60  ;;  %v4695_v3 = vunpack.i.h.bf16 %v7307_v27  ;;  %v4685_v27 = vunpack.i.h.bf16 %v7342_v12 }
 0x428   : > { %v4843_v37 = vpop.permute.xlu0 %4842  ;;  %v2917_v44 = vsel %vm2898_vm3, %v2884_v41, %v4829_v13  ;;  %v2918_v40 = vsel %vm2898_vm3, %v2885_v28, %v4830_v1  ;;  %v4734_v1 = vunpack.i.l.bf16 %v7370_v48  ;;  %v2759_v13 = vsel %vm1108_vm7, %v6497_v6, %v4730_v49 }
 0x429   : > { %v4845_v35 = vunpack.i.h.bf16 %v4843_v37  ;;  %v4844_v4 = vunpack.i.l.bf16 %v4843_v37  ;;  %v4838_v22 = vpop.permute.xlu1 %4837  ;;  %v4810_v6 = vunpack.i.h.bf16 %v7538_v17 }
 0x42a   : > { %3324 = vrot.lane.b32.xlu0 %v8942_v30, %s5044_s11  ;;  %v4840_v14 = vunpack.i.h.bf16 %v4838_v22  ;;  %v4839_v20 = vunpack.i.l.bf16 %v4838_v22  ;;  %v8946_v22 = vld [vmem:[#allocation37_spill] sm:$0xff] }
 0x42b   : > { %v2981_v55 = vsel %vm2964_vm6, %v2948_v63, %v4844_v4  ;;  %v2982_v25 = vsel %vm2964_vm6, %v2949_v33, %v4845_v35  ;;  %3352 = vrot.lane.b32.xlu1 %v8943_v47, %s5044_s11  ;;  %v4684_v4 = vunpack.i.l.bf16 %v7342_v12  ;;  %v2758_v63 = vsel %vm1108_vm7, %v6425_v53, %v4729_v19 }
 0x42c   : > { %v3005_v61 = vpack.c.bf16 %v2982_v25, %v2981_v55  ;;  %v7598_v21 = vpop.permute.xlu0 %4852  ;;  %v2950_v15 = vsel %vm2931_vm5, %v2917_v44, %v4839_v20  ;;  %v2951_v9 = vsel %vm2931_vm5, %v2918_v40, %v4840_v14  ;;  %v4715_v33 = vunpack.i.h.bf16 %v7356_v50 }
 0x42d   : > { %v4848_v60 = vpop.permute.xlu1 %4847  ;;  %v2757_v53 = vsel %vm1108_vm7, %v6409_v36, %v4695_v3  ;;  %v4740_v55 = vunpack.i.h.bf16 %v7391_v57  ;;  %v4720_v14 = vunpack.i.h.bf16 %v7360_v62  ;;  %v2790_v12 = vsel %vm1174_vm10, %v2758_v63, %v4685_v27 }
 0x42e   : > { %v4850_v38 = vunpack.i.h.bf16 %v4848_v60  ;;  %v4849_v46 = vunpack.i.l.bf16 %v4848_v60  ;;  %3328 = vrot.lane.b32.xlu0 %v8944_v0, %s5044_s11  ;;  %4309 = vmatprep.mubr.msk.bf16.mxu1 %vm3056_vm8, %v3005_v61  ;;  %v4744_v50 = vunpack.i.l.bf16 %v7400_v39  ;;  %v4719_v20 = vunpack.i.l.bf16 %v7360_v62 }
 0x42f   : > { %3356 = vrot.lane.b32.xlu1 %v8945_v58, %s5044_s11  ;;  %v2791_v47 = vsel %vm1174_vm10, %v2759_v13, %v4739_v16  ;;  %v4854_v23 = vunpack.i.l.bf16 %v7598_v21  ;;  %v2760_v57 = vsel %vm1108_vm7, %v8862_v26, %v4734_v1  ;;  %v4855_v26 = vunpack.i.h.bf16 %v7598_v21 }
 0x430   : > { %v2983_v59 = vsel %vm2964_vm6, %v2950_v15, %v4849_v46  ;;  %v2984_v52 = vsel %vm2964_vm6, %v2951_v9, %v4850_v38  ;;  %v4863_v37 = vpop.permute.xlu0 %4862  ;;  %v2792_v28 = vsel %vm1174_vm10, %v2760_v57, %v4740_v55  ;;  %v2822_v62 = vsel %vm1240_vm12, %v2790_v12, %v4719_v20 }
 0x431   : > { %v3006_v31 = vpack.c.bf16 %v2984_v52, %v2983_v59  ;;  %v7616_v35 = vpop.permute.xlu1 %4857  ;;  %v4865_v29 = vunpack.i.h.bf16 %v4863_v37  ;;  %v4864_v61 = vunpack.i.l.bf16 %v4863_v37  ;;  %v2824_v40 = vsel %vm1240_vm12, %v2792_v28, %v4744_v50 }
 0x432   : > { %3332 = vrot.lane.b32.xlu0 %v8946_v22, %s5044_s11  ;;  %v2823_v38 = vsel %vm1240_vm12, %v2791_v47, %v4720_v14  ;;  %v2854_v19 = vsel %vm1306_vm14, %v2822_v62, %v4854_v23  ;;  %v4859_v15 = vunpack.i.l.bf16 %v7616_v35  ;;  %v4759_v57 = vunpack.i.l.bf16 %v7432_v8 }
 0x433   : > { %3360 = vrot.lane.b32.xlu1 %v7178_v32, %s5044_s11  ;;  %4310 = vmatmul.mubr.msk.bf16.gmra.mrb[16].mxu1 %vm3056_vm8, %v3006_v31  ;;  %v2789_v32 = vsel %vm1174_vm10, %v2757_v53, %v4684_v4  ;;  %v2887_v58 = vsel %vm2865_vm2, %v2854_v19, %v4865_v29  ;;  %v2855_v53 = vsel %vm1306_vm14, %v2823_v38, %v4855_v26 }
 0x434   : > { %v4873_v30 = vpop.permute.xlu0 %4872  ;;  %v2821_v36 = vsel %vm1240_vm12, %v2789_v32, %v4715_v33  ;;  %v2856_v55 = vsel %vm1306_vm14, %v2824_v40, %v4859_v15  ;;  %v4725_v40 = vunpack.i.h.bf16 %v7383_v45  ;;  %v2762_v38 = vsel %vm1108_vm7, %v6500_v54, %v4759_v57 }
 0x435   : > { %v4868_v25 = vpop.permute.xlu1 %4867  ;;  %v4875_v60 = vunpack.i.h.bf16 %v4873_v30  ;;  %v4874_v44 = vunpack.i.l.bf16 %v4873_v30  ;;  %v2853_v0 = vsel %vm1306_vm14, %v2821_v36, %v4810_v6  ;;  %v4735_v36 = vunpack.i.h.bf16 %v7370_v48 }
 0x436   : > { %v2886_v9 = vsel %vm2865_vm2, %v2853_v0, %v4864_v61  ;;  %v4870_v49 = vunpack.i.h.bf16 %v4868_v25  ;;  %v4869_v59 = vunpack.i.l.bf16 %v4868_v25  ;;  %v4764_v0 = vunpack.i.l.bf16 %v7410_v42 }
 0x437   : > { %3364 = vrot.lane.b32.xlu1 %v7175_v10, %s5044_s11  ;;  %v2919_v37 = vsel %vm2898_vm3, %v2886_v9, %v4874_v44  ;;  %v2920_v3 = vsel %vm2898_vm3, %v2887_v58, %v4875_v60  ;;  %v2761_v48 = vsel %vm1108_vm7, %v8863_v56, %v4735_v36  ;;  %v4770_v15 = vunpack.i.h.bf16 %v7421_v11 }
 0x438   : > { %v4883_v41 = vpop.permute.xlu0 %4882  ;;  %v2888_v14 = vsel %vm2865_vm2, %v2855_v53, %v4869_v59  ;;  %v2889_v12 = vsel %vm2865_vm2, %v2856_v55, %v4870_v49  ;;  %v4750_v9 = vunpack.i.h.bf16 %v7406_v2  ;;  %v2794_v58 = vsel %vm1174_vm10, %v2762_v38, %v4725_v40 }
 0x439   : > { %v4878_v17 = vpop.permute.xlu1 %4877  ;;  %v4885_v10 = vunpack.i.h.bf16 %v4883_v41  ;;  %v4884_v46 = vunpack.i.l.bf16 %v4883_v41  ;;  %v4760_v41 = vunpack.i.h.bf16 %v7432_v8  ;;  %v4724_v8 = vunpack.i.l.bf16 %v7383_v45 }
 0x43a   : > { %v4880_v16 = vunpack.i.h.bf16 %v4878_v17  ;;  %v4879_v27 = vunpack.i.l.bf16 %v4878_v17  ;;  %v4774_v49 = vunpack.i.l.bf16 %v7440_v43  ;;  %v4749_v45 = vunpack.i.l.bf16 %v7406_v2 }
 0x43b   : > { %v2952_v21 = vsel %vm2931_vm5, %v2919_v37, %v4884_v46  ;;  %v2953_v63 = vsel %vm2931_vm5, %v2920_v3, %v4885_v10  ;;  %v4769_v10 = vunpack.i.l.bf16 %v7421_v11  ;;  %v4745_v46 = vunpack.i.h.bf16 %v7400_v39 }
 0x43c   : > { %v4893_v52 = vpop.permute.xlu0 %4892  ;;  %v2921_v20 = vsel %vm2898_vm3, %v2888_v14, %v4879_v27  ;;  %v2922_v47 = vsel %vm2898_vm3, %v2889_v12, %v4880_v16  ;;  %v2763_v26 = vsel %vm1108_vm7, %v8867_v7, %v4760_v41  ;;  %v2793_v54 = vsel %vm1174_vm10, %v2761_v48, %v4724_v8 }
 0x43d   : > { %v4895_v31 = vunpack.i.h.bf16 %v4893_v52  ;;  %v4894_v4 = vunpack.i.l.bf16 %v4893_v52  ;;  %v4888_v22 = vpop.permute.xlu1 %4887  ;;  %v2795_v39 = vsel %vm1174_vm10, %v2763_v26, %v4769_v10  ;;  %v4860_v59 = vunpack.i.h.bf16 %v7616_v35 }
 0x43e   : > { %v4890_v13 = vunpack.i.h.bf16 %v4888_v22  ;;  %v4889_v30 = vunpack.i.l.bf16 %v4888_v22  ;;  %v2825_v52 = vsel %vm1240_vm12, %v2793_v54, %v4745_v46  ;;  %v2764_v11 = vsel %vm1108_vm7, %v8865_v51, %v4764_v0 }
 0x43f   : > { %v2985_v33 = vsel %vm2964_vm6, %v2952_v21, %v4894_v4  ;;  %v2986_v1 = vsel %vm2964_vm6, %v2953_v63, %v4895_v31  ;;  %v2796_v4 = vsel %vm1174_vm10, %v2764_v11, %v4770_v15  ;;  %v2826_v22 = vsel %vm1240_vm12, %v2794_v58, %v4749_v45  ;;  %v8947_v11 = vld [vmem:[#allocation7_spill] sm:$0xff] }
 0x440   : > { %v3007_v25 = vpack.c.bf16 %v2986_v1, %v2985_v33  ;;  %v7666_v32 = vpop.permute.xlu0 %4902  ;;  %v2954_v29 = vsel %vm2931_vm5, %v2921_v20, %v4889_v30  ;;  %v2955_v61 = vsel %vm2931_vm5, %v2922_v47, %v4890_v13  ;;  %v2828_v16 = vsel %vm1240_vm12, %v2796_v4, %v4774_v49 }
 0x441   : > { %v4898_v50 = vpop.permute.xlu1 %4897  ;;  %v4904_v7 = vunpack.i.l.bf16 %v7666_v32  ;;  %v2827_v35 = vsel %vm1240_vm12, %v2795_v39, %v4750_v9  ;;  %v2857_v1 = vsel %vm1306_vm14, %v2825_v52, %v4860_v59  ;;  %v4905_v51 = vunpack.i.h.bf16 %v7666_v32 }
 0x442   : > { %v4900_v6 = vunpack.i.h.bf16 %v4898_v50  ;;  %v4899_v23 = vunpack.i.l.bf16 %v4898_v50  ;;  %4313 = vmatprep.mubr.msk.bf16.mxu1 %vm3056_vm8, %v3007_v25  ;;  %v4765_v15 = vunpack.i.h.bf16 %v7410_v42  ;;  %v4784_v54 = vunpack.i.l.bf16 %v7485_v34 }
 0x443   : > { %v2858_v13 = vsel %vm1306_vm14, %v2826_v22, %v4904_v7  ;;  %v4785_v7 = vunpack.i.h.bf16 %v7485_v34  ;;  %v4794_v42 = vunpack.i.l.bf16 %v7507_v5  ;;  %v4795_v4 = vunpack.i.h.bf16 %v7507_v5  ;;  %v8951_v5 = vld [vmem:[#allocation23_spill] sm:$0xff] }
 0x444   : > { %v2987_v28 = vsel %vm2964_vm6, %v2954_v29, %v4899_v23  ;;  %v2988_v62 = vsel %vm2964_vm6, %v2955_v61, %v4900_v6  ;;  %v4913_v60 = vpop.permute.xlu0 %4912  ;;  %v2765_v52 = vsel %vm1108_vm7, %v8891_v24, %v4765_v15  ;;  %v7751_v24 = vld [vmem:[%s8560_s4] ss:$0 sm:$0xff] }
 0x445   : > { %v3008_v44 = vpack.c.bf16 %v2988_v62, %v2987_v28  ;;  %v7680_v17 = vpop.permute.xlu1 %4907  ;;  %v4915_v37 = vunpack.i.h.bf16 %v4913_v60  ;;  %v4914_v3 = vunpack.i.l.bf16 %v4913_v60  ;;  %v2859_v60 = vsel %vm1306_vm14, %v2827_v35, %v4905_v51 }
 0x446   : > { %v4909_v30 = vunpack.i.l.bf16 %v7680_v17 }
 0x447   : > { %4314 = vmatmul.mubr.msk.bf16.gmra.mrb[20].mxu1 %vm3056_vm8, %v3008_v44  ;;  %v2890_v53 = vsel %vm2865_vm2, %v2857_v1, %v4914_v3  ;;  %v2891_v55 = vsel %vm2865_vm2, %v2858_v13, %v4915_v37  ;;  %v4754_v37 = vunpack.i.l.bf16 %v8947_v11  ;;  %v8948_v3 = vld [vmem:[#allocation54_spill] sm:$0xff]  ;;  %v2768_v1 = vsel %vm1108_vm7, %v8951_v5, %v7491_v18 }
 0x448   : > { %v4923_v19 = vpop.permute.xlu0 %4922  ;;  %v2860_v44 = vsel %vm1306_vm14, %v2828_v16, %v4909_v30  ;;  %v8949_v16 = vld [vmem:[#allocation57_spill] sm:$0xff]  ;;  %v4910_v13 = vunpack.i.h.bf16 %v7680_v17 }
 0x449   : > { %v4918_v56 = vpop.permute.xlu1 %4917  ;;  %v4925_v21 = vunpack.i.h.bf16 %v4923_v19  ;;  %v4924_v2 = vunpack.i.l.bf16 %v4923_v19  ;;  %v4780_v35 = vunpack.i.h.bf16 %v8949_v16 }
 0x44a   : > { %v4920_v25 = vunpack.i.h.bf16 %v4918_v56  ;;  %v4919_v14 = vunpack.i.l.bf16 %v4918_v56 }
 0x44b   : > { %v2923_v50 = vsel %vm2898_vm3, %v2890_v53, %v4924_v2  ;;  %v2924_v20 = vsel %vm2898_vm3, %v2891_v55, %v4925_v21  ;;  %v4755_v21 = vunpack.i.h.bf16 %v8947_v11  ;;  %v4775_v2 = vunpack.i.h.bf16 %v7440_v43 }
 0x44c   : > { %v4933_v31 = vpop.permute.xlu0 %4932  ;;  %v2892_v38 = vsel %vm2865_vm2, %v2859_v60, %v4919_v14  ;;  %v2893_v10 = vsel %vm2865_vm2, %v2860_v44, %v4920_v25  ;;  %v4779_v53 = vunpack.i.l.bf16 %v8949_v16  ;;  %v2800_v14 = vsel %vm1174_vm10, %v2768_v1, %v4795_v4  ;;  %v8955_v1 = vld [vmem:[#allocation25_spill] sm:$0xff] }
 0x44d   : > { %v4928_v63 = vpop.permute.xlu1 %4927  ;;  %v4935_v27 = vunpack.i.h.bf16 %v4933_v31  ;;  %v4934_v33 = vunpack.i.l.bf16 %v4933_v31  ;;  %v2766_v31 = vsel %vm1108_vm7, %v8948_v3, %v4784_v54 }
 0x44e   : > { %v4930_v57 = vunpack.i.h.bf16 %v4928_v63  ;;  %v4929_v29 = vunpack.i.l.bf16 %v4928_v63  ;;  %v2797_v63 = vsel %vm1174_vm10, %v2765_v52, %v4754_v37  ;;  %v2798_v51 = vsel %vm1174_vm10, %v2766_v31, %v4755_v21 }
 0x44f   : > { %v2956_v32 = vsel %vm2931_vm5, %v2923_v50, %v4934_v33  ;;  %v2957_v36 = vsel %vm2931_vm5, %v2924_v20, %v4935_v27  ;;  %v8950_v27 = vld [vmem:[#allocation48_spill] sm:$0xff]  ;;  %v8952_v50 = vld [vmem:[#allocation41_spill] sm:$0xff]  ;;  %v2829_v18 = vsel %vm1240_vm12, %v2797_v63, %v4775_v2 }
 0x450   : > { %v4943_v12 = vpop.permute.xlu0 %4942  ;;  %v2925_v46 = vsel %vm2898_vm3, %v2892_v38, %v4929_v29  ;;  %v2926_v0 = vsel %vm2898_vm3, %v2893_v10, %v4930_v57  ;;  %v2767_v33 = vsel %vm1108_vm7, %v8950_v27, %v4785_v7  ;;  %v3144_v20 = vadd.f32 %v7751_v24, %v8952_v50 }
 0x451   : > { %v4945_v47 = vunpack.i.h.bf16 %v4943_v12  ;;  %v4944_v6 = vunpack.i.l.bf16 %v4943_v12  ;;  %v4938_v23 = vpop.permute.xlu1 %4937  ;;  %v2799_v43 = vsel %vm1174_vm10, %v2767_v33, %v4794_v42  ;;  %v2861_v29 = vsel %vm1306_vm14, %v2829_v18, %v4910_v13 }
 0x452   : > { %v4940_v28 = vunpack.i.h.bf16 %v4938_v23  ;;  %v4939_v62 = vunpack.i.l.bf16 %v4938_v23  ;;  %v2831_v17 = vsel %vm1240_vm12, %v2799_v43, %v4780_v35 }
 0x453   : > { %v2989_v61 = vsel %vm2964_vm6, %v2956_v32, %v4944_v6  ;;  %v2990_v41 = vsel %vm2964_vm6, %v2957_v36, %v4945_v47  ;;  %v2830_v32 = vsel %vm1240_vm12, %v2798_v51, %v4779_v53  ;;  %v3168_v51 = vadd.f32 %v8955_v1, %v7751_v24  ;;  %v8956_v53 = vld [vmem:[#allocation5_spill] sm:$0xff] }
 0x454   : > { %v3009_v40 = vpack.c.bf16 %v2990_v41, %v2989_v61  ;;  %v7724_v48 = vpop.permute.xlu0 %4952  ;;  %v2958_v56 = vsel %vm2931_vm5, %v2925_v46, %v4939_v62  ;;  %v2959_v9 = vsel %vm2931_vm5, %v2926_v0, %v4940_v28  ;;  %v8953_v28 = vld [vmem:[#allocation59_spill] sm:$0xff] }
 0x455   : > { %v4948_v8 = vpop.permute.xlu1 %4947  ;;  %v4954_v30 = vunpack.i.l.bf16 %v7724_v48  ;;  %v4955_v61 = vunpack.i.h.bf16 %v7724_v48  ;;  %v2832_v62 = vsel %vm1240_vm12, %v2800_v14, %v8953_v28 }
 0x456   : > { %v4950_v26 = vunpack.i.h.bf16 %v4948_v8  ;;  %v4949_v19 = vunpack.i.l.bf16 %v4948_v8  ;;  %4317 = vmatprep.mubr.msk.bf16.mxu1 %vm3056_vm8, %v3009_v40 }
 0x457   : > { %v2862_v41 = vsel %vm1306_vm14, %v2830_v32, %v4954_v30 }
 0x458   : > { %v2991_v58 = vsel %vm2964_vm6, %v2958_v56, %v4949_v19  ;;  %v2992_v49 = vsel %vm2964_vm6, %v2959_v9, %v4950_v26  ;;  %v4958_v45 = vpop.permute.xlu0 %4957 }
 0x459   : > { %v3010_v39 = vpack.c.bf16 %v2992_v49, %v2991_v58  ;;  %v2320_v59 = vpop.permute.xlu1 %2319  ;;  %v4960_v55 = vunpack.i.h.bf16 %v4958_v45  ;;  %v4959_v25 = vunpack.i.l.bf16 %v4958_v45 }
 0x45a   : > { %v2864_v7 = vsel %vm1306_vm14, %v2832_v62, %v2320_v59 }
 0x45b   : > { %4318 = vmatmul.mubr.msk.bf16.gmra.mrb[24].mxu1 %vm3056_vm8, %v3010_v39  ;;  %v2894_v60 = vsel %vm2865_vm2, %v2861_v29, %v4959_v25  ;;  %v2895_v44 = vsel %vm2865_vm2, %v2862_v41, %v4960_v55  ;;  %v2863_v39 = vsel %vm1306_vm14, %v2831_v17, %v4955_v61  ;;  %v3160_v55 = vadd.f32 %v7751_v24, %v8956_v53  ;;  %v8957_v25 = vld [vmem:[#allocation49_spill] sm:$0xff] }
 0x45c   : > { %v4968_v22 = vpop.permute.xlu0 %4967  ;;  %v7805_v14 = vadd.f32 %v8957_v25, %v7751_v24 }
 0x45d   : > { %v4963_v34 = vpop.permute.xlu1 %4962  ;;  %v4970_v47 = vunpack.i.h.bf16 %v4968_v22  ;;  %v4969_v6 = vunpack.i.l.bf16 %v4968_v22 }
 0x45e   : > { %v4965_v40 = vunpack.i.h.bf16 %v4963_v34  ;;  %v4964_v38 = vunpack.i.l.bf16 %v4963_v34  ;;  %v8954_v34 = vld [vmem:[#allocation51_spill] sm:$0xff] }
 0x45f   : > { %v2927_v8 = vsel %vm2898_vm3, %v2894_v60, %v4969_v6  ;;  %v2928_v46 = vsel %vm2898_vm3, %v2895_v44, %v4970_v47  ;;  %v3152_v63 = vadd.f32 %v8954_v34, %v7751_v24 }
 0x460   : > { %v4978_v12 = vpop.permute.xlu0 %4977  ;;  %v2897_v11 = vsel %vm2865_vm2, %v2864_v7, %v4965_v40  ;;  %v2896_v37 = vsel %vm2865_vm2, %v2863_v39, %v4964_v38 }
 0x461   : > { %v4973_v23 = vpop.permute.xlu1 %4972  ;;  %v4980_v36 = vunpack.i.h.bf16 %v4978_v12  ;;  %v4979_v57 = vunpack.i.l.bf16 %v4978_v12 }
 0x462   : > { %v4975_v56 = vunpack.i.h.bf16 %v4973_v23  ;;  %v4974_v9 = vunpack.i.l.bf16 %v4973_v23 }
 0x463   : > { %v2960_v48 = vsel %vm2931_vm5, %v2927_v8, %v4979_v57  ;;  %v2961_v15 = vsel %vm2931_vm5, %v2928_v46, %v4980_v36 }
 0x464   : > { %v4988_v10 = vpop.permute.xlu0 %4987  ;;  %v2929_v4 = vsel %vm2898_vm3, %v2896_v37, %v4974_v9  ;;  %v2930_v22 = vsel %vm2898_vm3, %v2897_v11, %v4975_v56 }
 0x465   : > { %v4990_v0 = vunpack.i.h.bf16 %v4988_v10  ;;  %v4989_v26 = vunpack.i.l.bf16 %v4988_v10  ;;  %v4983_v19 = vpop.permute.xlu1 %4982 }
 0x466   : > { %v4985_v49 = vunpack.i.h.bf16 %v4983_v19  ;;  %v4984_v45 = vunpack.i.l.bf16 %v4983_v19 }
 0x467   : > { %v2993_v54 = vsel %vm2964_vm6, %v2960_v48, %v4989_v26  ;;  %v2994_v58 = vsel %vm2964_vm6, %v2961_v15, %v4990_v0  ;;  %v8958_v15 = vld [vmem:[#allocation33_spill] sm:$0xff] }
 0x468   : > { %v3011_v52 = vpack.c.bf16 %v2994_v58, %v2993_v54  ;;  %v3303_v42 = vpop.permute.xlu0 %3302  ;;  %v2962_v59 = vsel %vm2931_vm5, %v2929_v4, %v4984_v45  ;;  %v2963_v16 = vsel %vm2931_vm5, %v2930_v22, %v4985_v49  ;;  %v3176_v56 = vadd.f32 %v7751_v24, %v8958_v15 }
 0x469   : > { %v3398_v3 = vadd.f32 %v3303_v42, %v3144_v20  ;;  %v4993_v31 = vpop.permute.xlu1 %4992 }
 0x46a   : > { %v4995_v21 = vunpack.i.h.bf16 %v4993_v31  ;;  %v4994_v2 = vunpack.i.l.bf16 %v4993_v31  ;;  %4321 = vmatprep.mubr.msk.bf16.mxu1 %vm3056_vm8, %v3011_v52 }
 0x46b   : > { %v3430_v35 = vmax.f32 %v3398_v3, 0.0 }
 0x46c   : > { %v2995_v27 = vsel %vm2964_vm6, %v2962_v59, %v4994_v2  ;;  %v2996_v33 = vsel %vm2964_vm6, %v2963_v16, %v4995_v21  ;;  %v3307_v5 = vpop.permute.xlu0 %3306 }
 0x46d   : > { %v3012_v43 = vpack.c.bf16 %v2996_v33, %v2995_v27  ;;  %v3400_v13 = vadd.f32 %v3307_v5, %v3152_v63  ;;  %v7799_v30 = vpop.permute.xlu1 %3334  ;;  %v3685_v50 = vrot.slane %v3430_v35, 6  ;;  %v3515_v20 = vrot.slane %v3430_v35, 1 }
 0x46e   : > { %v3549_v18 = vrot.slane %v3430_v35, 2  ;;  %v3583_v6 = vrot.slane %v3430_v35, 3  ;;  %v3617_v23 = vrot.slane %v3430_v35, 4  ;;  %v3651_v32 = vrot.slane %v3430_v35, 5 }
 0x46f   : > { %v3432_v12 = vmax.f32 %v3400_v13, 0.0  ;;  %4322 = vmatmul.mubr.msk.bf16.gmra.mrb[28].mxu1 %vm3056_vm8, %v3012_v43  ;;  %v3719_v17 = vrot.slane %v3430_v35, 7 }
 0x470   : > { %v7808_v47 = vpop.permute.xlu0 %3338 }
 0x471   : > { %v3311_v36 = vpop.permute.xlu1 %3310  ;;  %v3686_v57 = vrot.slane %v3432_v12, 5  ;;  %v3516_v29 = vsel %vm3479_vm0, %v3432_v12, %v3515_v20  ;;  %v3550_v61 = vrot.slane %v3432_v12, 1  ;;  %v3584_v41 = vrot.slane %v3432_v12, 2 }
 0x472   : > { %v3402_v28 = vadd.f32 %v3311_v36, %v3160_v55  ;;  %v3618_v62 = vrot.slane %v3432_v12, 3  ;;  %v3652_v60 = vrot.slane %v3432_v12, 4  ;;  %v3720_v44 = vrot.slane %v3432_v12, 6 }
 0x473   : > { %v3687_v40 = vsel %vm3479_vm0, %v3686_v57, %v3685_v50  ;;  %v3551_v38 = vsel %vm3479_vm0, %v3550_v61, %v3549_v18  ;;  %v3585_v10 = vsel %vm3479_vm0, %v3584_v41, %v3583_v6  ;;  %v3478_v8 = vrot.slane %v3432_v12, 7 }
 0x474   : > { %v7814_v46 = vmax.f32 %v3402_v28, 0.0  ;;  %v3315_v0 = vpop.permute.xlu0 %3314  ;;  %v3619_v26 = vsel %vm3479_vm0, %v3618_v62, %v3617_v23  ;;  %v3653_v19 = vsel %vm3479_vm0, %v3652_v60, %v3651_v32  ;;  %v3721_v48 = vsel %vm3479_vm0, %v3720_v44, %v3719_v17 }
 0x475   : > { %v3404_v9 = vadd.f32 %v3315_v0, %v3168_v51  ;;  %v7821_v54 = vpop.permute.xlu1 %3342  ;;  %v7824_v58 = vsel %vm3479_vm0, %v3478_v8, %v3430_v35 }
 0x476   : > { %v3688_v49 = vrot.slane %v7814_v46, 4  ;;  %v3517_v45 = vrot.slane %v7814_v46, 7  ;;  %v3552_v39 = vsel %vm3482_vm4, %v7814_v46, %v3551_v38  ;;  %v3586_v7 = vrot.slane %v7814_v46, 1 }
 0x477   : > { %v7831_v52 = vmax.f32 %v3404_v9, 0.0  ;;  %v3620_v42 = vrot.slane %v7814_v46, 2  ;;  %v3654_v11 = vrot.slane %v7814_v46, 3  ;;  %v3722_v22 = vrot.slane %v7814_v46, 5 }
 0x478   : > { %v3319_v37 = vpop.permute.xlu0 %3318  ;;  %v3689_v3 = vsel %vm3482_vm4, %v3688_v49, %v3687_v40  ;;  %v3518_v31 = vsel %vm3482_vm4, %v3517_v45, %v3516_v29  ;;  %v3587_v4 = vsel %vm3482_vm4, %v3586_v7, %v3585_v10  ;;  %v3481_v27 = vrot.slane %v7814_v46, 6 }
 0x479   : > { %v3406_v21 = vadd.f32 %v3319_v37, %v3176_v56  ;;  %v7839_v2 = vpop.permute.xlu1 %3346  ;;  %v3690_v34 = vrot.slane %v7831_v52, 3  ;;  %v3519_v63 = vrot.slane %v7831_v52, 6  ;;  %v3553_v59 = vrot.slane %v7831_v52, 7 }
 0x47a   : > { %v3588_v16 = vsel %vm3485_vm9, %v7831_v52, %v3587_v4  ;;  %v3621_v35 = vsel %vm3482_vm4, %v3620_v42, %v3619_v26  ;;  %v3622_v13 = vrot.slane %v7831_v52, 1  ;;  %v3655_v53 = vsel %vm3482_vm4, %v3654_v11, %v3653_v19 }
 0x47b   : > { %v3438_v33 = vmax.f32 %v3406_v21, 0.0  ;;  %v3691_v5 = vsel %vm3485_vm9, %v3690_v34, %v3689_v3  ;;  %v3520_v1 = vsel %vm3485_vm9, %v3519_v63, %v3518_v31  ;;  %v3554_v51 = vsel %vm3485_vm9, %v3553_v59, %v3552_v39  ;;  %v8959_v21 = vld [vmem:[#allocation55_spill] sm:$0xff] }
 0x47c   : > { %v3323_v43 = vpop.permute.xlu0 %3322  ;;  %v3656_v55 = vrot.slane %v7831_v52, 2  ;;  %v3723_v25 = vsel %vm3482_vm4, %v3722_v22, %v3721_v48  ;;  %v3623_v32 = vsel %vm3485_vm9, %v3622_v13, %v3621_v35  ;;  %v3724_v44 = vrot.slane %v7831_v52, 4  ;;  %v8961_v13 = vld [vmem:[#allocation16_spill] sm:$0xff] }
 0x47d   : > { %v3408_v12 = vadd.f32 %v3323_v43, %v7805_v14  ;;  %v7856_v50 = vpop.permute.xlu1 %3350  ;;  %v3692_v20 = vrot.slane %v3438_v33, 2  ;;  %v3521_v18 = vrot.slane %v3438_v33, 5  ;;  %v3555_v6 = vrot.slane %v3438_v33, 6 }
 0x47e   : > { %v3589_v23 = vrot.slane %v3438_v33, 7  ;;  %v3657_v17 = vsel %vm3485_vm9, %v3656_v55, %v3655_v53  ;;  %v3658_v36 = vrot.slane %v3438_v33, 1  ;;  %v3624_v62 = vsel %vm3488_vm11, %v3438_v33, %v3623_v32  ;;  %v8962_v55 = vld [vmem:[#allocation26_spill] sm:$0xff] }
 0x47f   : > { %v3440_v57 = vmax.f32 %v3408_v12, 0.0  ;;  %v3693_v29 = vsel %vm3488_vm11, %v3692_v20, %v3691_v5  ;;  %v3522_v61 = vsel %vm3488_vm11, %v3521_v18, %v3520_v1  ;;  %v3556_v41 = vsel %vm3488_vm11, %v3555_v6, %v3554_v51 }
 0x480   : > { %v7863_v28 = vpop.permute.xlu0 %3326  ;;  %v3590_v14 = vsel %vm3488_vm11, %v3589_v23, %v3588_v16  ;;  %v3659_v60 = vsel %vm3488_vm11, %v3658_v36, %v3657_v17  ;;  %v3725_v19 = vsel %vm3485_vm9, %v3724_v44, %v3723_v25  ;;  %v3726_v48 = vrot.slane %v3438_v33, 3 }
 0x481   : > { %v7869_v40 = vpop.permute.xlu1 %3354  ;;  %v3694_v38 = vrot.slane %v3440_v57, 1  ;;  %v3523_v10 = vrot.slane %v3440_v57, 4  ;;  %v3557_v8 = vrot.slane %v3440_v57, 5  ;;  %v3591_v46 = vrot.slane %v3440_v57, 6 }
 0x482   : > { %v3625_v0 = vrot.slane %v3440_v57, 7  ;;  %v7872_v26 = vsel %vm3491_vm13, %v3440_v57, %v3659_v60  ;;  %v3727_v7 = vsel %vm3488_vm11, %v3726_v48, %v3725_v19  ;;  %v3728_v42 = vrot.slane %v3440_v57, 2 }
 0x483   : > { %v7876_v15 = vsel %vm3491_vm13, %v3694_v38, %v3693_v29  ;;  %v7879_v56 = vsel %vm3491_vm13, %v3523_v10, %v3522_v61  ;;  %v7882_v9 = vsel %vm3491_vm13, %v3557_v8, %v3556_v41  ;;  %v7885_v49 = vsel %vm3491_vm13, %v3591_v46, %v3590_v14 }
 0x484   : > { %v7887_v45 = vpop.permute.xlu0 %3330  ;;  %v7890_v39 = vsel %vm3491_vm13, %v3625_v0, %v3624_v62  ;;  %v3483_v11 = vsel %vm3482_vm4, %v3481_v27, %v7824_v58  ;;  %v3484_v3 = vrot.slane %v7831_v52, 5  ;;  %v3487_v31 = vrot.slane %v3438_v33, 4  ;;  %v8960_v52 = vld [vmem:[#allocation53_spill] sm:$0xff] }
 0x485   : > { %v7895_v37 = vpop.permute.xlu1 %3358  ;;  %v3490_v4 = vrot.slane %v3440_v57, 3  ;;  %v7899_v22 = vsel %vm3491_vm13, %v3728_v42, %v3727_v7  ;;  %v3155_v34 = vadd.f32 %v8959_v21, %v7751_v24  ;;  %v3147_v27 = vadd.f32 %v7751_v24, %v8960_v52  ;;  %v8964_v21 = vld [vmem:[#allocation56_spill] sm:$0xff] }
 0x486   : > { %v3486_v63 = vsel %vm3485_vm9, %v3484_v3, %v3483_v11  ;;  %v3171_v53 = vadd.f32 %v8961_v13, %v7751_v24  ;;  %v3163_v25 = vadd.f32 %v7751_v24, %v8962_v55 }
 0x487   : > { %v3489_v16 = vsel %vm3488_vm11, %v3487_v31, %v3486_v63  ;;  %v8963_v31 = vld [vmem:[#allocation20_spill] sm:$0xff] }
 0x488   : > { %v3309_v59 = vpop.permute.xlu0 %3308  ;;  %v7908_v58 = vsel %vm3491_vm13, %v3490_v4, %v3489_v16  ;;  %v3187_v4 = vadd.f32 %v8963_v31, %v7751_v24 }
 0x489   : > { %v3401_v35 = vadd.f32 %v3309_v59, %v3155_v34  ;;  %v7905_v5 = vpop.permute.xlu1 %3362  ;;  %v3179_v34 = vadd.f32 %v7751_v24, %v8964_v21 }
 0x48b   : > { %v3433_v33 = vmax.f32 %v3401_v35, 0.0 }
 0x48c   : > { %v3305_v1 = vpop.permute.xlu0 %3304 }
 0x48d   : > { %v3399_v51 = vadd.f32 %v3305_v1, %v3147_v27  ;;  %v7912_v43 = vpop.permute.xlu1 %3340  ;;  %v3974_v20 = vrot.slane %v3433_v33, 5  ;;  %v3769_v18 = vrot.slane %v3433_v33, 7  ;;  %v3838_v6 = vrot.slane %v3433_v33, 1 }
 0x48e   : > { %v3872_v32 = vrot.slane %v3433_v33, 2  ;;  %v3906_v17 = vrot.slane %v3433_v33, 3  ;;  %v3940_v36 = vrot.slane %v3433_v33, 4  ;;  %v4008_v57 = vrot.slane %v3433_v33, 6 }
 0x48f   : > { %v3431_v12 = vmax.f32 %v3399_v51, 0.0 }
 0x490   : > { %v7918_v23 = vpop.permute.xlu0 %3336 }
 0x491   : > { %v3313_v29 = vpop.permute.xlu1 %3312  ;;  %v3973_v61 = vrot.slane %v3431_v12, 6  ;;  %v3770_v41 = vsel %vm3479_vm0, %v3769_v18, %v3431_v12  ;;  %v3803_v14 = vrot.slane %v3431_v12, 1  ;;  %v3837_v62 = vrot.slane %v3431_v12, 2 }
 0x492   : > { %v3403_v60 = vadd.f32 %v3313_v29, %v3163_v25  ;;  %v3871_v44 = vrot.slane %v3431_v12, 3  ;;  %v3905_v38 = vrot.slane %v3431_v12, 4  ;;  %v3939_v10 = vrot.slane %v3431_v12, 5 }
 0x493   : > { %v3975_v8 = vsel %vm3479_vm0, %v3974_v20, %v3973_v61  ;;  %v3804_v46 = vsel %vm3479_vm0, %v3433_v33, %v3803_v14  ;;  %v3839_v0 = vsel %vm3479_vm0, %v3838_v6, %v3837_v62  ;;  %v4007_v19 = vrot.slane %v3431_v12, 7 }
 0x494   : > { %v7924_v48 = vmax.f32 %v3403_v60, 0.0  ;;  %v3317_v7 = vpop.permute.xlu0 %3316  ;;  %v3873_v42 = vsel %vm3479_vm0, %v3872_v32, %v3871_v44  ;;  %v3907_v11 = vsel %vm3479_vm0, %v3906_v17, %v3905_v38  ;;  %v3941_v3 = vsel %vm3479_vm0, %v3940_v36, %v3939_v10 }
 0x495   : > { %v3405_v63 = vadd.f32 %v3317_v7, %v3171_v53  ;;  %v4009_v59 = vsel %vm3479_vm0, %v4008_v57, %v4007_v19 }
 0x496   : > { %v3976_v16 = vrot.slane %v7924_v48, 4  ;;  %v3771_v35 = vrot.slane %v7924_v48, 6  ;;  %v3805_v52 = vrot.slane %v7924_v48, 7  ;;  %v3840_v27 = vsel %vm3482_vm4, %v7924_v48, %v3839_v0 }
 0x497   : > { %v3437_v33 = vmax.f32 %v3405_v63, 0.0  ;;  %v3874_v1 = vrot.slane %v7924_v48, 1  ;;  %v3908_v51 = vrot.slane %v7924_v48, 2  ;;  %v3942_v13 = vrot.slane %v7924_v48, 3 }
 0x498   : > { %v3321_v55 = vpop.permute.xlu0 %3320  ;;  %v3977_v53 = vsel %vm3482_vm4, %v3976_v16, %v3975_v8  ;;  %v3772_v25 = vsel %vm3482_vm4, %v3771_v35, %v3770_v41  ;;  %v3806_v12 = vsel %vm3482_vm4, %v3805_v52, %v3804_v46  ;;  %v4010_v20 = vrot.slane %v7924_v48, 5 }
 0x499   : > { %v3407_v18 = vadd.f32 %v3321_v55, %v3179_v34  ;;  %v3978_v6 = vrot.slane %v3437_v33, 3  ;;  %v3773_v32 = vrot.slane %v3437_v33, 5  ;;  %v3807_v17 = vrot.slane %v3437_v33, 6 }
 0x49a   : > { %v3841_v36 = vrot.slane %v3437_v33, 7  ;;  %v3875_v57 = vsel %vm3482_vm4, %v3874_v1, %v3873_v42  ;;  %v3909_v29 = vsel %vm3482_vm4, %v3908_v51, %v3907_v11  ;;  %v3910_v61 = vrot.slane %v3437_v33, 1 }
 0x49b   : > { %v3439_v14 = vmax.f32 %v3407_v18, 0.0  ;;  %v3979_v62 = vsel %vm3485_vm9, %v3978_v6, %v3977_v53  ;;  %v3774_v60 = vsel %vm3485_vm9, %v3773_v32, %v3772_v25  ;;  %v3808_v41 = vsel %vm3485_vm9, %v3807_v17, %v3806_v12 }
 0x49c   : > { %v3325_v44 = vpop.permute.xlu0 %3324  ;;  %v3842_v38 = vsel %vm3485_vm9, %v3841_v36, %v3840_v27  ;;  %v3876_v10 = vsel %vm3485_vm9, %v3437_v33, %v3875_v57  ;;  %v3911_v8 = vsel %vm3485_vm9, %v3910_v61, %v3909_v29  ;;  %v3943_v46 = vsel %vm3482_vm4, %v3942_v13, %v3941_v3 }
 0x49d   : > { %v3409_v0 = vadd.f32 %v3325_v44, %v3187_v4  ;;  %v3980_v19 = vrot.slane %v3439_v14, 2  ;;  %v3775_v48 = vrot.slane %v3439_v14, 4  ;;  %v3809_v7 = vrot.slane %v3439_v14, 5 }
 0x49e   : > { %v3843_v42 = vrot.slane %v3439_v14, 6  ;;  %v3877_v11 = vrot.slane %v3439_v14, 7  ;;  %v3912_v31 = vsel %vm3488_vm11, %v3439_v14, %v3911_v8  ;;  %v3944_v21 = vrot.slane %v3437_v33, 2 }
 0x49f   : > { %v3441_v34 = vmax.f32 %v3409_v0, 0.0  ;;  %v3981_v63 = vsel %vm3488_vm11, %v3980_v19, %v3979_v62  ;;  %v3776_v16 = vsel %vm3488_vm11, %v3775_v48, %v3774_v60  ;;  %v3810_v35 = vsel %vm3488_vm11, %v3809_v7, %v3808_v41 }
 0x4a0   : > { %v3844_v52 = vsel %vm3488_vm11, %v3843_v42, %v3842_v38  ;;  %v3878_v3 = vsel %vm3488_vm11, %v3877_v11, %v3876_v10  ;;  %v3945_v4 = vsel %vm3485_vm9, %v3944_v21, %v3943_v46  ;;  %v3946_v27 = vrot.slane %v3439_v14, 1  ;;  %v3329_v38 = vpop.permute.xlu0 %3328 }
 0x4a1   : > { %v3982_v1 = vrot.slane %v3441_v34, 1  ;;  %v3777_v51 = vrot.slane %v3441_v34, 3  ;;  %v3811_v13 = vrot.slane %v3441_v34, 4  ;;  %v3845_v55 = vrot.slane %v3441_v34, 5 }
 0x4a2   : > { %v3879_v53 = vrot.slane %v3441_v34, 6  ;;  %v3913_v25 = vrot.slane %v3441_v34, 7  ;;  %v3947_v12 = vsel %vm3488_vm11, %v3946_v27, %v3945_v4  ;;  %v4011_v18 = vsel %vm3482_vm4, %v4010_v20, %v4009_v59 }
 0x4a3   : > { %v3983_v6 = vsel %vm3491_vm13, %v3982_v1, %v3981_v63  ;;  %v7966_v32 = vsel %vm3491_vm13, %v3777_v51, %v3776_v16  ;;  %v7969_v17 = vsel %vm3491_vm13, %v3811_v13, %v3810_v35  ;;  %v7972_v36 = vsel %vm3491_vm13, %v3845_v55, %v3844_v52 }
 0x4a4   : > { %v7975_v57 = vsel %vm3491_vm13, %v3879_v53, %v3878_v3  ;;  %v7978_v29 = vsel %vm3491_vm13, %v3913_v25, %v3912_v31  ;;  %v7981_v61 = vsel %vm3491_vm13, %v3441_v34, %v3947_v12  ;;  %v4012_v59 = vrot.slane %v3437_v33, 4  ;;  %v3333_v7 = vpop.permute.xlu0 %3332 }
 0x4a5   : > { %v4014_v20 = vrot.slane %v3439_v14, 3  ;;  %v4016_v62 = vrot.slane %v3441_v34, 2 }
 0x4a6   : > { %v4013_v60 = vsel %vm3485_vm9, %v4012_v59, %v4011_v18 }
 0x4a7   : > { %v4015_v41 = vsel %vm3488_vm11, %v4014_v20, %v4013_v60 }
 0x4a8   : > { %v7986_v44 = vsel %vm3491_vm13, %v4016_v62, %v4015_v41 }
 0x4f2   : > { %v4307_v10 = vpop.f32.mrb[12].mxu1 }
 0x4f3   : > { %v3200_v8 = vadd.f32 %v4307_v10, %v7751_v24  ;;  %v3191_v46 = vpop.f32.mrb[13].mxu1 }
 0x4f4   : > { %v3192_v0 = vadd.f32 %v7751_v24, %v3191_v46  ;;  %v4308_v19 = vpop.f32.mrb[14].mxu1 }
 0x4f5   : > { %v3412_v48 = vadd.f32 %v7887_v45, %v3200_v8  ;;  %v3203_v33 = vadd.f32 %v4308_v19, %v7751_v24  ;;  %v3194_v14 = vpop.f32.mrb[15].mxu1 }
 0x4f6   : > { %v3410_v42 = vadd.f32 %v7863_v28, %v3192_v0  ;;  %v3195_v11 = vadd.f32 %v7751_v24, %v3194_v14 }
 0x4f7   : > { %v7994_v31 = vmax.f32 %v3412_v48, 0.0  ;;  %v3413_v21 = vadd.f32 %v3333_v7, %v3203_v33 }
 0x4f8   : > { %v7996_v34 = vmax.f32 %v3410_v42, 0.0  ;;  %v3411_v63 = vadd.f32 %v3329_v38, %v3195_v11 }
 0x4f9   : > { %v7998_v16 = vmax.f32 %v3413_v21, 0.0  ;;  %v3697_v45 = vrot.slane %v7994_v31, 7  ;;  %v3527_v35 = vrot.slane %v7994_v31, 2  ;;  %v3561_v52 = vrot.slane %v7994_v31, 3 }
 0x4fa   : > { %v3443_v3 = vmax.f32 %v3411_v63, 0.0  ;;  %v3696_v28 = vsel %vm3494_vm15, %v7996_v34, %v7876_v15  ;;  %v3525_v4 = vrot.slane %v7996_v34, 3  ;;  %v3559_v27 = vrot.slane %v7996_v34, 4 }
 0x4fb   : > { %v3698_v1 = vsel %vm3497_vm1, %v3697_v45, %v3696_v28  ;;  %v3593_v51 = vrot.slane %v7996_v34, 5  ;;  %v3595_v13 = vrot.slane %v7994_v31, 4  ;;  %v3627_v55 = vrot.slane %v7996_v34, 6 }
 0x4fc   : > { %3713 = vrot.lane.b32.xlu0 %v3698_v1, %s5040_s15  ;;  %v3526_v53 = vsel %vm3494_vm15, %v3525_v4, %v7879_v56  ;;  %v3560_v15 = vsel %vm3494_vm15, %v3559_v27, %v7882_v9  ;;  %v3629_v25 = vrot.slane %v7994_v31, 5  ;;  %v3661_v12 = vrot.slane %v7996_v34, 7 }
 0x4fd   : > { %v3528_v18 = vsel %vm3497_vm1, %v3527_v35, %v3526_v53  ;;  %v3562_v59 = vsel %vm3497_vm1, %v3561_v52, %v3560_v15  ;;  %v3594_v20 = vsel %vm3494_vm15, %v3593_v51, %v7885_v49  ;;  %v3628_v62 = vsel %vm3494_vm15, %v3627_v55, %v7890_v39 }
 0x4fe   : > { %v3596_v60 = vsel %vm3497_vm1, %v3595_v13, %v3594_v20  ;;  %v3630_v56 = vsel %vm3497_vm1, %v3629_v25, %v3628_v62  ;;  %v3662_v9 = vsel %vm3494_vm15, %v3661_v12, %v7872_v26  ;;  %v3663_v41 = vrot.slane %v7994_v31, 6 }
 0x4ff   : > { %v3730_v38 = vrot.slane %v7996_v34, 1  ;;  %v3984_v10 = vsel %vm3494_vm15, %v3443_v3, %v3983_v6  ;;  %v3985_v8 = vrot.slane %v7998_v16, 7  ;;  %v3779_v46 = vrot.slane %v3443_v3, 2 }
 0x500   : > { %3543 = vrot.lane.b32.xlu0 %v3528_v18, %s5033_s25  ;;  %v3664_v49 = vsel %vm3497_vm1, %v3663_v41, %v3662_v9  ;;  %v3781_v39 = vrot.slane %v7998_v16, 1  ;;  %v3813_v0 = vrot.slane %v3443_v3, 3  ;;  %v3815_v19 = vrot.slane %v7998_v16, 2 }
 0x501   : > { %v3731_v26 = vsel %vm3494_vm15, %v3730_v38, %v7899_v22  ;;  %v8040_v48 = vsel %vm3497_vm1, %v3985_v8, %v3984_v10  ;;  %v3780_v6 = vsel %vm3494_vm15, %v3779_v46, %v7966_v32  ;;  %v3847_v33 = vrot.slane %v3443_v3, 4 }
 0x502   : > { %v8046_v14 = vsel %vm3497_vm1, %v7994_v31, %v3731_v26  ;;  %v8049_v7 = vsel %vm3497_vm1, %v3781_v39, %v3780_v6  ;;  %v3814_v42 = vsel %vm3494_vm15, %v3813_v0, %v7969_v17  ;;  %v3849_v11 = vrot.slane %v7998_v16, 3 }
 0x503   : > { %v8055_v22 = vsel %vm3497_vm1, %v3815_v19, %v3814_v42  ;;  %v3848_v21 = vsel %vm3494_vm15, %v3847_v33, %v7972_v36  ;;  %v3881_v32 = vrot.slane %v3443_v3, 5  ;;  %v3883_v63 = vrot.slane %v7998_v16, 4 }
 0x504   : > { %3577 = vrot.lane.b32.xlu0 %v3562_v59, %s5035_s27  ;;  %v8062_v45 = vsel %vm3497_vm1, %v3849_v11, %v3848_v21  ;;  %v3915_v35 = vrot.slane %v3443_v3, 6  ;;  %v3917_v52 = vrot.slane %v7998_v16, 5  ;;  %v3949_v17 = vrot.slane %v3443_v3, 7 }
 0x505   : > { %v3882_v28 = vsel %vm3494_vm15, %v3881_v32, %v7975_v57  ;;  %v3951_v4 = vrot.slane %v7998_v16, 6  ;;  %v4018_v27 = vrot.slane %v3443_v3, 1  ;;  %v3496_v36 = vrot.slane %v7994_v31, 1 }
 0x506   : > { %v4311_v1 = vpop.f32.mrb[16].mxu1  ;;  %v8070_v51 = vsel %vm3497_vm1, %v3883_v63, %v3882_v28  ;;  %v3916_v13 = vsel %vm3494_vm15, %v3915_v35, %v7978_v29  ;;  %v3950_v55 = vsel %vm3494_vm15, %v3949_v17, %v7981_v61  ;;  %v3493_v53 = vrot.slane %v7996_v34, 2 }
 0x507   : > { %v3216_v15 = vadd.f32 %v4311_v1, %v7751_v24  ;;  %v3207_v57 = vpop.f32.mrb[17].mxu1  ;;  %v8079_v25 = vsel %vm3497_vm1, %v3917_v52, %v3916_v13  ;;  %v8082_v31 = vsel %vm3497_vm1, %v3951_v4, %v3950_v55  ;;  %v4019_v3 = vsel %vm3494_vm15, %v4018_v27, %v7986_v44 }
 0x508   : > { %v3208_v12 = vadd.f32 %v7751_v24, %v3207_v57  ;;  %v4312_v29 = vpop.f32.mrb[18].mxu1  ;;  %3611 = vrot.lane.b32.xlu0 %v3596_v60, %s5037_s29  ;;  %v8090_v61 = vsel %vm3497_vm1, %v7998_v16, %v4019_v3  ;;  %v3495_v34 = vsel %vm3494_vm15, %v3493_v53, %v7908_v58 }
 0x509   : > { %v3416_v18 = vadd.f32 %v7808_v47, %v3216_v15  ;;  %v3219_v59 = vadd.f32 %v4312_v29, %v7751_v24  ;;  %v3210_v20 = vpop.f32.mrb[19].mxu1  ;;  %v8097_v62 = vsel %vm3497_vm1, %v3496_v36, %v3495_v34 }
 0x50a   : > { %v3414_v44 = vadd.f32 %v7799_v30, %v3208_v12  ;;  %v3211_v9 = vadd.f32 %v7751_v24, %v3210_v20 }
 0x50b   : > { %v3448_v60 = vmax.f32 %v3416_v18, 0.0  ;;  %v3417_v41 = vadd.f32 %v7912_v43, %v3219_v59 }
 0x50c   : > { %v3446_v16 = vmax.f32 %v3414_v44, 0.0  ;;  %v3415_v38 = vadd.f32 %v7918_v23, %v3211_v9  ;;  %3645 = vrot.lane.b32.xlu0 %v3630_v56, %s5039_s12  ;;  %v3345_v44 = vpop.permute.xlu1 %3344 }
 0x50d   : > { %v3449_v58 = vmax.f32 %v3417_v41, 0.0  ;;  %v3700_v47 = vrot.slane %v3448_v60, 5  ;;  %v3564_v10 = vrot.slane %v3448_v60, 1  ;;  %v3598_v8 = vrot.slane %v3448_v60, 2 }
 0x50e   : > { %v3447_v46 = vmax.f32 %v3415_v38, 0.0  ;;  %v3699_v39 = vrot.slane %v3446_v16, 6  ;;  %v3529_v0 = vrot.slane %v3446_v16, 1  ;;  %v3563_v19 = vrot.slane %v3446_v16, 2 }
 0x50f   : > { %v3597_v26 = vrot.slane %v3446_v16, 3  ;;  %v3631_v30 = vrot.slane %v3446_v16, 4  ;;  %v3632_v6 = vrot.slane %v3448_v60, 3  ;;  %v3665_v33 = vrot.slane %v3446_v16, 5 }
 0x510   : > { %3679 = vrot.lane.b32.xlu0 %v3664_v49, %s5041_s16  ;;  %v8106_v43 = vsel %vm3479_vm0, %v3700_v47, %v3699_v39  ;;  %v8109_v23 = vsel %vm3479_vm0, %v3448_v60, %v3529_v0  ;;  %v3565_v56 = vsel %vm3479_vm0, %v3564_v10, %v3563_v19  ;;  %v3666_v42 = vrot.slane %v3448_v60, 4  ;;  %v3349_v19 = vpop.permute.xlu1 %3348 }
 0x511   : > { %v8113_v11 = vsel %vm3479_vm0, %v3598_v8, %v3597_v26  ;;  %v8116_v21 = vsel %vm3479_vm0, %v3632_v6, %v3631_v30  ;;  %v3733_v32 = vrot.slane %v3446_v16, 7  ;;  %v3734_v63 = vrot.slane %v3448_v60, 6 }
 0x512   : > { %v8119_v35 = vsel %vm3479_vm0, %v3666_v42, %v3665_v33  ;;  %v3987_v49 = vrot.slane %v3447_v46, 6  ;;  %v3988_v52 = vrot.slane %v3449_v58, 5  ;;  %v3783_v17 = vrot.slane %v3449_v58, 7 }
 0x513   : > { %v8122_v28 = vsel %vm3479_vm0, %v3734_v63, %v3733_v32  ;;  %v3817_v4 = vrot.slane %v3447_v46, 1  ;;  %v3851_v27 = vrot.slane %v3447_v46, 2  ;;  %v3852_v36 = vrot.slane %v3449_v58, 1 }
 0x514   : > { %3747 = vrot.lane.b32.xlu0 %v8046_v14, %s5042_s17  ;;  %v8127_v1 = vsel %vm3479_vm0, %v3988_v52, %v3987_v49  ;;  %v8130_v13 = vsel %vm3479_vm0, %v3783_v17, %v3447_v46  ;;  %v3885_v55 = vrot.slane %v3447_v46, 3  ;;  %v3886_v53 = vrot.slane %v3449_v58, 2 }
 0x515   : > { %v8133_v15 = vsel %vm3479_vm0, %v3449_v58, %v3817_v4  ;;  %v8136_v57 = vsel %vm3479_vm0, %v3852_v36, %v3851_v27  ;;  %v3919_v3 = vrot.slane %v3447_v46, 4  ;;  %v3920_v12 = vrot.slane %v3449_v58, 3 }
 0x516   : > { %v8139_v29 = vsel %vm3479_vm0, %v3886_v53, %v3885_v55  ;;  %v3953_v14 = vrot.slane %v3447_v46, 5  ;;  %v3954_v34 = vrot.slane %v3449_v58, 4  ;;  %v4021_v18 = vrot.slane %v3447_v46, 7 }
 0x517   : > { %v8142_v59 = vsel %vm3479_vm0, %v3920_v12, %v3919_v3  ;;  %v4022_v20 = vrot.slane %v3449_v58, 6  ;;  %v3499_v41 = vrot.slane %v3448_v60, 7 }
 0x518   : > { %4001 = vrot.lane.b32.xlu0 %v8040_v48, %s5045_s21  ;;  %v8147_v9 = vsel %vm3479_vm0, %v3954_v34, %v3953_v14 }
 0x519   : > { %v8150_v38 = vsel %vm3479_vm0, %v4022_v20, %v4021_v18  ;;  %v8153_v10 = vsel %vm3479_vm0, %v3499_v41, %v3446_v16  ;;  %vm4059_vm0 = vcmask 654336  }
 0x51a   : > { %v4315_v47 = vpop.f32.mrb[20].mxu1 }
 0x51b   : > { %v3232_v8 = vadd.f32 %v4315_v47, %v7751_v24  ;;  %v3223_v46 = vpop.f32.mrb[21].mxu1 }
 0x51c   : > { %v3224_v58 = vadd.f32 %v7751_v24, %v3223_v46  ;;  %v4316_v39 = vpop.f32.mrb[22].mxu1  ;;  %3797 = vrot.lane.b32.xlu0 %v8049_v7, %s5043_s20 }
 0x51d   : > { %v3420_v48 = vadd.f32 %v7839_v2, %v3232_v8  ;;  %v3235_v60 = vadd.f32 %v4316_v39, %v7751_v24  ;;  %v3226_v0 = vpop.f32.mrb[23].mxu1 }
 0x51e   : > { %v3418_v26 = vadd.f32 %v7821_v54, %v3224_v58  ;;  %v3227_v16 = vadd.f32 %v7751_v24, %v3226_v0 }
 0x51f   : > { %v8163_v30 = vmax.f32 %v3420_v48, 0.0  ;;  %v3421_v6 = vadd.f32 %v3349_v19, %v3235_v60 }
 0x520   : > { %v8165_v33 = vmax.f32 %v3418_v26, 0.0  ;;  %v3419_v42 = vadd.f32 %v3345_v44, %v3227_v16  ;;  %3831 = vrot.lane.b32.xlu0 %v8055_v22, %s5046_s22  ;;  %v3353_v16 = vpop.permute.xlu1 %3352 }
 0x521   : > { %v8169_v7 = vmax.f32 %v3421_v6, 0.0  ;;  %v3704_v2 = vrot.slane %v8163_v30, 3  ;;  %v3533_v32 = vrot.slane %v8163_v30, 6  ;;  %v3567_v54 = vrot.slane %v8163_v30, 7 }
 0x522   : > { %v8174_v63 = vmax.f32 %v3419_v42, 0.0  ;;  %v3702_v24 = vrot.slane %v8165_v33, 4  ;;  %v3531_v49 = vrot.slane %v8165_v33, 7  ;;  %v3566_v52 = vsel %vm3482_vm4, %v8165_v33, %v3565_v56 }
 0x523   : > { %v8181_v17 = vsel %vm3485_vm9, %v3567_v54, %v3566_v52  ;;  %v3600_v22 = vrot.slane %v8165_v33, 1  ;;  %v3634_v4 = vrot.slane %v8165_v33, 2  ;;  %v3636_v27 = vrot.slane %v8163_v30, 1 }
 0x524   : > { %3865 = vrot.lane.b32.xlu0 %v8062_v45, %s5047_s23  ;;  %v3703_v36 = vsel %vm3482_vm4, %v3702_v24, %v8106_v43  ;;  %v3532_v55 = vsel %vm3482_vm4, %v3531_v49, %v8109_v23  ;;  %v3668_v56 = vrot.slane %v8165_v33, 3  ;;  %v3670_v53 = vrot.slane %v8163_v30, 2 }
 0x525   : > { %v8195_v3 = vsel %vm3485_vm9, %v3704_v2, %v3703_v36  ;;  %v8198_v12 = vsel %vm3485_vm9, %v3533_v32, %v3532_v55  ;;  %v3601_v14 = vsel %vm3482_vm4, %v3600_v22, %v8113_v11  ;;  %v3635_v45 = vsel %vm3482_vm4, %v3634_v4, %v8116_v21 }
 0x526   : > { %v8206_v43 = vsel %vm3485_vm9, %v8163_v30, %v3601_v14  ;;  %v8209_v23 = vsel %vm3485_vm9, %v3636_v27, %v3635_v45  ;;  %v3669_v34 = vsel %vm3482_vm4, %v3668_v56, %v8119_v35  ;;  %v3736_v18 = vrot.slane %v8165_v33, 5 }
 0x527   : > { %v8215_v20 = vsel %vm3485_vm9, %v3670_v53, %v3669_v34  ;;  %v3738_v11 = vrot.slane %v8163_v30, 4  ;;  %v3990_v44 = vrot.slane %v8174_v63, 4  ;;  %v3992_v21 = vrot.slane %v8169_v7, 3 }
 0x528   : > { %3899 = vrot.lane.b32.xlu0 %v8070_v51, %s5048_s24  ;;  %v3737_v41 = vsel %vm3482_vm4, %v3736_v18, %v8122_v28  ;;  %v3785_v35 = vrot.slane %v8174_v63, 6  ;;  %v3787_v47 = vrot.slane %v8169_v7, 5  ;;  %v3819_v8 = vrot.slane %v8174_v63, 7 }
 0x529   : > { %v8228_v46 = vsel %vm3485_vm9, %v3738_v11, %v3737_v41  ;;  %v3991_v58 = vsel %vm3482_vm4, %v3990_v44, %v8127_v1  ;;  %v3821_v39 = vrot.slane %v8169_v7, 6  ;;  %v3854_v51 = vsel %vm3482_vm4, %v8174_v63, %v8136_v57 }
 0x52a   : > { %v8237_v28 = vsel %vm3485_vm9, %v3992_v21, %v3991_v58  ;;  %v3786_v48 = vsel %vm3482_vm4, %v3785_v35, %v8130_v13  ;;  %v3820_v60 = vsel %vm3482_vm4, %v3819_v8, %v8133_v15  ;;  %v3855_v0 = vrot.slane %v8169_v7, 7 }
 0x52b   : > { %v8245_v19 = vsel %vm3485_vm9, %v3787_v47, %v3786_v48  ;;  %v8248_v1 = vsel %vm3485_vm9, %v3821_v39, %v3820_v60  ;;  %v3888_v26 = vrot.slane %v8174_v63, 1  ;;  %v3922_v57 = vrot.slane %v8174_v63, 2 }
 0x52c   : > { %3933 = vrot.lane.b32.xlu0 %v8079_v25, %s5049_s26  ;;  %v8255_v13 = vsel %vm3485_vm9, %v3855_v0, %v3854_v51  ;;  %v3924_v15 = vrot.slane %v8169_v7, 1  ;;  %v3956_v6 = vrot.slane %v8174_v63, 3  ;;  %v3958_v32 = vrot.slane %v8169_v7, 2 }
 0x52d   : > { %v3889_v42 = vsel %vm3482_vm4, %v3888_v26, %v8139_v29  ;;  %v3923_v2 = vsel %vm3482_vm4, %v3922_v57, %v8142_v59  ;;  %v4024_v54 = vrot.slane %v8174_v63, 5  ;;  %v4026_v29 = vrot.slane %v8169_v7, 4  ;;  %v8278_v59 = vld [vmem:[%s8560_s4] ss:$0 sm:$0xff] }
 0x52e   : > { %v4319_v24 = vpop.f32.mrb[24].mxu1  ;;  %v8267_v25 = vsel %vm3485_vm9, %v8169_v7, %v3889_v42  ;;  %v8270_v49 = vsel %vm3485_vm9, %v3924_v15, %v3923_v2  ;;  %v3957_v52 = vsel %vm3482_vm4, %v3956_v6, %v8147_v9  ;;  %v3501_v7 = vrot.slane %v8165_v33, 6 }
 0x52f   : > { %v3248_v63 = vadd.f32 %v8278_v59, %v4319_v24  ;;  %v3239_v22 = vpop.f32.mrb[25].mxu1  ;;  %v8282_v4 = vsel %vm3485_vm9, %v3958_v32, %v3957_v52  ;;  %v4025_v27 = vsel %vm3482_vm4, %v4024_v54, %v8150_v38  ;;  %v3503_v45 = vrot.slane %v8163_v30, 5  ;;  %v3357_v38 = vpop.permute.xlu1 %3356 }
 0x530   : > { %v3240_v36 = vadd.f32 %v8278_v59, %v3239_v22  ;;  %v4320_v55 = vpop.f32.mrb[26].mxu1  ;;  %3967 = vrot.lane.b32.xlu0 %v8082_v31, %s5050_s6  ;;  %v8290_v9 = vsel %vm3485_vm9, %v4026_v29, %v4025_v27  ;;  %v3502_v31 = vsel %vm3482_vm4, %v3501_v7, %v8153_v10  ;;  %vm4062_vm4 = vcmask 719872  }
 0x531   : > { %v3424_v56 = vadd.f32 %v7869_v40, %v3248_v63  ;;  %v3251_v53 = vadd.f32 %v8278_v59, %v4320_v55  ;;  %v3242_v14 = vpop.f32.mrb[27].mxu1  ;;  %v8303_v33 = vsel %vm3485_vm9, %v3503_v45, %v3502_v31  ;;  %vm4065_vm9 = vcmask 785408  }
 0x532   : > { %v3422_v34 = vadd.f32 %v7856_v50, %v3240_v36  ;;  %v3243_v18 = vadd.f32 %v8278_v59, %v3242_v14 }
 0x533   : > { %v8300_v11 = vmax.f32 %v3424_v56, 0.0  ;;  %v3425_v44 = vadd.f32 %v3357_v38, %v3251_v53  ;;  %v3361_v38 = vpop.permute.xlu1 %3360 }
 0x534   : > { %v8305_v40 = vmax.f32 %v3422_v34, 0.0  ;;  %v3423_v21 = vadd.f32 %v3353_v16, %v3243_v18  ;;  %4035 = vrot.lane.b32.xlu0 %v8090_v61, %s5044_s11 }
 0x535   : > { %v8309_v30 = vmax.f32 %v3425_v44, 0.0  ;;  %v3708_v50 = vrot.slane %v8300_v11, 1  ;;  %v3537_v41 = vrot.slane %v8300_v11, 4  ;;  %v3571_v10 = vrot.slane %v8300_v11, 5 }
 0x536   : > { %v3455_v35 = vmax.f32 %v3423_v21, 0.0  ;;  %v3706_v47 = vrot.slane %v8305_v40, 2  ;;  %v3535_v8 = vrot.slane %v8305_v40, 5  ;;  %v3569_v58 = vrot.slane %v8305_v40, 6 }
 0x537   : > { %v3603_v39 = vrot.slane %v8305_v40, 7  ;;  %v3605_v51 = vrot.slane %v8300_v11, 6  ;;  %v3638_v61 = vsel %vm3488_vm11, %v8305_v40, %v8209_v23  ;;  %v3639_v48 = vrot.slane %v8300_v11, 7 }
 0x538   : > { %v3707_v60 = vsel %vm3488_vm11, %v3706_v47, %v8195_v3  ;;  %v3536_v0 = vsel %vm3488_vm11, %v3535_v8, %v8198_v12  ;;  %v3570_v26 = vsel %vm3488_vm11, %v3569_v58, %v8181_v17  ;;  %v3672_v57 = vrot.slane %v8305_v40, 1 }
 0x539   : > { %v8331_v16 = vsel %vm3491_vm13, %v3708_v50, %v3707_v60  ;;  %v8334_v15 = vsel %vm3491_vm13, %v3537_v41, %v3536_v0  ;;  %v8337_v23 = vsel %vm3491_vm13, %v3571_v10, %v3570_v26  ;;  %v3604_v3 = vsel %vm3488_vm11, %v3603_v39, %v8206_v43  ;;  %v3365_v0 = vpop.permute.xlu1 %3364 }
 0x53a   : > { %v8342_v6 = vsel %vm3491_vm13, %v3605_v51, %v3604_v3  ;;  %v8345_v12 = vsel %vm3491_vm13, %v3639_v48, %v3638_v61  ;;  %v3673_v17 = vsel %vm3488_vm11, %v3672_v57, %v8215_v20  ;;  %v3740_v42 = vrot.slane %v8305_v40, 3 }
 0x53b   : > { %v8352_v2 = vsel %vm3491_vm13, %v8300_v11, %v3673_v17  ;;  %v3742_v32 = vrot.slane %v8300_v11, 2  ;;  %v3994_v54 = vrot.slane %v3455_v35, 2  ;;  %v3996_v43 = vrot.slane %v8309_v30, 1 }
 0x53c   : > { %v3741_v24 = vsel %vm3488_vm11, %v3740_v42, %v8228_v46  ;;  %v3789_v52 = vrot.slane %v3455_v35, 4  ;;  %v3791_v29 = vrot.slane %v8309_v30, 3  ;;  %v3823_v63 = vrot.slane %v3455_v35, 5 }
 0x53d   : > { %v8360_v20 = vsel %vm3491_vm13, %v3742_v32, %v3741_v24  ;;  %v3995_v22 = vsel %vm3488_vm11, %v3994_v54, %v8237_v28  ;;  %v3825_v27 = vrot.slane %v8309_v30, 4  ;;  %v3857_v36 = vrot.slane %v3455_v35, 6 }
 0x53e   : > { %v8366_v55 = vsel %vm3491_vm13, %v3996_v43, %v3995_v22  ;;  %v3790_v7 = vsel %vm3488_vm11, %v3789_v52, %v8245_v19  ;;  %v3824_v46 = vsel %vm3488_vm11, %v3823_v63, %v8248_v1  ;;  %v3859_v56 = vrot.slane %v8309_v30, 5 }
 0x53f   : > { %v8374_v53 = vsel %vm3491_vm13, %v3791_v29, %v3790_v7  ;;  %v8377_v14 = vsel %vm3491_vm13, %v3825_v27, %v3824_v46  ;;  %v3858_v28 = vsel %vm3488_vm11, %v3857_v36, %v8255_v13  ;;  %v3891_v45 = vrot.slane %v3455_v35, 7 }
 0x540   : > { %v8382_v34 = vsel %vm3491_vm13, %v3859_v56, %v3858_v28  ;;  %v3893_v19 = vrot.slane %v8309_v30, 6  ;;  %v3926_v1 = vsel %vm3488_vm11, %v3455_v35, %v8270_v49  ;;  %v3927_v18 = vrot.slane %v8309_v30, 7 }
 0x541   : > { %v3892_v31 = vsel %vm3488_vm11, %v3891_v45, %v8267_v25  ;;  %v3960_v44 = vrot.slane %v3455_v35, 1  ;;  %v4028_v21 = vrot.slane %v3455_v35, 3  ;;  %v4030_v10 = vrot.slane %v8309_v30, 2 }
 0x542   : > { %v4323_v50 = vpop.f32.mrb[28].mxu1  ;;  %v8391_v13 = vsel %vm3491_vm13, %v3893_v19, %v3892_v31  ;;  %v8394_v41 = vsel %vm3491_vm13, %v3927_v18, %v3926_v1  ;;  %v3505_v47 = vrot.slane %v8305_v40, 4  ;;  %v3507_v35 = vrot.slane %v8300_v11, 3 }
 0x543   : > { %v3264_v49 = vadd.f32 %v8278_v59, %v4323_v50  ;;  %v3255_v8 = vpop.f32.mrb[29].mxu1  ;;  %v3961_v58 = vsel %vm3488_vm11, %v3960_v44, %v8282_v4  ;;  %v4029_v25 = vsel %vm3488_vm11, %v4028_v21, %v8290_v9 }
 0x544   : > { %v3256_v39 = vadd.f32 %v8278_v59, %v3255_v8  ;;  %v4324_v51 = vpop.f32.mrb[30].mxu1  ;;  %v8407_v61 = vsel %vm3491_vm13, %v8309_v30, %v3961_v58  ;;  %v8410_v40 = vsel %vm3491_vm13, %v4030_v10, %v4029_v25  ;;  %v3506_v48 = vsel %vm3488_vm11, %v3505_v47, %v8303_v33 }
 0x545   : > { %v3428_v4 = vadd.f32 %v7905_v5, %v3264_v49  ;;  %v3267_v60 = vadd.f32 %v8278_v59, %v4324_v51  ;;  %v3258_v9 = vpop.f32.mrb[31].mxu1  ;;  %v8417_v11 = vsel %vm3491_vm13, %v3507_v35, %v3506_v48  ;;  %vm4068_vm11 = vcmask 850944  }
 0x546   : > { %v3426_v26 = vadd.f32 %v7895_v37, %v3256_v39  ;;  %v3259_v30 = vadd.f32 %v8278_v59, %v3258_v9  ;;  %vm4071_vm13 = vcmask 916480  }
 0x547   : > { %v8421_v57 = vmax.f32 %v3428_v4, 0.0  ;;  %v3429_v3 = vadd.f32 %v3365_v0, %v3267_v60 }
 0x548   : > { %v8423_v17 = vmax.f32 %v3426_v26, 0.0  ;;  %v3427_v42 = vadd.f32 %v3361_v38, %v3259_v30 }
 0x549   : > { %v8425_v33 = vmax.f32 %v3429_v3, 0.0  ;;  %v3711_v5 = vrot.slane %v8421_v57, 7  ;;  %v3541_v32 = vrot.slane %v8421_v57, 2  ;;  %v3575_v54 = vrot.slane %v8421_v57, 3 }
 0x54a   : > { %v3459_v43 = vmax.f32 %v3427_v42, 0.0  ;;  %v3710_v37 = vsel %vm3494_vm15, %v8423_v17, %v8331_v16  ;;  %v3539_v59 = vrot.slane %v8423_v17, 3  ;;  %v3573_v24 = vrot.slane %v8423_v17, 4 }
 0x54b   : > { %v3712_v52 = vsel %vm3497_vm1, %v3711_v5, %v3710_v37  ;;  %v3607_v29 = vrot.slane %v8423_v17, 5  ;;  %v3609_v63 = vrot.slane %v8421_v57, 4  ;;  %v3641_v22 = vrot.slane %v8423_v17, 6 }
 0x54c   : > { %3715 = vrot.lane.b32.xlu1 %v3712_v52, %s5040_s15  ;;  %v3540_v27 = vsel %vm3494_vm15, %v3539_v59, %v8334_v15  ;;  %v3574_v16 = vsel %vm3494_vm15, %v3573_v24, %v8337_v23  ;;  %v3643_v36 = vrot.slane %v8421_v57, 5  ;;  %v3675_v7 = vrot.slane %v8423_v17, 7 }
 0x54d   : > { %v3542_v46 = vsel %vm3497_vm1, %v3541_v32, %v3540_v27  ;;  %v3576_v56 = vsel %vm3497_vm1, %v3575_v54, %v3574_v16  ;;  %v3608_v28 = vsel %vm3494_vm15, %v3607_v29, %v8342_v6  ;;  %v3642_v45 = vsel %vm3494_vm15, %v3641_v22, %v8345_v12 }
 0x54e   : > { %v3610_v38 = vsel %vm3497_vm1, %v3609_v63, %v3608_v28  ;;  %v3644_v15 = vsel %vm3497_vm1, %v3643_v36, %v3642_v45  ;;  %v3676_v23 = vsel %vm3494_vm15, %v3675_v7, %v8352_v2  ;;  %v3677_v19 = vrot.slane %v8421_v57, 6 }
 0x54f   : > { %v3744_v1 = vrot.slane %v8423_v17, 1  ;;  %v3998_v18 = vsel %vm3494_vm15, %v3459_v43, %v8366_v55  ;;  %v3999_v31 = vrot.slane %v8425_v33, 7  ;;  %v3793_v6 = vrot.slane %v3459_v43, 2 }
 0x550   : > { %3545 = vrot.lane.b32.xlu1 %v3542_v46, %s5033_s25  ;;  %v3678_v12 = vsel %vm3497_vm1, %v3677_v19, %v3676_v23  ;;  %v3795_v44 = vrot.slane %v8425_v33, 1  ;;  %v3827_v21 = vrot.slane %v3459_v43, 3  ;;  %v3829_v50 = vrot.slane %v8425_v33, 2  ;;  %s4204_s25 = sshll.u32 %s8966_s19, 4 }
 0x551   : > { %v3745_v2 = vsel %vm3494_vm15, %v3744_v1, %v8360_v20  ;;  %v4000_v10 = vsel %vm3497_vm1, %v3999_v31, %v3998_v18  ;;  %v3794_v55 = vsel %vm3494_vm15, %v3793_v6, %v8374_v53  ;;  %v3861_v47 = vrot.slane %v3459_v43, 4 }
 0x552   : > { %v3746_v49 = vsel %vm3497_vm1, %v8421_v57, %v3745_v2  ;;  %v3796_v8 = vsel %vm3497_vm1, %v3795_v44, %v3794_v55  ;;  %v3828_v58 = vsel %vm3494_vm15, %v3827_v21, %v8377_v14  ;;  %v3863_v25 = vrot.slane %v8425_v33, 3 }
 0x553   : > { %v3830_v35 = vsel %vm3497_vm1, %v3829_v50, %v3828_v58  ;;  %v3862_v20 = vsel %vm3494_vm15, %v3861_v47, %v8382_v34  ;;  %v3895_v39 = vrot.slane %v3459_v43, 5  ;;  %v3897_v51 = vrot.slane %v8425_v33, 4 }
 0x554   : > { %3579 = vrot.lane.b32.xlu1 %v3576_v56, %s5035_s27  ;;  %v3864_v53 = vsel %vm3497_vm1, %v3863_v25, %v3862_v20  ;;  %v3929_v48 = vrot.slane %v3459_v43, 6  ;;  %v3963_v4 = vrot.slane %v3459_v43, 7  ;;  %v3931_v14 = vrot.slane %v8425_v33, 5 }
 0x555   : > { %v3896_v60 = vsel %vm3494_vm15, %v3895_v39, %v8391_v13  ;;  %v3965_v9 = vrot.slane %v8425_v33, 6  ;;  %v4032_v0 = vrot.slane %v3459_v43, 1  ;;  %v3509_v3 = vrot.slane %v8423_v17, 2 }
 0x556   : > { %v3898_v26 = vsel %vm3497_vm1, %v3897_v51, %v3896_v60  ;;  %v3930_v34 = vsel %vm3494_vm15, %v3929_v48, %v8394_v41  ;;  %v3964_v30 = vsel %vm3494_vm15, %v3963_v4, %v8407_v61  ;;  %v3511_v32 = vrot.slane %v8421_v57, 1 }
 0x557   : > { %v3932_v42 = vsel %vm3497_vm1, %v3931_v14, %v3930_v34  ;;  %v3966_v5 = vsel %vm3497_vm1, %v3965_v9, %v3964_v30  ;;  %v4033_v13 = vsel %vm3494_vm15, %v4032_v0, %v8410_v40  ;;  %v3510_v41 = vsel %vm3494_vm15, %v3509_v3, %v8417_v11 }
 0x558   : > { %3613 = vrot.lane.b32.xlu1 %v3610_v38, %s5037_s29  ;;  %v4034_v54 = vsel %vm3497_vm1, %v8425_v33, %v4033_v13  ;;  %v3512_v61 = vsel %vm3497_vm1, %v3511_v32, %v3510_v41  ;;  %vm4074_vm15 = vcmask 982016  }
 0x55c   : > { %3647 = vrot.lane.b32.xlu1 %v3644_v15, %s5039_s12  ;;  %s8532_s12 = scalar_lea.vmem %s8561_s5, %s4204_s25 }
 0x560   : > { %3681 = vrot.lane.b32.xlu1 %v3678_v12, %s5041_s16 }
 0x564   : > { %3749 = vrot.lane.b32.xlu1 %v3746_v49, %s5042_s17 }
 0x568   : > { %4003 = vrot.lane.b32.xlu1 %v4000_v10, %s5045_s21 }
 0x56c   : > { %3799 = vrot.lane.b32.xlu1 %v3796_v8, %s5043_s20 }
 0x56e   : > { %v3714_v40 = vpop.permute.xlu0 %3713 }
 0x570   : > { %3833 = vrot.lane.b32.xlu1 %v3830_v35, %s5046_s22 }
 0x572   : > { %v3544_v57 = vpop.permute.xlu0 %3543 }
 0x573   : > { %v4041_v29 = vsel %vm1108_vm7, %v8097_v62, %v3544_v57 }
 0x574   : > { %3867 = vrot.lane.b32.xlu1 %v3864_v53, %s5047_s23 }
 0x576   : > { %v3578_v17 = vpop.permute.xlu0 %3577 }
 0x577   : > { %v4043_v63 = vsel %vm1174_vm10, %v4041_v29, %v3578_v17 }
 0x578   : > { %3901 = vrot.lane.b32.xlu1 %v3898_v26, %s5048_s24 }
 0x57a   : > { %v3612_v11 = vpop.permute.xlu0 %3611 }
 0x57b   : > { %v4045_v27 = vsel %vm1240_vm12, %v4043_v63, %v3612_v11 }
 0x57c   : > { %3935 = vrot.lane.b32.xlu1 %v3932_v42, %s5049_s26 }
 0x57e   : > { %v3646_v33 = vpop.permute.xlu0 %3645 }
 0x57f   : > { %v4047_v16 = vsel %vm1306_vm14, %v4045_v27, %v3646_v33 }
 0x580   : > { %3969 = vrot.lane.b32.xlu1 %v3966_v5, %s5050_s6 }
 0x582   : > { %v3680_v43 = vpop.permute.xlu0 %3679 }
 0x583   : > { %v4049_v36 = vsel %vm2865_vm2, %v4047_v16, %v3680_v43 }
 0x584   : > { %4037 = vrot.lane.b32.xlu1 %v4034_v54, %s5044_s11  ;;  %v4051_v46 = vsel %vm2898_vm3, %v4049_v36, %v3714_v40 }
 0x586   : > { %v3748_v37 = vpop.permute.xlu0 %3747 }
 0x587   : > { %v4053_v56 = vsel %vm2931_vm5, %v4051_v46, %v3748_v37 }
 0x58a   : > { %v4002_v59 = vpop.permute.xlu0 %4001 }
 0x58e   : > { %v3798_v24 = vpop.permute.xlu0 %3797 }
 0x58f   : > { %v4055_v28 = vsel %vm2964_vm6, %v4053_v56, %v3798_v24 }
 0x592   : > { %v3832_v52 = vpop.permute.xlu0 %3831 }
 0x593   : > { %v4057_v45 = vsel %vm3056_vm8, %v4055_v28, %v3832_v52 }
 0x596   : > { %v3866_v22 = vpop.permute.xlu0 %3865 }
 0x597   : > { %v4060_v38 = vsel %vm4059_vm0, %v4057_v45, %v3866_v22 }
 0x59a   : > { %v3900_v7 = vpop.permute.xlu0 %3899 }
 0x59b   : > { %v4063_v15 = vsel %vm4062_vm4, %v4060_v38, %v3900_v7 }
 0x59e   : > { %v3934_v62 = vpop.permute.xlu0 %3933 }
 0x59f   : > { %v4066_v23 = vsel %vm4065_vm9, %v4063_v15, %v3934_v62 }
 0x5a2   : > { %v3968_v19 = vpop.permute.xlu0 %3967 }
 0x5a3   : > { %v4069_v1 = vsel %vm4068_vm11, %v4066_v23, %v3968_v19 }
 0x5a4   : > { %v4072_v31 = vsel %vm4071_vm13, %v4069_v1, %v4002_v59 }
 0x5a6   : > { %v4036_v18 = vpop.permute.xlu0 %4035 }
 0x5a7   : > { %v4075_v6 = vsel %vm4074_vm15, %v4072_v31, %v4036_v18 }
 0x5a8   : > { %4077 = vst [vmem:[%s8532_s12] sm:$0xff] %v4075_v6 }
 0x5be   : > { %v3716_v12 = vpop.permute.xlu1 %3715 }
 0x5c2   : > { %v3546_v44 = vpop.permute.xlu1 %3545 }
 0x5c3   : > { %v4042_v58 = vsel %vm1108_vm7, %v3512_v61, %v3546_v44 }
 0x5c6   : > { %v3580_v21 = vpop.permute.xlu1 %3579 }
 0x5c7   : > { %v4044_v25 = vsel %vm1174_vm10, %v4042_v58, %v3580_v21 }
 0x5ca   : > { %v3614_v50 = vpop.permute.xlu1 %3613 }
 0x5cb   : > { %v4046_v20 = vsel %vm1240_vm12, %v4044_v25, %v3614_v50 }
 0x5ce   : > { %v3648_v2 = vpop.permute.xlu1 %3647 }
 0x5cf   : > { %v4048_v39 = vsel %vm1306_vm14, %v4046_v20, %v3648_v2 }
 0x5d2   : > { %v3682_v10 = vpop.permute.xlu1 %3681 }
 0x5d3   : > { %v4050_v53 = vsel %vm2865_vm2, %v4048_v39, %v3682_v10 }
 0x5d4   : > { %v4052_v48 = vsel %vm2898_vm3, %v4050_v53, %v3716_v12 }
 0x5d6   : > { %v3750_v55 = vpop.permute.xlu1 %3749 }
 0x5d7   : > { %v4054_v4 = vsel %vm2931_vm5, %v4052_v48, %v3750_v55 }
 0x5da   : > { %v4004_v47 = vpop.permute.xlu1 %4003 }
 0x5de   : > { %v3800_v49 = vpop.permute.xlu1 %3799 }
 0x5df   : > { %v4056_v60 = vsel %vm2964_vm6, %v4054_v4, %v3800_v49 }
 0x5e2   : > { %v3834_v8 = vpop.permute.xlu1 %3833 }
 0x5e3   : > { %v4058_v9 = vsel %vm3056_vm8, %v4056_v60, %v3834_v8 }
 0x5e6   : > { %v3868_v35 = vpop.permute.xlu1 %3867 }
 0x5e7   : > { %v4061_v0 = vsel %vm4059_vm0, %v4058_v9, %v3868_v35 }
 0x5ea   : > { %v3902_v51 = vpop.permute.xlu1 %3901 }
 0x5eb   : > { %v4064_v26 = vsel %vm4062_vm4, %v4061_v0, %v3902_v51 }
 0x5ee   : > { %v3936_v14 = vpop.permute.xlu1 %3935 }
 0x5ef   : > { %v4067_v34 = vsel %vm4065_vm9, %v4064_v26, %v3936_v14 }
 0x5f2   : > { %v3970_v30 = vpop.permute.xlu1 %3969 }
 0x5f3   : > { %v4070_v3 = vsel %vm4068_vm11, %v4067_v34, %v3970_v30 }
 0x5f4   : > { %v4073_v5 = vsel %vm4071_vm13, %v4070_v3, %v4004_v47 }
 0x5f6   : > { %v4038_v42 = vpop.permute.xlu1 %4037 }
 0x5f7   : > { %v4076_v13 = vsel %vm4074_vm15, %v4073_v5, %v4038_v42 }
 0x5f8   : > { %4078 = vst [vmem:[%s8532_s12 + $0x8] sm:$0xff] %v4076_v13 }
 0x5f9 PF: > { %s15_s18 = sadd.s32 1, %s5028_s18  }
 0x5fa   : > { %p12_p4 = scmp.ge.s32.totalorder %s15_s18, 4  }
 0x5fc   :  { %14 = sbr.rel (!%p12_p4) target bundleno = 1 (0x1), region = 70 }

</bundles_post_ra>
